<compile_context>
chip_gen: v5e
topology: v5e:2x2
jax: 0.10.0
libtpu: 0.0.40
codegen_flags: <defaults>
</compile_context>

<pallas_src>
import functools

import jax
import jax.numpy as jnp
from jax.experimental import pallas as pl
from jax.experimental.pallas import tpu as pltpu


_LANE = 128
_VMEM_LIMIT = 48 * 1024 * 1024          # explicit scoped-VMEM limit (headroom on v7x)
_MATMUL_TILE_BUDGET = 24 * 1024 * 1024  # VMEM budget for the matmul tile buffers


def _round_up(x, m):
    return ((x + m - 1) // m) * m


# ----------------------------------------------------------------------------
# Matmul + bias (+ tanh) kernel: y = x @ w + b
#   grid = (M/tm, N/tn, K/tk); f32 VMEM accumulator revisited across k.
# ----------------------------------------------------------------------------
def _matmul_bias_kernel(x_ref, w_ref, b_ref, o_ref, acc_ref, *, apply_tanh):
    k = pl.program_id(2)

    @pl.when(k == 0)
    def _():
        acc_ref[...] = jnp.zeros_like(acc_ref)

    acc_ref[...] += jnp.dot(x_ref[...], w_ref[...],
                            preferred_element_type=jnp.float32)

    @pl.when(k == pl.num_programs(2) - 1)
    def _():
        out = acc_ref[...] + b_ref[...]
        if apply_tanh:
            out = jnp.tanh(out)
        o_ref[...] = out.astype(o_ref.dtype)


def matmul_bias(x, w, b, *, apply_tanh=False):
    """y = x @ w + b (optionally tanh).  x:(M,K)  w:(K,N)  b:(N,).

    MXU runs in bf16 with f32 accumulation; N is padded to a lane-dense
    multiple of 128; M/N/K are all tiled so VMEM use is O(tm*tk+tk*tn+tm*tn).
    """
    M, K = x.shape
    Kw, N = w.shape
    assert K == Kw and b.shape == (N,)

    # --- tile sizes (budget-aware) --------------------------------------
    Np = _round_up(N, _LANE)
    tn = 256 if Np % 256 == 0 else 128

    if K <= 512:
        tk = _round_up(K, _LANE)
        Kp = tk
    else:
        tk = 512
        Kp = _round_up(K, tk)

    # bytes ~= 2*tm*tk*2 (x bf16, dbl-buf) + 2*tk*tn*2 (w bf16, dbl-buf)
    #          + 2*tm*tn*4 (out f32, dbl-buf) + tm*tn*4 (acc scratch)
    avail = _MATMUL_TILE_BUDGET - 4 * tk * tn
    tm_budget = max(16, (avail // (4 * tk + 12 * tn)) // 16 * 16)
    tm = min(512, _round_up(M, 16), tm_budget)
    Mp = _round_up(M, tm)

    xp = jnp.pad(x, ((0, Mp - M), (0, Kp - K))).astype(jnp.bfloat16)
    wp = jnp.pad(w, ((0, Kp - K), (0, Np - N))).astype(jnp.bfloat16)
    bp = jnp.pad(b, (0, Np - N)).reshape(1, Np).astype(jnp.float32)

    out = pl.pallas_call(
        functools.partial(_matmul_bias_kernel, apply_tanh=apply_tanh),
        out_shape=jax.ShapeDtypeStruct((Mp, Np), jnp.float32),
        grid_spec=pltpu.PrefetchScalarGridSpec(
            num_scalar_prefetch=0,
            grid=(Mp // tm, Np // tn, Kp // tk),
            in_specs=[
                pl.BlockSpec((tm, tk), lambda i, j, k: (i, k)),   # activations
                pl.BlockSpec((tk, tn), lambda i, j, k: (k, j)),   # weights
                pl.BlockSpec((1, tn), lambda i, j, k: (0, j)),    # bias
            ],
            out_specs=pl.BlockSpec((tm, tn), lambda i, j, k: (i, j)),
            scratch_shapes=[pltpu.VMEM((tm, tn), jnp.float32)],
        ),
        compiler_params=pltpu.CompilerParams(
            dimension_semantics=("parallel", "parallel", "arbitrary"),
            vmem_limit_bytes=_VMEM_LIMIT),
    )(xp, wp, bp)
    return out[:M, :N]


# ----------------------------------------------------------------------------
# BatchNorm2d (training mode, biased variance, eps=1e-5, affine), tiled.
# ----------------------------------------------------------------------------
def _bn_stats_kernel(x_ref, sum_ref, sq_ref):
    @pl.when(pl.program_id(0) == 0)
    def _():
        sum_ref[...] = jnp.zeros_like(sum_ref)
        sq_ref[...] = jnp.zeros_like(sq_ref)

    x = x_ref[...].astype(jnp.float32)
    sum_ref[...] += jnp.sum(x, axis=0, keepdims=True)
    sq_ref[...] += jnp.sum(x * x, axis=0, keepdims=True)


def _bn_norm_kernel(x_ref, scale_ref, shift_ref, o_ref):
    o_ref[...] = (x_ref[...] * scale_ref[...] + shift_ref[...]).astype(o_ref.dtype)


def batchnorm2d(x_nhwc, gamma, beta, *, eps=1e-5):
    """Training-mode BatchNorm2d over the (N, H, W) axes of an NHWC tensor."""
    N, H, W, C = x_nhwc.shape
    M = N * H * W
    x2 = x_nhwc.reshape(M, C)

    tm = min(1024, _round_up(M, 8))
    Mp = _round_up(M, tm)
    xp = jnp.pad(x2, ((0, Mp - M), (0, 0)))      # zero rows: no effect on sums

    s, sq = pl.pallas_call(
        _bn_stats_kernel,
        out_shape=(jax.ShapeDtypeStruct((1, C), jnp.float32),
                   jax.ShapeDtypeStruct((1, C), jnp.float32)),
        grid=(Mp // tm,),
        in_specs=[pl.BlockSpec((tm, C), lambda i: (i, 0))],
        out_specs=[pl.BlockSpec((1, C), lambda i: (0, 0)),
                   pl.BlockSpec((1, C), lambda i: (0, 0))],
        compiler_params=pltpu.CompilerParams(
            dimension_semantics=("arbitrary",),
            vmem_limit_bytes=_VMEM_LIMIT),
    )(xp)

    mean = s / M                                       # (1, C)
    var = jnp.maximum(sq / M - mean * mean, 0.0)       # biased variance
    scale = gamma.reshape(1, C) * jax.lax.rsqrt(var + eps)
    shift = beta.reshape(1, C) - mean * scale

    y = pl.pallas_call(
        _bn_norm_kernel,
        out_shape=jax.ShapeDtypeStruct((Mp, C), x2.dtype),
        grid=(Mp // tm,),
        in_specs=[
            pl.BlockSpec((tm, C), lambda i: (i, 0)),
            pl.BlockSpec((1, C), lambda i: (0, 0)),
            pl.BlockSpec((1, C), lambda i: (0, 0)),
        ],
        out_specs=pl.BlockSpec((tm, C), lambda i: (i, 0)),
        compiler_params=pltpu.CompilerParams(
            dimension_semantics=("parallel",),
            vmem_limit_bytes=_VMEM_LIMIT),
    )(xp, scale, shift)
    return y[:M].reshape(N, H, W, C)


# ----------------------------------------------------------------------------
# ConvTranspose2d lowerings
# ----------------------------------------------------------------------------
def tconv_from_1x1(x_nhwc, w_pt, bias, *, apply_tanh=False):
    """ConvTranspose2d(k=4, s=1, p=0) on a 1x1 spatial input == one matmul.

    x_nhwc : (N, 1, 1, Cin)   w_pt : (Cin, Cout, kH, kW)   bias : (Cout,)
    """
    N, H, W, Cin = x_nhwc.shape
    assert H == 1 and W == 1
    _, Cout, kH, kW = w_pt.shape
    x2 = x_nhwc.reshape(N, Cin)
    # out[n, i, j, co] = sum_ci x[n, ci] * w_pt[ci, co, i, j] + b[co]
    w_mat = jnp.transpose(w_pt, (0, 2, 3, 1)).reshape(Cin, kH * kW * Cout)
    b_full = jnp.tile(bias, kH * kW)
    y = matmul_bias(x2, w_mat, b_full, apply_tanh=apply_tanh)
    return y.reshape(N, kH, kW, Cout)


def tconv_stride2(x_nhwc, w_pt, bias, *, apply_tanh=False):
    """ConvTranspose2d(k=4, s=2, p=1) via 4-phase sub-convolutions.

    Each output phase (a, b) = (oh%2, ow%2) is a stride-1 conv with a 2x2
    sub-kernel over the original input (padded by 1), so the stride-2
    dilation zeros are never materialized.
      out[n, 2m+a, 2w+b, co] =
        sum_{di,dj in {0,1}} xpad[n, m+a+di, w+b+dj, :] @ w_pt[:, co, 3-2*di-a, 3-2*dj-b]
    """
    N, H, W, Cin = x_nhwc.shape
    Cin_w, Cout, kH, kW = w_pt.shape
    assert (kH, kW) == (4, 4) and Cin_w == Cin
    xpad = jnp.pad(x_nhwc, ((0, 0), (1, 1), (1, 1), (0, 0)))

    phase_rows = []
    for a in (0, 1):
        row = []
        for bph in (0, 1):
            taps = [xpad[:, a + di:a + di + H, bph + dj:bph + dj + W, :]
                    for di in (0, 1) for dj in (0, 1)]
            patches = jnp.stack(taps, axis=3)               # (N, H, W, 4, Cin)
            patches = patches.reshape(N * H * W, 4 * Cin)
            w_taps = jnp.stack(
                [w_pt[:, :, 3 - 2 * di - a, 3 - 2 * dj - bph]
                 for di in (0, 1) for dj in (0, 1)], axis=0)  # (4, Cin, Cout)
            w_mat = w_taps.reshape(4 * Cin, Cout)
            y = matmul_bias(patches, w_mat, bias, apply_tanh=apply_tanh)
            row.append(y.reshape(N, H, W, Cout))
        phase_rows.append(jnp.stack(row, axis=0))            # (2, N, H, W, Cout)
    stacked = jnp.stack(phase_rows, axis=0)                  # (2, 2, N, H, W, Cout)
    out = jnp.transpose(stacked, (2, 3, 0, 4, 1, 5)).reshape(N, 2 * H, 2 * W, Cout)
    return out


# ----------------------------------------------------------------------------
# Generator
# ----------------------------------------------------------------------------
def init_generator_params(key, noise_dim, channels, out_channels=3):
    """Deterministic synthetic parameters (shapes follow the nn.Module)."""
    c1, c2, c3, c4 = channels
    dims = [(noise_dim, c1), (c1, c2), (c2, c3), (c3, c4), (c4, out_channels)]
    params = {}
    keys = jax.random.split(key, len(dims))
    for idx, ((cin, cout), k) in enumerate(zip(dims, keys), start=1):
        wkey, bkey = jax.random.split(k)
        params[f"w{idx}"] = 0.05 * jax.random.normal(
            wkey, (cin, cout, 4, 4), jnp.float32)
        params[f"b{idx}"] = 0.05 * jax.random.normal(
            bkey, (cout,), jnp.float32)
    for idx, c in enumerate((c1, c2, c3, c4), start=1):
        params[f"gamma{idx}"] = jnp.ones((c,), jnp.float32)
        params[f"beta{idx}"] = jnp.zeros((c,), jnp.float32)
    return params


def generator_forward(params, x_nchw):
    """x_nchw: (N, noise_dim, 1, 1) -> NCHW output, like the PyTorch module."""
    x = jnp.transpose(x_nchw, (0, 2, 3, 1))                   # NCHW -> NHWC
    x = tconv_from_1x1(x, params["w1"], params["b1"])         # 1x1 -> 4x4
    x = batchnorm2d(x, params["gamma1"], params["beta1"])
    x = tconv_stride2(x, params["w2"], params["b2"])          # 4 -> 8
    x = batchnorm2d(x, params["gamma2"], params["beta2"])
    x = tconv_stride2(x, params["w3"], params["b3"])          # 8 -> 16
    x = batchnorm2d(x, params["gamma3"], params["beta3"])
    x = tconv_stride2(x, params["w4"], params["b4"])          # 16 -> 32
    x = batchnorm2d(x, params["gamma4"], params["beta4"])
    x = tconv_stride2(x, params["w5"], params["b5"],          # 32 -> 64, + tanh
                      apply_tanh=True)
    return jnp.transpose(x, (0, 3, 1, 2))                     # NHWC -> NCHW


if __name__ == "__main__":
    key = jax.random.PRNGKey(0)
    pkey, xkey = jax.random.split(key)

    noise_dim = 16
    batch = 2
    # Small channel widths preserving the module's structure
    # (original 1024/512/256/128 scaled down for a quick synthetic run).
    channels = (32, 16, 8, 8)

    params = init_generator_params(pkey, noise_dim, channels, out_channels=3)
    x = jax.random.normal(xkey, (batch, noise_dim, 1, 1), jnp.float32)

    out = jax.jit(generator_forward)(params, x)
    out = jax.block_until_ready(out)

    assert out.shape == (batch, 3, 64, 64), out.shape
    assert bool(jnp.all(jnp.isfinite(out)))
    assert bool(jnp.all(jnp.abs(out) <= 1.0 + 1e-6))  # tanh range
    print("KERNEL_OK")
</pallas_src>

<mosaic_0001>
module attributes {stable_mosaic.version = 11 : i64} {
  func.func @_matmul_bias_kernel(%arg0: i32, %arg1: i32, %arg2: i32, %arg3: memref<16x128xbf16, #tpu.memory_space<vmem>>, %arg4: memref<128x256xbf16, #tpu.memory_space<vmem>>, %arg5: memref<1x256xf32, #tpu.memory_space<vmem>>, %arg6: memref<16x256xf32, #tpu.memory_space<vmem>>, %arg7: memref<16x256xf32, #tpu.memory_space<vmem>>) attributes {dimension_semantics = [#tpu.dimension_semantics<parallel>, #tpu.dimension_semantics<parallel>, #tpu.dimension_semantics<arbitrary>], iteration_bounds = array<i64: 1, 2, 1>, scalar_prefetch = 0 : i64, scratch_operands = 1 : i64, tpu.core_type = #tpu.core_type<tc>, window_params = [{transform_indices = @transform_0, window_bounds = array<i64: 16, 128>}, {transform_indices = @transform_1, window_bounds = array<i64: 128, 256>}, {transform_indices = @transform_2, window_bounds = array<i64: 1, 256>}, {transform_indices = @transform_3, window_bounds = array<i64: 16, 256>}]} {
    %c0_i32 = arith.constant 0 : i32
    %0 = arith.cmpi eq, %arg2, %c0_i32 : i32
    %1 = arith.extui %0 : i1 to i32
    %c0_i32_0 = arith.constant 0 : i32
    %2 = arith.cmpi ne, %1, %c0_i32_0 : i32
    scf.if %2 {
      %cst_10 = arith.constant 0.000000e+00 : f32
      %12 = vector.broadcast %cst_10 : f32 to vector<16x256xf32>
      %c0_11 = arith.constant 0 : index
      %c0_12 = arith.constant 0 : index
      %13 = vector.load %arg7[%c0_11, %c0_12] : memref<16x256xf32, #tpu.memory_space<vmem>>, vector<16x256xf32>
      tpu.vector_store %arg7[%c0_11, %c0_12], %12 {strides = array<i32>} : memref<16x256xf32, #tpu.memory_space<vmem>>, vector<16x256xf32>,
    } else {
    }
    %c0 = arith.constant 0 : index
    %c0_1 = arith.constant 0 : index
    %3 = vector.load %arg7[%c0, %c0_1] : memref<16x256xf32, #tpu.memory_space<vmem>>, vector<16x256xf32>
    %c0_2 = arith.constant 0 : index
    %c0_3 = arith.constant 0 : index
    %4 = vector.load %arg3[%c0_2, %c0_3] : memref<16x128xbf16, #tpu.memory_space<vmem>>, vector<16x128xbf16>
    %c0_4 = arith.constant 0 : index
    %c0_5 = arith.constant 0 : index
    %5 = vector.load %arg4[%c0_4, %c0_5] : memref<128x256xbf16, #tpu.memory_space<vmem>>, vector<128x256xbf16>
    %cst = arith.constant dense<0.000000e+00> : vector<16x256xf32>
    %6 = tpu.matmul %4, %5, %cst {dimension_numbers = #tpu.dot_dimension_numbers<[1], [0], [0], [1], [0, 0, 1, 1], [], []>} : vector<16x128xbf16>, vector<128x256xbf16>, vector<16x256xf32> -> vector<16x256xf32>
    %7 = arith.addf %3, %6 : vector<16x256xf32>
    %c0_6 = arith.constant 0 : index
    %c0_7 = arith.constant 0 : index
    %8 = vector.load %arg7[%c0_6, %c0_7] : memref<16x256xf32, #tpu.memory_space<vmem>>, vector<16x256xf32>
    tpu.vector_store %arg7[%c0_6, %c0_7], %7 {strides = array<i32>} : memref<16x256xf32, #tpu.memory_space<vmem>>, vector<16x256xf32>,
    %c0_i32_8 = arith.constant 0 : i32
    %9 = arith.cmpi eq, %arg2, %c0_i32_8 : i32
    %10 = arith.extui %9 : i1 to i32
    %c0_i32_9 = arith.constant 0 : i32
    %11 = arith.cmpi ne, %10, %c0_i32_9 : i32
    scf.if %11 {
      %c0_10 = arith.constant 0 : index
      %c0_11 = arith.constant 0 : index
      %12 = vector.load %arg7[%c0_10, %c0_11] : memref<16x256xf32, #tpu.memory_space<vmem>>, vector<16x256xf32>
      %c0_12 = arith.constant 0 : index
      %c0_13 = arith.constant 0 : index
      %13 = vector.load %arg5[%c0_12, %c0_13] : memref<1x256xf32, #tpu.memory_space<vmem>>, vector<1x256xf32>
      %14 = vector.broadcast %13 : vector<1x256xf32> to vector<16x256xf32>
      %15 = arith.addf %12, %14 : vector<16x256xf32>
      %c0_14 = arith.constant 0 : index
      %c0_15 = arith.constant 0 : index
      %16 = vector.load %arg6[%c0_14, %c0_15] : memref<16x256xf32, #tpu.memory_space<vmem>>, vector<16x256xf32>
      tpu.vector_store %arg6[%c0_14, %c0_15], %15 {strides = array<i32>} : memref<16x256xf32, #tpu.memory_space<vmem>>, vector<16x256xf32>,
    } else {
    }
    return
  }
  func.func @transform_0(%arg0: i32, %arg1: i32, %arg2: i32) -> (i32, i32) {
    %c0_i32 = arith.constant 0 : i32
    return %arg0, %arg2 : i32, i32
  }
  func.func @transform_1(%arg0: i32, %arg1: i32, %arg2: i32) -> (i32, i32) {
    %c0_i32 = arith.constant 0 : i32
    return %arg2, %arg1 : i32, i32
  }
  func.func @transform_2(%arg0: i32, %arg1: i32, %arg2: i32) -> (i32, i32) {
    %c0_i32 = arith.constant 0 : i32
    %c0_i32_0 = arith.constant 0 : i32
    return %c0_i32, %arg1 : i32, i32
  }
  func.func @transform_3(%arg0: i32, %arg1: i32, %arg2: i32) -> (i32, i32) {
    %c0_i32 = arith.constant 0 : i32
    return %arg0, %arg1 : i32, i32
  }
}

module attributes {stable_mosaic.version = 11 : i64} {
  func.func @_bn_norm_kernel(%arg0: i32, %arg1: memref<32x32xf32, #tpu.memory_space<vmem>>, %arg2: memref<1x32xf32, #tpu.memory_space<vmem>>, %arg3: memref<1x32xf32, #tpu.memory_space<vmem>>, %arg4: memref<32x32xf32, #tpu.memory_space<vmem>>) attributes {dimension_semantics = [#tpu.dimension_semantics<parallel>], iteration_bounds = array<i64: 1>, scalar_prefetch = 0 : i64, scratch_operands = 0 : i64, tpu.core_type = #tpu.core_type<tc>, window_params = [{transform_indices = @transform_0, window_bounds = array<i64: 32, 32>}, {pipeline_mode = #tpu.pipeline_mode<synchronous>, transform_indices = @transform_1, window_bounds = array<i64: 1, 32>}, {pipeline_mode = #tpu.pipeline_mode<synchronous>, transform_indices = @transform_2, window_bounds = array<i64: 1, 32>}, {transform_indices = @transform_3, window_bounds = array<i64: 32, 32>}]} {
    %c0 = arith.constant 0 : index
    %c0_0 = arith.constant 0 : index
    %0 = vector.load %arg1[%c0, %c0_0] : memref<32x32xf32, #tpu.memory_space<vmem>>, vector<32x32xf32>
    %c0_1 = arith.constant 0 : index
    %c0_2 = arith.constant 0 : index
    %1 = vector.load %arg2[%c0_1, %c0_2] : memref<1x32xf32, #tpu.memory_space<vmem>>, vector<1x32xf32>
    %2 = vector.broadcast %1 : vector<1x32xf32> to vector<32x32xf32>
    %3 = arith.mulf %0, %2 : vector<32x32xf32>
    %c0_3 = arith.constant 0 : index
    %c0_4 = arith.constant 0 : index
    %4 = vector.load %arg3[%c0_3, %c0_4] : memref<1x32xf32, #tpu.memory_space<vmem>>, vector<1x32xf32>
    %5 = vector.broadcast %4 : vector<1x32xf32> to vector<32x32xf32>
    %6 = arith.addf %3, %5 : vector<32x32xf32>
    %c0_5 = arith.constant 0 : index
    %c0_6 = arith.constant 0 : index
    %7 = vector.load %arg4[%c0_5, %c0_6] : memref<32x32xf32, #tpu.memory_space<vmem>>, vector<32x32xf32>
    tpu.vector_store %arg4[%c0_5, %c0_6], %6 {strides = array<i32>} : memref<32x32xf32, #tpu.memory_space<vmem>>, vector<32x32xf32>,
    return
  }
  func.func @transform_0(%arg0: i32) -> (i32, i32) {
    %c0_i32 = arith.constant 0 : i32
    %c0_i32_0 = arith.constant 0 : i32
    return %arg0, %c0_i32 : i32, i32
  }
  func.func @transform_1(%arg0: i32) -> (i32, i32) {
    %c0_i32 = arith.constant 0 : i32
    %c0_i32_0 = arith.constant 0 : i32
    %c0_i32_1 = arith.constant 0 : i32
    return %c0_i32, %c0_i32_0 : i32, i32
  }
  func.func @transform_2(%arg0: i32) -> (i32, i32) {
    %c0_i32 = arith.constant 0 : i32
    %c0_i32_0 = arith.constant 0 : i32
    %c0_i32_1 = arith.constant 0 : i32
    return %c0_i32, %c0_i32_0 : i32, i32
  }
  func.func @transform_3(%arg0: i32) -> (i32, i32) {
    %c0_i32 = arith.constant 0 : i32
    %c0_i32_0 = arith.constant 0 : i32
    return %arg0, %c0_i32 : i32, i32
  }
}

module attributes {stable_mosaic.version = 11 : i64} {
  func.func @_bn_stats_kernel(%arg0: i32, %arg1: memref<32x32xf32, #tpu.memory_space<vmem>>, %arg2: memref<1x32xf32, #tpu.memory_space<vmem>>, %arg3: memref<1x32xf32, #tpu.memory_space<vmem>>) attributes {dimension_semantics = [#tpu.dimension_semantics<arbitrary>], iteration_bounds = array<i64: 1>, scalar_prefetch = 0 : i64, scratch_operands = 0 : i64, tpu.core_type = #tpu.core_type<tc>, window_params = [{transform_indices = @transform_0, window_bounds = array<i64: 32, 32>}, {pipeline_mode = #tpu.pipeline_mode<synchronous>, transform_indices = @transform_1, window_bounds = array<i64: 1, 32>}, {pipeline_mode = #tpu.pipeline_mode<synchronous>, transform_indices = @transform_2, window_bounds = array<i64: 1, 32>}]} {
    %c0_i32 = arith.constant 0 : i32
    %0 = arith.cmpi eq, %arg0, %c0_i32 : i32
    %1 = arith.extui %0 : i1 to i32
    %c0_i32_0 = arith.constant 0 : i32
    %2 = arith.cmpi ne, %1, %c0_i32_0 : i32
    scf.if %2 {
      %cst_11 = arith.constant 0.000000e+00 : f32
      %15 = vector.broadcast %cst_11 : f32 to vector<1x32xf32>
      %c0_12 = arith.constant 0 : index
      %c0_13 = arith.constant 0 : index
      %16 = vector.load %arg2[%c0_12, %c0_13] : memref<1x32xf32, #tpu.memory_space<vmem>>, vector<1x32xf32>
      tpu.vector_store %arg2[%c0_12, %c0_13], %15 {strides = array<i32>} : memref<1x32xf32, #tpu.memory_space<vmem>>, vector<1x32xf32>,
      %cst_14 = arith.constant 0.000000e+00 : f32
      %17 = vector.broadcast %cst_14 : f32 to vector<1x32xf32>
      %c0_15 = arith.constant 0 : index
      %c0_16 = arith.constant 0 : index
      %18 = vector.load %arg3[%c0_15, %c0_16] : memref<1x32xf32, #tpu.memory_space<vmem>>, vector<1x32xf32>
      tpu.vector_store %arg3[%c0_15, %c0_16], %17 {strides = array<i32>} : memref<1x32xf32, #tpu.memory_space<vmem>>, vector<1x32xf32>,
    } else {
    }
    %c0 = arith.constant 0 : index
    %c0_1 = arith.constant 0 : index
    %3 = vector.load %arg1[%c0, %c0_1] : memref<32x32xf32, #tpu.memory_space<vmem>>, vector<32x32xf32>
    %c0_2 = arith.constant 0 : index
    %c0_3 = arith.constant 0 : index
    %4 = vector.load %arg2[%c0_2, %c0_3] : memref<1x32xf32, #tpu.memory_space<vmem>>, vector<1x32xf32>
    %cst = arith.constant dense<0.000000e+00> : vector<32xf32>
    %5 = vector.multi_reduction <add>, %3, %cst [0] : vector<32x32xf32> to vector<32xf32>
    %6 = vector.shape_cast %5 : vector<32xf32> to vector<1x32xf32>
    %7 = arith.addf %4, %6 : vector<1x32xf32>
    %c0_4 = arith.constant 0 : index
    %c0_5 = arith.constant 0 : index
    %8 = vector.load %arg2[%c0_4, %c0_5] : memref<1x32xf32, #tpu.memory_space<vmem>>, vector<1x32xf32>
    tpu.vector_store %arg2[%c0_4, %c0_5], %7 {strides = array<i32>} : memref<1x32xf32, #tpu.memory_space<vmem>>, vector<1x32xf32>,
    %c0_6 = arith.constant 0 : index
    %c0_7 = arith.constant 0 : index
    %9 = vector.load %arg3[%c0_6, %c0_7] : memref<1x32xf32, #tpu.memory_space<vmem>>, vector<1x32xf32>
    %10 = arith.mulf %3, %3 : vector<32x32xf32>
    %cst_8 = arith.constant dense<0.000000e+00> : vector<32xf32>
    %11 = vector.multi_reduction <add>, %10, %cst_8 [0] : vector<32x32xf32> to vector<32xf32>
    %12 = vector.shape_cast %11 : vector<32xf32> to vector<1x32xf32>
    %13 = arith.addf %9, %12 : vector<1x32xf32>
    %c0_9 = arith.constant 0 : index
    %c0_10 = arith.constant 0 : index
    %14 = vector.load %arg3[%c0_9, %c0_10] : memref<1x32xf32, #tpu.memory_space<vmem>>, vector<1x32xf32>
    tpu.vector_store %arg3[%c0_9, %c0_10], %13 {strides = array<i32>} : memref<1x32xf32, #tpu.memory_space<vmem>>, vector<1x32xf32>,
    return
  }
  func.func @transform_0(%arg0: i32) -> (i32, i32) {
    %c0_i32 = arith.constant 0 : i32
    %c0_i32_0 = arith.constant 0 : i32
    return %arg0, %c0_i32 : i32, i32
  }
  func.func @transform_1(%arg0: i32) -> (i32, i32) {
    %c0_i32 = arith.constant 0 : i32
    %c0_i32_0 = arith.constant 0 : i32
    %c0_i32_1 = arith.constant 0 : i32
    return %c0_i32, %c0_i32_0 : i32, i32
  }
  func.func @transform_2(%arg0: i32) -> (i32, i32) {
    %c0_i32 = arith.constant 0 : i32
    %c0_i32_0 = arith.constant 0 : i32
    %c0_i32_1 = arith.constant 0 : i32
    return %c0_i32, %c0_i32_0 : i32, i32
  }
}

module attributes {stable_mosaic.version = 11 : i64} {
  func.func @_matmul_bias_kernel(%arg0: i32, %arg1: i32, %arg2: i32, %arg3: memref<32x128xbf16, #tpu.memory_space<vmem>>, %arg4: memref<128x128xbf16, #tpu.memory_space<vmem>>, %arg5: memref<1x128xf32, #tpu.memory_space<vmem>>, %arg6: memref<32x128xf32, #tpu.memory_space<vmem>>, %arg7: memref<32x128xf32, #tpu.memory_space<vmem>>) attributes {dimension_semantics = [#tpu.dimension_semantics<parallel>, #tpu.dimension_semantics<parallel>, #tpu.dimension_semantics<arbitrary>], iteration_bounds = array<i64: 1, 1, 1>, scalar_prefetch = 0 : i64, scratch_operands = 1 : i64, tpu.core_type = #tpu.core_type<tc>, window_params = [{transform_indices = @transform_0, window_bounds = array<i64: 32, 128>}, {transform_indices = @transform_1, window_bounds = array<i64: 128, 128>}, {transform_indices = @transform_2, window_bounds = array<i64: 1, 128>}, {transform_indices = @transform_3, window_bounds = array<i64: 32, 128>}]} {
    %c0_i32 = arith.constant 0 : i32
    %0 = arith.cmpi eq, %arg2, %c0_i32 : i32
    %1 = arith.extui %0 : i1 to i32
    %c0_i32_0 = arith.constant 0 : i32
    %2 = arith.cmpi ne, %1, %c0_i32_0 : i32
    scf.if %2 {
      %cst_10 = arith.constant 0.000000e+00 : f32
      %12 = vector.broadcast %cst_10 : f32 to vector<32x128xf32>
      %c0_11 = arith.constant 0 : index
      %c0_12 = arith.constant 0 : index
      %13 = vector.load %arg7[%c0_11, %c0_12] : memref<32x128xf32, #tpu.memory_space<vmem>>, vector<32x128xf32>
      tpu.vector_store %arg7[%c0_11, %c0_12], %12 {strides = array<i32>} : memref<32x128xf32, #tpu.memory_space<vmem>>, vector<32x128xf32>,
    } else {
    }
    %c0 = arith.constant 0 : index
    %c0_1 = arith.constant 0 : index
    %3 = vector.load %arg7[%c0, %c0_1] : memref<32x128xf32, #tpu.memory_space<vmem>>, vector<32x128xf32>
    %c0_2 = arith.constant 0 : index
    %c0_3 = arith.constant 0 : index
    %4 = vector.load %arg3[%c0_2, %c0_3] : memref<32x128xbf16, #tpu.memory_space<vmem>>, vector<32x128xbf16>
    %c0_4 = arith.constant 0 : index
    %c0_5 = arith.constant 0 : index
    %5 = vector.load %arg4[%c0_4, %c0_5] : memref<128x128xbf16, #tpu.memory_space<vmem>>, vector<128x128xbf16>
    %cst = arith.constant dense<0.000000e+00> : vector<32x128xf32>
    %6 = tpu.matmul %4, %5, %cst {dimension_numbers = #tpu.dot_dimension_numbers<[1], [0], [0], [1], [0, 0, 1, 1], [], []>} : vector<32x128xbf16>, vector<128x128xbf16>, vector<32x128xf32> -> vector<32x128xf32>
    %7 = arith.addf %3, %6 : vector<32x128xf32>
    %c0_6 = arith.constant 0 : index
    %c0_7 = arith.constant 0 : index
    %8 = vector.load %arg7[%c0_6, %c0_7] : memref<32x128xf32, #tpu.memory_space<vmem>>, vector<32x128xf32>
    tpu.vector_store %arg7[%c0_6, %c0_7], %7 {strides = array<i32>} : memref<32x128xf32, #tpu.memory_space<vmem>>, vector<32x128xf32>,
    %c0_i32_8 = arith.constant 0 : i32
    %9 = arith.cmpi eq, %arg2, %c0_i32_8 : i32
    %10 = arith.extui %9 : i1 to i32
    %c0_i32_9 = arith.constant 0 : i32
    %11 = arith.cmpi ne, %10, %c0_i32_9 : i32
    scf.if %11 {
      %c0_10 = arith.constant 0 : index
      %c0_11 = arith.constant 0 : index
      %12 = vector.load %arg7[%c0_10, %c0_11] : memref<32x128xf32, #tpu.memory_space<vmem>>, vector<32x128xf32>
      %c0_12 = arith.constant 0 : index
      %c0_13 = arith.constant 0 : index
      %13 = vector.load %arg5[%c0_12, %c0_13] : memref<1x128xf32, #tpu.memory_space<vmem>>, vector<1x128xf32>
      %14 = vector.broadcast %13 : vector<1x128xf32> to vector<32x128xf32>
      %15 = arith.addf %12, %14 : vector<32x128xf32>
      %c0_14 = arith.constant 0 : index
      %c0_15 = arith.constant 0 : index
      %16 = vector.load %arg6[%c0_14, %c0_15] : memref<32x128xf32, #tpu.memory_space<vmem>>, vector<32x128xf32>
      tpu.vector_store %arg6[%c0_14, %c0_15], %15 {strides = array<i32>} : memref<32x128xf32, #tpu.memory_space<vmem>>, vector<32x128xf32>,
    } else {
    }
    return
  }
  func.func @transform_0(%arg0: i32, %arg1: i32, %arg2: i32) -> (i32, i32) {
    %c0_i32 = arith.constant 0 : i32
    return %arg0, %arg2 : i32, i32
  }
  func.func @transform_1(%arg0: i32, %arg1: i32, %arg2: i32) -> (i32, i32) {
    %c0_i32 = arith.constant 0 : i32
    return %arg2, %arg1 : i32, i32
  }
  func.func @transform_2(%arg0: i32, %arg1: i32, %arg2: i32) -> (i32, i32) {
    %c0_i32 = arith.constant 0 : i32
    %c0_i32_0 = arith.constant 0 : i32
    return %c0_i32, %arg1 : i32, i32
  }
  func.func @transform_3(%arg0: i32, %arg1: i32, %arg2: i32) -> (i32, i32) {
    %c0_i32 = arith.constant 0 : i32
    return %arg0, %arg1 : i32, i32
  }
}

module attributes {stable_mosaic.version = 11 : i64} {
  func.func @_bn_stats_kernel(%arg0: i32, %arg1: memref<128x16xf32, #tpu.memory_space<vmem>>, %arg2: memref<1x16xf32, #tpu.memory_space<vmem>>, %arg3: memref<1x16xf32, #tpu.memory_space<vmem>>) attributes {dimension_semantics = [#tpu.dimension_semantics<arbitrary>], iteration_bounds = array<i64: 1>, scalar_prefetch = 0 : i64, scratch_operands = 0 : i64, tpu.core_type = #tpu.core_type<tc>, window_params = [{transform_indices = @transform_0, window_bounds = array<i64: 128, 16>}, {pipeline_mode = #tpu.pipeline_mode<synchronous>, transform_indices = @transform_1, window_bounds = array<i64: 1, 16>}, {pipeline_mode = #tpu.pipeline_mode<synchronous>, transform_indices = @transform_2, window_bounds = array<i64: 1, 16>}]} {
    %c0_i32 = arith.constant 0 : i32
    %0 = arith.cmpi eq, %arg0, %c0_i32 : i32
    %1 = arith.extui %0 : i1 to i32
    %c0_i32_0 = arith.constant 0 : i32
    %2 = arith.cmpi ne, %1, %c0_i32_0 : i32
    scf.if %2 {
      %cst_11 = arith.constant 0.000000e+00 : f32
      %15 = vector.broadcast %cst_11 : f32 to vector<1x16xf32>
      %c0_12 = arith.constant 0 : index
      %c0_13 = arith.constant 0 : index
      %16 = vector.load %arg2[%c0_12, %c0_13] : memref<1x16xf32, #tpu.memory_space<vmem>>, vector<1x16xf32>
      tpu.vector_store %arg2[%c0_12, %c0_13], %15 {strides = array<i32>} : memref<1x16xf32, #tpu.memory_space<vmem>>, vector<1x16xf32>,
      %cst_14 = arith.constant 0.000000e+00 : f32
      %17 = vector.broadcast %cst_14 : f32 to vector<1x16xf32>
      %c0_15 = arith.constant 0 : index
      %c0_16 = arith.constant 0 : index
      %18 = vector.load %arg3[%c0_15, %c0_16] : memref<1x16xf32, #tpu.memory_space<vmem>>, vector<1x16xf32>
      tpu.vector_store %arg3[%c0_15, %c0_16], %17 {strides = array<i32>} : memref<1x16xf32, #tpu.memory_space<vmem>>, vector<1x16xf32>,
    } else {
    }
    %c0 = arith.constant 0 : index
    %c0_1 = arith.constant 0 : index
    %3 = vector.load %arg1[%c0, %c0_1] : memref<128x16xf32, #tpu.memory_space<vmem>>, vector<128x16xf32>
    %c0_2 = arith.constant 0 : index
    %c0_3 = arith.constant 0 : index
    %4 = vector.load %arg2[%c0_2, %c0_3] : memref<1x16xf32, #tpu.memory_space<vmem>>, vector<1x16xf32>
    %cst = arith.constant dense<0.000000e+00> : vector<16xf32>
    %5 = vector.multi_reduction <add>, %3, %cst [0] : vector<128x16xf32> to vector<16xf32>
    %6 = vector.shape_cast %5 : vector<16xf32> to vector<1x16xf32>
    %7 = arith.addf %4, %6 : vector<1x16xf32>
    %c0_4 = arith.constant 0 : index
    %c0_5 = arith.constant 0 : index
    %8 = vector.load %arg2[%c0_4, %c0_5] : memref<1x16xf32, #tpu.memory_space<vmem>>, vector<1x16xf32>
    tpu.vector_store %arg2[%c0_4, %c0_5], %7 {strides = array<i32>} : memref<1x16xf32, #tpu.memory_space<vmem>>, vector<1x16xf32>,
    %c0_6 = arith.constant 0 : index
    %c0_7 = arith.constant 0 : index
    %9 = vector.load %arg3[%c0_6, %c0_7] : memref<1x16xf32, #tpu.memory_space<vmem>>, vector<1x16xf32>
    %10 = arith.mulf %3, %3 : vector<128x16xf32>
    %cst_8 = arith.constant dense<0.000000e+00> : vector<16xf32>
    %11 = vector.multi_reduction <add>, %10, %cst_8 [0] : vector<128x16xf32> to vector<16xf32>
    %12 = vector.shape_cast %11 : vector<16xf32> to vector<1x16xf32>
    %13 = arith.addf %9, %12 : vector<1x16xf32>
    %c0_9 = arith.constant 0 : index
    %c0_10 = arith.constant 0 : index
    %14 = vector.load %arg3[%c0_9, %c0_10] : memref<1x16xf32, #tpu.memory_space<vmem>>, vector<1x16xf32>
    tpu.vector_store %arg3[%c0_9, %c0_10], %13 {strides = array<i32>} : memref<1x16xf32, #tpu.memory_space<vmem>>, vector<1x16xf32>,
    return
  }
  func.func @transform_0(%arg0: i32) -> (i32, i32) {
    %c0_i32 = arith.constant 0 : i32
    %c0_i32_0 = arith.constant 0 : i32
    return %arg0, %c0_i32 : i32, i32
  }
  func.func @transform_1(%arg0: i32) -> (i32, i32) {
    %c0_i32 = arith.constant 0 : i32
    %c0_i32_0 = arith.constant 0 : i32
    %c0_i32_1 = arith.constant 0 : i32
    return %c0_i32, %c0_i32_0 : i32, i32
  }
  func.func @transform_2(%arg0: i32) -> (i32, i32) {
    %c0_i32 = arith.constant 0 : i32
    %c0_i32_0 = arith.constant 0 : i32
    %c0_i32_1 = arith.constant 0 : i32
    return %c0_i32, %c0_i32_0 : i32, i32
  }
}

module attributes {stable_mosaic.version = 11 : i64} {
  func.func @_bn_norm_kernel(%arg0: i32, %arg1: memref<128x16xf32, #tpu.memory_space<vmem>>, %arg2: memref<1x16xf32, #tpu.memory_space<vmem>>, %arg3: memref<1x16xf32, #tpu.memory_space<vmem>>, %arg4: memref<128x16xf32, #tpu.memory_space<vmem>>) attributes {dimension_semantics = [#tpu.dimension_semantics<parallel>], iteration_bounds = array<i64: 1>, scalar_prefetch = 0 : i64, scratch_operands = 0 : i64, tpu.core_type = #tpu.core_type<tc>, window_params = [{transform_indices = @transform_0, window_bounds = array<i64: 128, 16>}, {pipeline_mode = #tpu.pipeline_mode<synchronous>, transform_indices = @transform_1, window_bounds = array<i64: 1, 16>}, {pipeline_mode = #tpu.pipeline_mode<synchronous>, transform_indices = @transform_2, window_bounds = array<i64: 1, 16>}, {transform_indices = @transform_3, window_bounds = array<i64: 128, 16>}]} {
    %c0 = arith.constant 0 : index
    %c0_0 = arith.constant 0 : index
    %0 = vector.load %arg1[%c0, %c0_0] : memref<128x16xf32, #tpu.memory_space<vmem>>, vector<128x16xf32>
    %c0_1 = arith.constant 0 : index
    %c0_2 = arith.constant 0 : index
    %1 = vector.load %arg2[%c0_1, %c0_2] : memref<1x16xf32, #tpu.memory_space<vmem>>, vector<1x16xf32>
    %2 = vector.broadcast %1 : vector<1x16xf32> to vector<128x16xf32>
    %3 = arith.mulf %0, %2 : vector<128x16xf32>
    %c0_3 = arith.constant 0 : index
    %c0_4 = arith.constant 0 : index
    %4 = vector.load %arg3[%c0_3, %c0_4] : memref<1x16xf32, #tpu.memory_space<vmem>>, vector<1x16xf32>
    %5 = vector.broadcast %4 : vector<1x16xf32> to vector<128x16xf32>
    %6 = arith.addf %3, %5 : vector<128x16xf32>
    %c0_5 = arith.constant 0 : index
    %c0_6 = arith.constant 0 : index
    %7 = vector.load %arg4[%c0_5, %c0_6] : memref<128x16xf32, #tpu.memory_space<vmem>>, vector<128x16xf32>
    tpu.vector_store %arg4[%c0_5, %c0_6], %6 {strides = array<i32>} : memref<128x16xf32, #tpu.memory_space<vmem>>, vector<128x16xf32>,
    return
  }
  func.func @transform_0(%arg0: i32) -> (i32, i32) {
    %c0_i32 = arith.constant 0 : i32
    %c0_i32_0 = arith.constant 0 : i32
    return %arg0, %c0_i32 : i32, i32
  }
  func.func @transform_1(%arg0: i32) -> (i32, i32) {
    %c0_i32 = arith.constant 0 : i32
    %c0_i32_0 = arith.constant 0 : i32
    %c0_i32_1 = arith.constant 0 : i32
    return %c0_i32, %c0_i32_0 : i32, i32
  }
  func.func @transform_2(%arg0: i32) -> (i32, i32) {
    %c0_i32 = arith.constant 0 : i32
    %c0_i32_0 = arith.constant 0 : i32
    %c0_i32_1 = arith.constant 0 : i32
    return %c0_i32, %c0_i32_0 : i32, i32
  }
  func.func @transform_3(%arg0: i32) -> (i32, i32) {
    %c0_i32 = arith.constant 0 : i32
    %c0_i32_0 = arith.constant 0 : i32
    return %arg0, %c0_i32 : i32, i32
  }
}

module attributes {stable_mosaic.version = 11 : i64} {
  func.func @_matmul_bias_kernel(%arg0: i32, %arg1: i32, %arg2: i32, %arg3: memref<128x128xbf16, #tpu.memory_space<vmem>>, %arg4: memref<128x128xbf16, #tpu.memory_space<vmem>>, %arg5: memref<1x128xf32, #tpu.memory_space<vmem>>, %arg6: memref<128x128xf32, #tpu.memory_space<vmem>>, %arg7: memref<128x128xf32, #tpu.memory_space<vmem>>) attributes {dimension_semantics = [#tpu.dimension_semantics<parallel>, #tpu.dimension_semantics<parallel>, #tpu.dimension_semantics<arbitrary>], iteration_bounds = array<i64: 1, 1, 1>, scalar_prefetch = 0 : i64, scratch_operands = 1 : i64, tpu.core_type = #tpu.core_type<tc>, window_params = [{transform_indices = @transform_0, window_bounds = array<i64: 128, 128>}, {transform_indices = @transform_1, window_bounds = array<i64: 128, 128>}, {transform_indices = @transform_2, window_bounds = array<i64: 1, 128>}, {transform_indices = @transform_3, window_bounds = array<i64: 128, 128>}]} {
    %c0_i32 = arith.constant 0 : i32
    %0 = arith.cmpi eq, %arg2, %c0_i32 : i32
    %1 = arith.extui %0 : i1 to i32
    %c0_i32_0 = arith.constant 0 : i32
    %2 = arith.cmpi ne, %1, %c0_i32_0 : i32
    scf.if %2 {
      %cst_10 = arith.constant 0.000000e+00 : f32
      %12 = vector.broadcast %cst_10 : f32 to vector<128x128xf32>
      %c0_11 = arith.constant 0 : index
      %c0_12 = arith.constant 0 : index
      %13 = vector.load %arg7[%c0_11, %c0_12] : memref<128x128xf32, #tpu.memory_space<vmem>>, vector<128x128xf32>
      tpu.vector_store %arg7[%c0_11, %c0_12], %12 {strides = array<i32>} : memref<128x128xf32, #tpu.memory_space<vmem>>, vector<128x128xf32>,
    } else {
    }
    %c0 = arith.constant 0 : index
    %c0_1 = arith.constant 0 : index
    %3 = vector.load %arg7[%c0, %c0_1] : memref<128x128xf32, #tpu.memory_space<vmem>>, vector<128x128xf32>
    %c0_2 = arith.constant 0 : index
    %c0_3 = arith.constant 0 : index
    %4 = vector.load %arg3[%c0_2, %c0_3] : memref<128x128xbf16, #tpu.memory_space<vmem>>, vector<128x128xbf16>
    %c0_4 = arith.constant 0 : index
    %c0_5 = arith.constant 0 : index
    %5 = vector.load %arg4[%c0_4, %c0_5] : memref<128x128xbf16, #tpu.memory_space<vmem>>, vector<128x128xbf16>
    %cst = arith.constant dense<0.000000e+00> : vector<128x128xf32>
    %6 = tpu.matmul %4, %5, %cst {dimension_numbers = #tpu.dot_dimension_numbers<[1], [0], [0], [1], [0, 0, 1, 1], [], []>} : vector<128x128xbf16>, vector<128x128xbf16>, vector<128x128xf32> -> vector<128x128xf32>
    %7 = arith.addf %3, %6 : vector<128x128xf32>
    %c0_6 = arith.constant 0 : index
    %c0_7 = arith.constant 0 : index
    %8 = vector.load %arg7[%c0_6, %c0_7] : memref<128x128xf32, #tpu.memory_space<vmem>>, vector<128x128xf32>
    tpu.vector_store %arg7[%c0_6, %c0_7], %7 {strides = array<i32>} : memref<128x128xf32, #tpu.memory_space<vmem>>, vector<128x128xf32>,
    %c0_i32_8 = arith.constant 0 : i32
    %9 = arith.cmpi eq, %arg2, %c0_i32_8 : i32
    %10 = arith.extui %9 : i1 to i32
    %c0_i32_9 = arith.constant 0 : i32
    %11 = arith.cmpi ne, %10, %c0_i32_9 : i32
    scf.if %11 {
      %c0_10 = arith.constant 0 : index
      %c0_11 = arith.constant 0 : index
      %12 = vector.load %arg7[%c0_10, %c0_11] : memref<128x128xf32, #tpu.memory_space<vmem>>, vector<128x128xf32>
      %c0_12 = arith.constant 0 : index
      %c0_13 = arith.constant 0 : index
      %13 = vector.load %arg5[%c0_12, %c0_13] : memref<1x128xf32, #tpu.memory_space<vmem>>, vector<1x128xf32>
      %14 = vector.broadcast %13 : vector<1x128xf32> to vector<128x128xf32>
      %15 = arith.addf %12, %14 : vector<128x128xf32>
      %c0_14 = arith.constant 0 : index
      %c0_15 = arith.constant 0 : index
      %16 = vector.load %arg6[%c0_14, %c0_15] : memref<128x128xf32, #tpu.memory_space<vmem>>, vector<128x128xf32>
      tpu.vector_store %arg6[%c0_14, %c0_15], %15 {strides = array<i32>} : memref<128x128xf32, #tpu.memory_space<vmem>>, vector<128x128xf32>,
    } else {
    }
    return
  }
  func.func @transform_0(%arg0: i32, %arg1: i32, %arg2: i32) -> (i32, i32) {
    %c0_i32 = arith.constant 0 : i32
    return %arg0, %arg2 : i32, i32
  }
  func.func @transform_1(%arg0: i32, %arg1: i32, %arg2: i32) -> (i32, i32) {
    %c0_i32 = arith.constant 0 : i32
    return %arg2, %arg1 : i32, i32
  }
  func.func @transform_2(%arg0: i32, %arg1: i32, %arg2: i32) -> (i32, i32) {
    %c0_i32 = arith.constant 0 : i32
    %c0_i32_0 = arith.constant 0 : i32
    return %c0_i32, %arg1 : i32, i32
  }
  func.func @transform_3(%arg0: i32, %arg1: i32, %arg2: i32) -> (i32, i32) {
    %c0_i32 = arith.constant 0 : i32
    return %arg0, %arg1 : i32, i32
  }
}

module attributes {stable_mosaic.version = 11 : i64} {
  func.func @_bn_stats_kernel(%arg0: i32, %arg1: memref<512x8xf32, #tpu.memory_space<vmem>>, %arg2: memref<1x8xf32, #tpu.memory_space<vmem>>, %arg3: memref<1x8xf32, #tpu.memory_space<vmem>>) attributes {dimension_semantics = [#tpu.dimension_semantics<arbitrary>], iteration_bounds = array<i64: 1>, scalar_prefetch = 0 : i64, scratch_operands = 0 : i64, tpu.core_type = #tpu.core_type<tc>, window_params = [{transform_indices = @transform_0, window_bounds = array<i64: 512, 8>}, {pipeline_mode = #tpu.pipeline_mode<synchronous>, transform_indices = @transform_1, window_bounds = array<i64: 1, 8>}, {pipeline_mode = #tpu.pipeline_mode<synchronous>, transform_indices = @transform_2, window_bounds = array<i64: 1, 8>}]} {
    %c0_i32 = arith.constant 0 : i32
    %0 = arith.cmpi eq, %arg0, %c0_i32 : i32
    %1 = arith.extui %0 : i1 to i32
    %c0_i32_0 = arith.constant 0 : i32
    %2 = arith.cmpi ne, %1, %c0_i32_0 : i32
    scf.if %2 {
      %cst_11 = arith.constant 0.000000e+00 : f32
      %15 = vector.broadcast %cst_11 : f32 to vector<1x8xf32>
      %c0_12 = arith.constant 0 : index
      %c0_13 = arith.constant 0 : index
      %16 = vector.load %arg2[%c0_12, %c0_13] : memref<1x8xf32, #tpu.memory_space<vmem>>, vector<1x8xf32>
      tpu.vector_store %arg2[%c0_12, %c0_13], %15 {strides = array<i32>} : memref<1x8xf32, #tpu.memory_space<vmem>>, vector<1x8xf32>,
      %cst_14 = arith.constant 0.000000e+00 : f32
      %17 = vector.broadcast %cst_14 : f32 to vector<1x8xf32>
      %c0_15 = arith.constant 0 : index
      %c0_16 = arith.constant 0 : index
      %18 = vector.load %arg3[%c0_15, %c0_16] : memref<1x8xf32, #tpu.memory_space<vmem>>, vector<1x8xf32>
      tpu.vector_store %arg3[%c0_15, %c0_16], %17 {strides = array<i32>} : memref<1x8xf32, #tpu.memory_space<vmem>>, vector<1x8xf32>,
    } else {
    }
    %c0 = arith.constant 0 : index
    %c0_1 = arith.constant 0 : index
    %3 = vector.load %arg1[%c0, %c0_1] : memref<512x8xf32, #tpu.memory_space<vmem>>, vector<512x8xf32>
    %c0_2 = arith.constant 0 : index
    %c0_3 = arith.constant 0 : index
    %4 = vector.load %arg2[%c0_2, %c0_3] : memref<1x8xf32, #tpu.memory_space<vmem>>, vector<1x8xf32>
    %cst = arith.constant dense<0.000000e+00> : vector<8xf32>
    %5 = vector.multi_reduction <add>, %3, %cst [0] : vector<512x8xf32> to vector<8xf32>
    %6 = vector.shape_cast %5 : vector<8xf32> to vector<1x8xf32>
    %7 = arith.addf %4, %6 : vector<1x8xf32>
    %c0_4 = arith.constant 0 : index
    %c0_5 = arith.constant 0 : index
    %8 = vector.load %arg2[%c0_4, %c0_5] : memref<1x8xf32, #tpu.memory_space<vmem>>, vector<1x8xf32>
    tpu.vector_store %arg2[%c0_4, %c0_5], %7 {strides = array<i32>} : memref<1x8xf32, #tpu.memory_space<vmem>>, vector<1x8xf32>,
    %c0_6 = arith.constant 0 : index
    %c0_7 = arith.constant 0 : index
    %9 = vector.load %arg3[%c0_6, %c0_7] : memref<1x8xf32, #tpu.memory_space<vmem>>, vector<1x8xf32>
    %10 = arith.mulf %3, %3 : vector<512x8xf32>
    %cst_8 = arith.constant dense<0.000000e+00> : vector<8xf32>
    %11 = vector.multi_reduction <add>, %10, %cst_8 [0] : vector<512x8xf32> to vector<8xf32>
    %12 = vector.shape_cast %11 : vector<8xf32> to vector<1x8xf32>
    %13 = arith.addf %9, %12 : vector<1x8xf32>
    %c0_9 = arith.constant 0 : index
    %c0_10 = arith.constant 0 : index
    %14 = vector.load %arg3[%c0_9, %c0_10] : memref<1x8xf32, #tpu.memory_space<vmem>>, vector<1x8xf32>
    tpu.vector_store %arg3[%c0_9, %c0_10], %13 {strides = array<i32>} : memref<1x8xf32, #tpu.memory_space<vmem>>, vector<1x8xf32>,
    return
  }
  func.func @transform_0(%arg0: i32) -> (i32, i32) {
    %c0_i32 = arith.constant 0 : i32
    %c0_i32_0 = arith.constant 0 : i32
    return %arg0, %c0_i32 : i32, i32
  }
  func.func @transform_1(%arg0: i32) -> (i32, i32) {
    %c0_i32 = arith.constant 0 : i32
    %c0_i32_0 = arith.constant 0 : i32
    %c0_i32_1 = arith.constant 0 : i32
    return %c0_i32, %c0_i32_0 : i32, i32
  }
  func.func @transform_2(%arg0: i32) -> (i32, i32) {
    %c0_i32 = arith.constant 0 : i32
    %c0_i32_0 = arith.constant 0 : i32
    %c0_i32_1 = arith.constant 0 : i32
    return %c0_i32, %c0_i32_0 : i32, i32
  }
}

module attributes {stable_mosaic.version = 11 : i64} {
  func.func @_bn_norm_kernel(%arg0: i32, %arg1: memref<512x8xf32, #tpu.memory_space<vmem>>, %arg2: memref<1x8xf32, #tpu.memory_space<vmem>>, %arg3: memref<1x8xf32, #tpu.memory_space<vmem>>, %arg4: memref<512x8xf32, #tpu.memory_space<vmem>>) attributes {dimension_semantics = [#tpu.dimension_semantics<parallel>], iteration_bounds = array<i64: 1>, scalar_prefetch = 0 : i64, scratch_operands = 0 : i64, tpu.core_type = #tpu.core_type<tc>, window_params = [{transform_indices = @transform_0, window_bounds = array<i64: 512, 8>}, {pipeline_mode = #tpu.pipeline_mode<synchronous>, transform_indices = @transform_1, window_bounds = array<i64: 1, 8>}, {pipeline_mode = #tpu.pipeline_mode<synchronous>, transform_indices = @transform_2, window_bounds = array<i64: 1, 8>}, {transform_indices = @transform_3, window_bounds = array<i64: 512, 8>}]} {
    %c0 = arith.constant 0 : index
    %c0_0 = arith.constant 0 : index
    %0 = vector.load %arg1[%c0, %c0_0] : memref<512x8xf32, #tpu.memory_space<vmem>>, vector<512x8xf32>
    %c0_1 = arith.constant 0 : index
    %c0_2 = arith.constant 0 : index
    %1 = vector.load %arg2[%c0_1, %c0_2] : memref<1x8xf32, #tpu.memory_space<vmem>>, vector<1x8xf32>
    %2 = vector.broadcast %1 : vector<1x8xf32> to vector<512x8xf32>
    %3 = arith.mulf %0, %2 : vector<512x8xf32>
    %c0_3 = arith.constant 0 : index
    %c0_4 = arith.constant 0 : index
    %4 = vector.load %arg3[%c0_3, %c0_4] : memref<1x8xf32, #tpu.memory_space<vmem>>, vector<1x8xf32>
    %5 = vector.broadcast %4 : vector<1x8xf32> to vector<512x8xf32>
    %6 = arith.addf %3, %5 : vector<512x8xf32>
    %c0_5 = arith.constant 0 : index
    %c0_6 = arith.constant 0 : index
    %7 = vector.load %arg4[%c0_5, %c0_6] : memref<512x8xf32, #tpu.memory_space<vmem>>, vector<512x8xf32>
    tpu.vector_store %arg4[%c0_5, %c0_6], %6 {strides = array<i32>} : memref<512x8xf32, #tpu.memory_space<vmem>>, vector<512x8xf32>,
    return
  }
  func.func @transform_0(%arg0: i32) -> (i32, i32) {
    %c0_i32 = arith.constant 0 : i32
    %c0_i32_0 = arith.constant 0 : i32
    return %arg0, %c0_i32 : i32, i32
  }
  func.func @transform_1(%arg0: i32) -> (i32, i32) {
    %c0_i32 = arith.constant 0 : i32
    %c0_i32_0 = arith.constant 0 : i32
    %c0_i32_1 = arith.constant 0 : i32
    return %c0_i32, %c0_i32_0 : i32, i32
  }
  func.func @transform_2(%arg0: i32) -> (i32, i32) {
    %c0_i32 = arith.constant 0 : i32
    %c0_i32_0 = arith.constant 0 : i32
    %c0_i32_1 = arith.constant 0 : i32
    return %c0_i32, %c0_i32_0 : i32, i32
  }
  func.func @transform_3(%arg0: i32) -> (i32, i32) {
    %c0_i32 = arith.constant 0 : i32
    %c0_i32_0 = arith.constant 0 : i32
    return %arg0, %c0_i32 : i32, i32
  }
}

module attributes {stable_mosaic.version = 11 : i64} {
  func.func @_matmul_bias_kernel(%arg0: i32, %arg1: i32, %arg2: i32, %arg3: memref<512x128xbf16, #tpu.memory_space<vmem>>, %arg4: memref<128x128xbf16, #tpu.memory_space<vmem>>, %arg5: memref<1x128xf32, #tpu.memory_space<vmem>>, %arg6: memref<512x128xf32, #tpu.memory_space<vmem>>, %arg7: memref<512x128xf32, #tpu.memory_space<vmem>>) attributes {dimension_semantics = [#tpu.dimension_semantics<parallel>, #tpu.dimension_semantics<parallel>, #tpu.dimension_semantics<arbitrary>], iteration_bounds = array<i64: 1, 1, 1>, scalar_prefetch = 0 : i64, scratch_operands = 1 : i64, tpu.core_type = #tpu.core_type<tc>, window_params = [{transform_indices = @transform_0, window_bounds = array<i64: 512, 128>}, {transform_indices = @transform_1, window_bounds = array<i64: 128, 128>}, {transform_indices = @transform_2, window_bounds = array<i64: 1, 128>}, {transform_indices = @transform_3, window_bounds = array<i64: 512, 128>}]} {
    %c0_i32 = arith.constant 0 : i32
    %0 = arith.cmpi eq, %arg2, %c0_i32 : i32
    %1 = arith.extui %0 : i1 to i32
    %c0_i32_0 = arith.constant 0 : i32
    %2 = arith.cmpi ne, %1, %c0_i32_0 : i32
    scf.if %2 {
      %cst_10 = arith.constant 0.000000e+00 : f32
      %12 = vector.broadcast %cst_10 : f32 to vector<512x128xf32>
      %c0_11 = arith.constant 0 : index
      %c0_12 = arith.constant 0 : index
      %13 = vector.load %arg7[%c0_11, %c0_12] : memref<512x128xf32, #tpu.memory_space<vmem>>, vector<512x128xf32>
      tpu.vector_store %arg7[%c0_11, %c0_12], %12 {strides = array<i32>} : memref<512x128xf32, #tpu.memory_space<vmem>>, vector<512x128xf32>,
    } else {
    }
    %c0 = arith.constant 0 : index
    %c0_1 = arith.constant 0 : index
    %3 = vector.load %arg7[%c0, %c0_1] : memref<512x128xf32, #tpu.memory_space<vmem>>, vector<512x128xf32>
    %c0_2 = arith.constant 0 : index
    %c0_3 = arith.constant 0 : index
    %4 = vector.load %arg3[%c0_2, %c0_3] : memref<512x128xbf16, #tpu.memory_space<vmem>>, vector<512x128xbf16>
    %c0_4 = arith.constant 0 : index
    %c0_5 = arith.constant 0 : index
    %5 = vector.load %arg4[%c0_4, %c0_5] : memref<128x128xbf16, #tpu.memory_space<vmem>>, vector<128x128xbf16>
    %cst = arith.constant dense<0.000000e+00> : vector<512x128xf32>
    %6 = tpu.matmul %4, %5, %cst {dimension_numbers = #tpu.dot_dimension_numbers<[1], [0], [0], [1], [0, 0, 1, 1], [], []>} : vector<512x128xbf16>, vector<128x128xbf16>, vector<512x128xf32> -> vector<512x128xf32>
    %7 = arith.addf %3, %6 : vector<512x128xf32>
    %c0_6 = arith.constant 0 : index
    %c0_7 = arith.constant 0 : index
    %8 = vector.load %arg7[%c0_6, %c0_7] : memref<512x128xf32, #tpu.memory_space<vmem>>, vector<512x128xf32>
    tpu.vector_store %arg7[%c0_6, %c0_7], %7 {strides = array<i32>} : memref<512x128xf32, #tpu.memory_space<vmem>>, vector<512x128xf32>,
    %c0_i32_8 = arith.constant 0 : i32
    %9 = arith.cmpi eq, %arg2, %c0_i32_8 : i32
    %10 = arith.extui %9 : i1 to i32
    %c0_i32_9 = arith.constant 0 : i32
    %11 = arith.cmpi ne, %10, %c0_i32_9 : i32
    scf.if %11 {
      %c0_10 = arith.constant 0 : index
      %c0_11 = arith.constant 0 : index
      %12 = vector.load %arg7[%c0_10, %c0_11] : memref<512x128xf32, #tpu.memory_space<vmem>>, vector<512x128xf32>
      %c0_12 = arith.constant 0 : index
      %c0_13 = arith.constant 0 : index
      %13 = vector.load %arg5[%c0_12, %c0_13] : memref<1x128xf32, #tpu.memory_space<vmem>>, vector<1x128xf32>
      %14 = vector.broadcast %13 : vector<1x128xf32> to vector<512x128xf32>
      %15 = arith.addf %12, %14 : vector<512x128xf32>
      %c0_14 = arith.constant 0 : index
      %c0_15 = arith.constant 0 : index
      %16 = vector.load %arg6[%c0_14, %c0_15] : memref<512x128xf32, #tpu.memory_space<vmem>>, vector<512x128xf32>
      tpu.vector_store %arg6[%c0_14, %c0_15], %15 {strides = array<i32>} : memref<512x128xf32, #tpu.memory_space<vmem>>, vector<512x128xf32>,
    } else {
    }
    return
  }
  func.func @transform_0(%arg0: i32, %arg1: i32, %arg2: i32) -> (i32, i32) {
    %c0_i32 = arith.constant 0 : i32
    return %arg0, %arg2 : i32, i32
  }
  func.func @transform_1(%arg0: i32, %arg1: i32, %arg2: i32) -> (i32, i32) {
    %c0_i32 = arith.constant 0 : i32
    return %arg2, %arg1 : i32, i32
  }
  func.func @transform_2(%arg0: i32, %arg1: i32, %arg2: i32) -> (i32, i32) {
    %c0_i32 = arith.constant 0 : i32
    %c0_i32_0 = arith.constant 0 : i32
    return %c0_i32, %arg1 : i32, i32
  }
  func.func @transform_3(%arg0: i32, %arg1: i32, %arg2: i32) -> (i32, i32) {
    %c0_i32 = arith.constant 0 : i32
    return %arg0, %arg1 : i32, i32
  }
}

module attributes {stable_mosaic.version = 11 : i64} {
  func.func @_bn_stats_kernel(%arg0: i32, %arg1: memref<1024x8xf32, #tpu.memory_space<vmem>>, %arg2: memref<1x8xf32, #tpu.memory_space<vmem>>, %arg3: memref<1x8xf32, #tpu.memory_space<vmem>>) attributes {dimension_semantics = [#tpu.dimension_semantics<arbitrary>], iteration_bounds = array<i64: 2>, scalar_prefetch = 0 : i64, scratch_operands = 0 : i64, tpu.core_type = #tpu.core_type<tc>, window_params = [{transform_indices = @transform_0, window_bounds = array<i64: 1024, 8>}, {pipeline_mode = #tpu.pipeline_mode<synchronous>, transform_indices = @transform_1, window_bounds = array<i64: 1, 8>}, {pipeline_mode = #tpu.pipeline_mode<synchronous>, transform_indices = @transform_2, window_bounds = array<i64: 1, 8>}]} {
    %c0_i32 = arith.constant 0 : i32
    %0 = arith.cmpi eq, %arg0, %c0_i32 : i32
    %1 = arith.extui %0 : i1 to i32
    %c0_i32_0 = arith.constant 0 : i32
    %2 = arith.cmpi ne, %1, %c0_i32_0 : i32
    scf.if %2 {
      %cst_11 = arith.constant 0.000000e+00 : f32
      %15 = vector.broadcast %cst_11 : f32 to vector<1x8xf32>
      %c0_12 = arith.constant 0 : index
      %c0_13 = arith.constant 0 : index
      %16 = vector.load %arg2[%c0_12, %c0_13] : memref<1x8xf32, #tpu.memory_space<vmem>>, vector<1x8xf32>
      tpu.vector_store %arg2[%c0_12, %c0_13], %15 {strides = array<i32>} : memref<1x8xf32, #tpu.memory_space<vmem>>, vector<1x8xf32>,
      %cst_14 = arith.constant 0.000000e+00 : f32
      %17 = vector.broadcast %cst_14 : f32 to vector<1x8xf32>
      %c0_15 = arith.constant 0 : index
      %c0_16 = arith.constant 0 : index
      %18 = vector.load %arg3[%c0_15, %c0_16] : memref<1x8xf32, #tpu.memory_space<vmem>>, vector<1x8xf32>
      tpu.vector_store %arg3[%c0_15, %c0_16], %17 {strides = array<i32>} : memref<1x8xf32, #tpu.memory_space<vmem>>, vector<1x8xf32>,
    } else {
    }
    %c0 = arith.constant 0 : index
    %c0_1 = arith.constant 0 : index
    %3 = vector.load %arg1[%c0, %c0_1] : memref<1024x8xf32, #tpu.memory_space<vmem>>, vector<1024x8xf32>
    %c0_2 = arith.constant 0 : index
    %c0_3 = arith.constant 0 : index
    %4 = vector.load %arg2[%c0_2, %c0_3] : memref<1x8xf32, #tpu.memory_space<vmem>>, vector<1x8xf32>
    %cst = arith.constant dense<0.000000e+00> : vector<8xf32>
    %5 = vector.multi_reduction <add>, %3, %cst [0] : vector<1024x8xf32> to vector<8xf32>
    %6 = vector.shape_cast %5 : vector<8xf32> to vector<1x8xf32>
    %7 = arith.addf %4, %6 : vector<1x8xf32>
    %c0_4 = arith.constant 0 : index
    %c0_5 = arith.constant 0 : index
    %8 = vector.load %arg2[%c0_4, %c0_5] : memref<1x8xf32, #tpu.memory_space<vmem>>, vector<1x8xf32>
    tpu.vector_store %arg2[%c0_4, %c0_5], %7 {strides = array<i32>} : memref<1x8xf32, #tpu.memory_space<vmem>>, vector<1x8xf32>,
    %c0_6 = arith.constant 0 : index
    %c0_7 = arith.constant 0 : index
    %9 = vector.load %arg3[%c0_6, %c0_7] : memref<1x8xf32, #tpu.memory_space<vmem>>, vector<1x8xf32>
    %10 = arith.mulf %3, %3 : vector<1024x8xf32>
    %cst_8 = arith.constant dense<0.000000e+00> : vector<8xf32>
    %11 = vector.multi_reduction <add>, %10, %cst_8 [0] : vector<1024x8xf32> to vector<8xf32>
    %12 = vector.shape_cast %11 : vector<8xf32> to vector<1x8xf32>
    %13 = arith.addf %9, %12 : vector<1x8xf32>
    %c0_9 = arith.constant 0 : index
    %c0_10 = arith.constant 0 : index
    %14 = vector.load %arg3[%c0_9, %c0_10] : memref<1x8xf32, #tpu.memory_space<vmem>>, vector<1x8xf32>
    tpu.vector_store %arg3[%c0_9, %c0_10], %13 {strides = array<i32>} : memref<1x8xf32, #tpu.memory_space<vmem>>, vector<1x8xf32>,
    return
  }
  func.func @transform_0(%arg0: i32) -> (i32, i32) {
    %c0_i32 = arith.constant 0 : i32
    %c0_i32_0 = arith.constant 0 : i32
    return %arg0, %c0_i32 : i32, i32
  }
  func.func @transform_1(%arg0: i32) -> (i32, i32) {
    %c0_i32 = arith.constant 0 : i32
    %c0_i32_0 = arith.constant 0 : i32
    %c0_i32_1 = arith.constant 0 : i32
    return %c0_i32, %c0_i32_0 : i32, i32
  }
  func.func @transform_2(%arg0: i32) -> (i32, i32) {
    %c0_i32 = arith.constant 0 : i32
    %c0_i32_0 = arith.constant 0 : i32
    %c0_i32_1 = arith.constant 0 : i32
    return %c0_i32, %c0_i32_0 : i32, i32
  }
}

module attributes {stable_mosaic.version = 11 : i64} {
  func.func @_bn_norm_kernel(%arg0: i32, %arg1: memref<1024x8xf32, #tpu.memory_space<vmem>>, %arg2: memref<1x8xf32, #tpu.memory_space<vmem>>, %arg3: memref<1x8xf32, #tpu.memory_space<vmem>>, %arg4: memref<1024x8xf32, #tpu.memory_space<vmem>>) attributes {dimension_semantics = [#tpu.dimension_semantics<parallel>], iteration_bounds = array<i64: 2>, scalar_prefetch = 0 : i64, scratch_operands = 0 : i64, tpu.core_type = #tpu.core_type<tc>, window_params = [{transform_indices = @transform_0, window_bounds = array<i64: 1024, 8>}, {pipeline_mode = #tpu.pipeline_mode<synchronous>, transform_indices = @transform_1, window_bounds = array<i64: 1, 8>}, {pipeline_mode = #tpu.pipeline_mode<synchronous>, transform_indices = @transform_2, window_bounds = array<i64: 1, 8>}, {transform_indices = @transform_3, window_bounds = array<i64: 1024, 8>}]} {
    %c0 = arith.constant 0 : index
    %c0_0 = arith.constant 0 : index
    %0 = vector.load %arg1[%c0, %c0_0] : memref<1024x8xf32, #tpu.memory_space<vmem>>, vector<1024x8xf32>
    %c0_1 = arith.constant 0 : index
    %c0_2 = arith.constant 0 : index
    %1 = vector.load %arg2[%c0_1, %c0_2] : memref<1x8xf32, #tpu.memory_space<vmem>>, vector<1x8xf32>
    %2 = vector.broadcast %1 : vector<1x8xf32> to vector<1024x8xf32>
    %3 = arith.mulf %0, %2 : vector<1024x8xf32>
    %c0_3 = arith.constant 0 : index
    %c0_4 = arith.constant 0 : index
    %4 = vector.load %arg3[%c0_3, %c0_4] : memref<1x8xf32, #tpu.memory_space<vmem>>, vector<1x8xf32>
    %5 = vector.broadcast %4 : vector<1x8xf32> to vector<1024x8xf32>
    %6 = arith.addf %3, %5 : vector<1024x8xf32>
    %c0_5 = arith.constant 0 : index
    %c0_6 = arith.constant 0 : index
    %7 = vector.load %arg4[%c0_5, %c0_6] : memref<1024x8xf32, #tpu.memory_space<vmem>>, vector<1024x8xf32>
    tpu.vector_store %arg4[%c0_5, %c0_6], %6 {strides = array<i32>} : memref<1024x8xf32, #tpu.memory_space<vmem>>, vector<1024x8xf32>,
    return
  }
  func.func @transform_0(%arg0: i32) -> (i32, i32) {
    %c0_i32 = arith.constant 0 : i32
    %c0_i32_0 = arith.constant 0 : i32
    return %arg0, %c0_i32 : i32, i32
  }
  func.func @transform_1(%arg0: i32) -> (i32, i32) {
    %c0_i32 = arith.constant 0 : i32
    %c0_i32_0 = arith.constant 0 : i32
    %c0_i32_1 = arith.constant 0 : i32
    return %c0_i32, %c0_i32_0 : i32, i32
  }
  func.func @transform_2(%arg0: i32) -> (i32, i32) {
    %c0_i32 = arith.constant 0 : i32
    %c0_i32_0 = arith.constant 0 : i32
    %c0_i32_1 = arith.constant 0 : i32
    return %c0_i32, %c0_i32_0 : i32, i32
  }
  func.func @transform_3(%arg0: i32) -> (i32, i32) {
    %c0_i32 = arith.constant 0 : i32
    %c0_i32_0 = arith.constant 0 : i32
    return %arg0, %c0_i32 : i32, i32
  }
}

module attributes {stable_mosaic.version = 11 : i64} {
  func.func @_matmul_bias_kernel(%arg0: i32, %arg1: i32, %arg2: i32, %arg3: memref<512x128xbf16, #tpu.memory_space<vmem>>, %arg4: memref<128x128xbf16, #tpu.memory_space<vmem>>, %arg5: memref<1x128xf32, #tpu.memory_space<vmem>>, %arg6: memref<512x128xf32, #tpu.memory_space<vmem>>, %arg7: memref<512x128xf32, #tpu.memory_space<vmem>>) attributes {dimension_semantics = [#tpu.dimension_semantics<parallel>, #tpu.dimension_semantics<parallel>, #tpu.dimension_semantics<arbitrary>], iteration_bounds = array<i64: 4, 1, 1>, scalar_prefetch = 0 : i64, scratch_operands = 1 : i64, tpu.core_type = #tpu.core_type<tc>, window_params = [{transform_indices = @transform_0, window_bounds = array<i64: 512, 128>}, {transform_indices = @transform_1, window_bounds = array<i64: 128, 128>}, {transform_indices = @transform_2, window_bounds = array<i64: 1, 128>}, {transform_indices = @transform_3, window_bounds = array<i64: 512, 128>}]} {
    %c0_i32 = arith.constant 0 : i32
    %0 = arith.cmpi eq, %arg2, %c0_i32 : i32
    %1 = arith.extui %0 : i1 to i32
    %c0_i32_0 = arith.constant 0 : i32
    %2 = arith.cmpi ne, %1, %c0_i32_0 : i32
    scf.if %2 {
      %cst_10 = arith.constant 0.000000e+00 : f32
      %12 = vector.broadcast %cst_10 : f32 to vector<512x128xf32>
      %c0_11 = arith.constant 0 : index
      %c0_12 = arith.constant 0 : index
      %13 = vector.load %arg7[%c0_11, %c0_12] : memref<512x128xf32, #tpu.memory_space<vmem>>, vector<512x128xf32>
      tpu.vector_store %arg7[%c0_11, %c0_12], %12 {strides = array<i32>} : memref<512x128xf32, #tpu.memory_space<vmem>>, vector<512x128xf32>,
    } else {
    }
    %c0 = arith.constant 0 : index
    %c0_1 = arith.constant 0 : index
    %3 = vector.load %arg7[%c0, %c0_1] : memref<512x128xf32, #tpu.memory_space<vmem>>, vector<512x128xf32>
    %c0_2 = arith.constant 0 : index
    %c0_3 = arith.constant 0 : index
    %4 = vector.load %arg3[%c0_2, %c0_3] : memref<512x128xbf16, #tpu.memory_space<vmem>>, vector<512x128xbf16>
    %c0_4 = arith.constant 0 : index
    %c0_5 = arith.constant 0 : index
    %5 = vector.load %arg4[%c0_4, %c0_5] : memref<128x128xbf16, #tpu.memory_space<vmem>>, vector<128x128xbf16>
    %cst = arith.constant dense<0.000000e+00> : vector<512x128xf32>
    %6 = tpu.matmul %4, %5, %cst {dimension_numbers = #tpu.dot_dimension_numbers<[1], [0], [0], [1], [0, 0, 1, 1], [], []>} : vector<512x128xbf16>, vector<128x128xbf16>, vector<512x128xf32> -> vector<512x128xf32>
    %7 = arith.addf %3, %6 : vector<512x128xf32>
    %c0_6 = arith.constant 0 : index
    %c0_7 = arith.constant 0 : index
    %8 = vector.load %arg7[%c0_6, %c0_7] : memref<512x128xf32, #tpu.memory_space<vmem>>, vector<512x128xf32>
    tpu.vector_store %arg7[%c0_6, %c0_7], %7 {strides = array<i32>} : memref<512x128xf32, #tpu.memory_space<vmem>>, vector<512x128xf32>,
    %c0_i32_8 = arith.constant 0 : i32
    %9 = arith.cmpi eq, %arg2, %c0_i32_8 : i32
    %10 = arith.extui %9 : i1 to i32
    %c0_i32_9 = arith.constant 0 : i32
    %11 = arith.cmpi ne, %10, %c0_i32_9 : i32
    scf.if %11 {
      %c0_10 = arith.constant 0 : index
      %c0_11 = arith.constant 0 : index
      %12 = vector.load %arg7[%c0_10, %c0_11] : memref<512x128xf32, #tpu.memory_space<vmem>>, vector<512x128xf32>
      %c0_12 = arith.constant 0 : index
      %c0_13 = arith.constant 0 : index
      %13 = vector.load %arg5[%c0_12, %c0_13] : memref<1x128xf32, #tpu.memory_space<vmem>>, vector<1x128xf32>
      %14 = vector.broadcast %13 : vector<1x128xf32> to vector<512x128xf32>
      %15 = arith.addf %12, %14 : vector<512x128xf32>
      %16 = math.tanh %15 : vector<512x128xf32>
      %c0_14 = arith.constant 0 : index
      %c0_15 = arith.constant 0 : index
      %17 = vector.load %arg6[%c0_14, %c0_15] : memref<512x128xf32, #tpu.memory_space<vmem>>, vector<512x128xf32>
      tpu.vector_store %arg6[%c0_14, %c0_15], %16 {strides = array<i32>} : memref<512x128xf32, #tpu.memory_space<vmem>>, vector<512x128xf32>,
    } else {
    }
    return
  }
  func.func @transform_0(%arg0: i32, %arg1: i32, %arg2: i32) -> (i32, i32) {
    %c0_i32 = arith.constant 0 : i32
    return %arg0, %arg2 : i32, i32
  }
  func.func @transform_1(%arg0: i32, %arg1: i32, %arg2: i32) -> (i32, i32) {
    %c0_i32 = arith.constant 0 : i32
    return %arg2, %arg1 : i32, i32
  }
  func.func @transform_2(%arg0: i32, %arg1: i32, %arg2: i32) -> (i32, i32) {
    %c0_i32 = arith.constant 0 : i32
    %c0_i32_0 = arith.constant 0 : i32
    return %c0_i32, %arg1 : i32, i32
  }
  func.func @transform_3(%arg0: i32, %arg1: i32, %arg2: i32) -> (i32, i32) {
    %c0_i32 = arith.constant 0 : i32
    return %arg0, %arg1 : i32, i32
  }
}

</mosaic_0001>

<bundles_post_ra>
// kernel: tile.8
= control target key start
LH: loop header
LB: loop body
LE: loop exit
PB: predicated region body
PF: predicated region fallthrough
CT: control target
= control target key end

     0   :  { %2 = vsyncpa [#allocation1], 0  ;;  %s51_s8 = smov [#allocation0]   ;;  %s71_s0 = inlined_call_operand.hbm [shape: f32[32], index: 0, kind: input, shape index: {}]   ;;  %s72_s1 = inlined_call_operand.vmem [shape: f32[16,32], index: 1, kind: output, shape index: {}]  }
   0x1   :  { %s8_s0 = sshll.u32 %s71_s0, 4  ;;  %s10_s9 = sshll.u32 %s51_s8, 4  ;;  %s9_s0 = int_to_ptr.hbm [resolvable:$true] %s8_s0  ;;  %s11_s9 = int_to_ptr.vmem [resolvable:$true] %s10_s9 }
   0x2   :  { %13 = dma.hbm_to_vmem [thread:$0]  %s9_s0, 16, %s11_s9, [#allocation1]  }
   0x3   :  { %49 = dma.done.wait [#allocation1], 16  }
   0x4   :  { %50 = vsyncadd [#allocation1], 4294967280  ;;  %v18_v0 = vld [vmem:[#allocation0] ss:$0 sm:$0xff] }
   0x5   :  { %19 = vst [vmem:[%s72_s1] sm:$0xff] %v18_v0 }
   0x6   :  { %23 = vst [vmem:[%s72_s1 + $0x8] sm:$0xff] %v18_v0 }
   0x7   :  { %22 = vsyncpa [#allocation1], 1 }

// kernel: generator_forward.27
= control target key start
LH: loop header
LB: loop body
LE: loop exit
PB: predicated region body
PF: predicated region fallthrough
CT: control target
= control target key end

     0   :  { %vm34_vm0 = vcmask 261120   ;;  %s95_s0 = inlined_call_operand.vmem [shape: f32[32,32], index: 0, kind: input, shape index: {}]   ;;  %s96_s1 = inlined_call_operand.vmem [shape: f32[1,32], index: 1, kind: input, shape index: {}]   ;;  %s97_s2 = inlined_call_operand.vmem [shape: f32[1,32], index: 2, kind: input, shape index: {}]   ;;  %s98_s3 = inlined_call_operand.vmem [shape: f32[32,32], index: 3, kind: output, shape index: {}]  }
   0x1   :  { %v14_v0 = vld [vmem:[%s95_s0] sm:$0xff]  ;;  %v15_v3 = vld [vmem:[%s95_s0 + $0x8] sm:$0xff]  ;;  %v16_v6 = vld [vmem:[%s95_s0 + $0x10] sm:$0xff] }
   0x2   :  { %v43_v1 = vld [vmem:[%s96_s1] ss:$0 sm:$0xff]  ;;  %v17_v7 = vld [vmem:[%s95_s0 + $0x18] sm:$0xff] }
   0x3   :  { %v44_v2 = vld [vmem:[%s97_s2] ss:$0 sm:$0xff]  ;;  %v22_v4 = vmul.f32 %v43_v1, %v14_v0  ;;  %v23_v5 = vmul.f32 %v43_v1, %v15_v3  ;;  %v24_v8 = vmul.f32 %v43_v1, %v16_v6  ;;  %v25_v9 = vmul.f32 %v43_v1, %v17_v7 }
   0x5   :  { %v30_v10 = vadd.f32 %v44_v2, %v22_v4  ;;  %v31_v11 = vadd.f32 %v44_v2, %v23_v5  ;;  %v32_v12 = vadd.f32 %v44_v2, %v24_v8  ;;  %v33_v13 = vadd.f32 %v44_v2, %v25_v9 }
   0x7   :  { %35 = vst.msk [vmem:[%s98_s3] sm:$0xff] %vm34_vm0, %v30_v10 }
   0x8   :  { %36 = vst.msk [vmem:[%s98_s3 + $0x8] sm:$0xff] %vm34_vm0, %v31_v11 }
   0x9   :  { %37 = vst.msk [vmem:[%s98_s3 + $0x10] sm:$0xff] %vm34_vm0, %v32_v12 }
   0xa   :  { %38 = vst.msk [vmem:[%s98_s3 + $0x18] sm:$0xff] %vm34_vm0, %v33_v13 }

// kernel: generator_forward.25
= control target key start
LH: loop header
LB: loop body
LE: loop exit
PB: predicated region body
PF: predicated region fallthrough
CT: control target
= control target key end

     0   :  { %s857_s12 = smov 0   ;;  %s859_s13 = smov 0   ;;  %s992_s0 = inlined_call_operand.vmem [shape: bf16[16,128], index: 0, kind: input, shape index: {}]   ;;  %s993_s1 = inlined_call_operand.vmem [shape: bf16[128,512], index: 1, kind: input, shape index: {}]   ;;  %s994_s2 = inlined_call_operand.vmem [shape: f32[1,512], index: 2, kind: input, shape index: {}]   ;;  %s995_s3 = inlined_call_operand.vmem [shape: f32[16,512], index: 3, kind: output, shape index: {}]  }
   0x1   :  { %s861_s14 = smov 0   ;;  %s863_s15 = smov 0  }
   0x2   :  { %s865_s16 = smov 0  }
   0x3 LB: > { %s28_s17 = sadd.s32 1, %s831_s15  ;;  %s653_s18 = sadd.s32 4294967295, %s835_s16   ;;  %s835_s16 = sphi %s865_s16, %s13_s16   ;;  %s831_s15 = sphi %s863_s15, %s1000_s15   ;;  %s827_s14 = sphi %s861_s14, %s999_s14   ;;  %s823_s13 = sphi %s859_s13, %s998_s13   ;;  %s819_s12 = sphi %s857_s12, %s997_s12  }
   0x4   : > { %p30_p0 = scmp.ge.s32.totalorder %s28_s17, 2  ;;  %p76_p1 = scmp.ne.s32.totalorder %s823_s13, %s819_s12 }
   0x5   : > { %p77_p2 = scmp.eq.s32.totalorder %s835_s16, 0  ;;  %p134_p4 = scmp.eq.s32.totalorder %s653_s18, 1 }
   0x6   : > { %s1002_s17 = smov (%p30_p0, %s28_s17), 0  ;;  %s69_s20 = sadd.s32 1, %s823_s13 }
   0x7   : > { %p78_p3 = por %p77_p2, %p76_p1  ;;  %s65_s19 = ssub.s32 %s831_s15, %s1002_s17 }
   0x8   : > { %p67_p5 = scmp.eq.s32.totalorder %s65_s19, 0  ;;  %p892_p6 = por %p134_p4, %p76_p1 }
   0x9   : > { %p657_p7 = scmp.ge.s32.totalorder %s835_s16, 2 }
   0xa   : > { %s897_s22 = scalar_select %p67_p5, %s823_s13, %s69_s20  }
   0xb   : > { %168 = sbr.rel (%p657_p7) target bundleno = 36 (0x24), region = 20 }
  0x10   : > { %171 = sbr.rel (!%p78_p3) target bundleno = 36 (0x24), region = 24  ;;  %s173_s23 = sand.u32 (%p78_p3), 1, %s823_s13  }
  0x11   : > { %s738_s24 = sshll.u32 (%p78_p3), %s831_s15, 3  ;;  %s658_s25 = sshll.u32 (%p78_p3), %s173_s23, 7 }
  0x12   : > { %s905_s28 = scalar_lea.vmem (%p78_p3), %s993_s1, %s738_s24  ;;  %s175_s29 = scalar_lea.vmem (%p78_p3), [#allocation3], %s658_s25 }
  0x13   : > { %v240_v0 = vld [vmem:[%s905_s28] sm:$0xff] (%p78_p3)  ;;  %v242_v1 = vld [vmem:[%s905_s28 + $0x10] sm:$0xff] (%p78_p3) }
  0x14   : > { %v244_v2 = vld [vmem:[%s905_s28 + $0x20] sm:$0xff] (%p78_p3)  ;;  %241 = vst [vmem:[%s175_s29] sm:$0xff] (%p78_p3), %v240_v0  ;;  %v246_v3 = vld [vmem:[%s905_s28 + $0x30] sm:$0xff] (%p78_p3) }
  0x15   : > { %243 = vst [vmem:[%s175_s29 + $0x8] sm:$0xff] %v242_v1  ;;  %v248_v4 = vld [vmem:[%s905_s28 + $0x40] sm:$0xff]  ;;  %v250_v5 = vld [vmem:[%s905_s28 + $0x50] sm:$0xff] }
  0x16   : > { %245 = vst [vmem:[%s175_s29 + $0x10] sm:$0xff] %v244_v2  ;;  %v252_v6 = vld [vmem:[%s905_s28 + $0x60] sm:$0xff]  ;;  %v254_v7 = vld [vmem:[%s905_s28 + $0x70] sm:$0xff] }
  0x17   : > { %247 = vst [vmem:[%s175_s29 + $0x18] sm:$0xff] %v246_v3  ;;  %v256_v8 = vld [vmem:[%s905_s28 + $0x80] sm:$0xff]  ;;  %v258_v9 = vld [vmem:[%s905_s28 + $0x90] sm:$0xff] }
  0x18   : > { %249 = vst [vmem:[%s175_s29 + $0x20] sm:$0xff] %v248_v4  ;;  %v260_v10 = vld [vmem:[%s905_s28 + $0xa0] sm:$0xff]  ;;  %v262_v11 = vld [vmem:[%s905_s28 + $0xb0] sm:$0xff] }
  0x19   : > { %251 = vst [vmem:[%s175_s29 + $0x28] sm:$0xff] %v250_v5  ;;  %v264_v12 = vld [vmem:[%s905_s28 + $0xc0] sm:$0xff]  ;;  %v266_v13 = vld [vmem:[%s905_s28 + $0xd0] sm:$0xff] }
  0x1a   : > { %253 = vst [vmem:[%s175_s29 + $0x30] sm:$0xff] %v252_v6  ;;  %v268_v14 = vld [vmem:[%s905_s28 + $0xe0] sm:$0xff]  ;;  %v270_v15 = vld [vmem:[%s905_s28 + $0xf0] sm:$0xff] }
  0x1b   : > { %255 = vst [vmem:[%s175_s29 + $0x38] sm:$0xff] %v254_v7 }
  0x1c   : > { %257 = vst [vmem:[%s175_s29 + $0x40] sm:$0xff] %v256_v8 }
  0x1d   : > { %259 = vst [vmem:[%s175_s29 + $0x48] sm:$0xff] %v258_v9 }
  0x1e   : > { %261 = vst [vmem:[%s175_s29 + $0x50] sm:$0xff] %v260_v10 }
  0x1f   : > { %263 = vst [vmem:[%s175_s29 + $0x58] sm:$0xff] %v262_v11 }
  0x20   : > { %265 = vst [vmem:[%s175_s29 + $0x60] sm:$0xff] %v264_v12 }
  0x21   : > { %267 = vst [vmem:[%s175_s29 + $0x68] sm:$0xff] %v266_v13 }
  0x22   : > { %269 = vst [vmem:[%s175_s29 + $0x70] sm:$0xff] %v268_v14 }
  0x23   : > { %271 = vst [vmem:[%s175_s29 + $0x78] sm:$0xff] %v270_v15 }
  0x24 PF: > { %p661_p8 = scmp.ge.s32.totalorder %s835_s16, 1  ;;  %p284_p9 = scmp.lt.s32.totalorder %s835_s16, 3 }
  0x26   : > { %p285_p10 = pnand %p661_p8, %p284_p9 }
  0x27   : > { %s291_s30 = sand.u32 (!%p285_p10), 1, %s819_s12   ;;  %s664_s8 = sshll.u32 (!%p285_p10), %s827_s14, 1 }
  0x28   : > { %288 = sbr.rel (%p285_p10) target bundleno = 225 (0xe1), region = 66  ;;  %s662_s4 = sshll.u32 (!%p285_p10), %s291_s30, 7 }
  0x29   : > { %s928_s5 = scalar_lea.vmem (!%p285_p10), [#allocation3], %s662_s4  ;;  %p337_p11 = scmp.lt.s32.totalorder (!%p285_p10), %s664_s8, 3 }
  0x2a   : > { %s663_s18 = sshll.u32 (!%p285_p10), %s291_s30, 5 }
  0x2b   : > { %s324_s19 = scalar_lea.vmem (!%p285_p10), [#allocation4], %s663_s18 }
  0x2d   : > { %v727_v16 = vld [vmem:[%s928_s5 + $0x70] sm:$0xf]  ;;  %v755_v17 = vld [vmem:[%s928_s5 + $0x74] sm:$0xf0]  ;;  %v754_v18 = vld [vmem:[%s928_s5 + $0x74] sm:$0xf] }
  0x2e   : > { %v728_v19 = vor.u32 %v755_v17, %v727_v16  ;;  %v729_v20 = vld [vmem:[%s928_s5 + $0x78] sm:$0xf0]  ;;  %v719_v21 = vld [vmem:[%s928_s5 + $0x60] sm:$0xf]  ;;  %v753_v22 = vld [vmem:[%s928_s5 + $0x64] sm:$0xf0] }
  0x2f   : > { %v732_v23 = vor.u32 %v754_v18, %v729_v20  ;;  %v752_v24 = vld [vmem:[%s928_s5 + $0x64] sm:$0xf]  ;;  %v721_v25 = vld [vmem:[%s928_s5 + $0x68] sm:$0xf0]  ;;  %v720_v26 = vor.u32 %v753_v22, %v719_v21  ;;  %v711_v28 = vld [vmem:[%s928_s5 + $0x50] sm:$0xf] }
  0x30   : > { %459 = vmatpush.bf16.msra.mxu0 %v728_v19  ;;  %v724_v27 = vor.u32 %v752_v24, %v721_v25  ;;  %v751_v29 = vld [vmem:[%s928_s5 + $0x54] sm:$0xf0]  ;;  %v750_v30 = vld [vmem:[%s928_s5 + $0x54] sm:$0xf]  ;;  %v713_v31 = vld [vmem:[%s928_s5 + $0x58] sm:$0xf0] }
  0x31   : > { %473 = vmatpush.bf16.msra.mxu1 %v732_v23  ;;  %v712_v32 = vor.u32 %v751_v29, %v711_v28  ;;  %v716_v33 = vor.u32 %v750_v30, %v713_v31  ;;  %v703_v34 = vld [vmem:[%s928_s5 + $0x40] sm:$0xf]  ;;  %v749_v35 = vld [vmem:[%s928_s5 + $0x44] sm:$0xf0]  ;;  %v748_v36 = vld [vmem:[%s928_s5 + $0x44] sm:$0xf] }
  0x32   : > { %v705_v37 = vld [vmem:[%s928_s5 + $0x48] sm:$0xf0]  ;;  %v704_v38 = vor.u32 %v749_v35, %v703_v34  ;;  %v695_v40 = vld [vmem:[%s928_s5 + $0x30] sm:$0xf]  ;;  %v747_v41 = vld [vmem:[%s928_s5 + $0x34] sm:$0xf0] }
  0x33   : > { %v708_v39 = vor.u32 %v748_v36, %v705_v37  ;;  %v746_v42 = vld [vmem:[%s928_s5 + $0x34] sm:$0xf]  ;;  %v697_v43 = vld [vmem:[%s928_s5 + $0x38] sm:$0xf0]  ;;  %v696_v44 = vor.u32 %v747_v41, %v695_v40  ;;  %v687_v46 = vld [vmem:[%s928_s5 + $0x20] sm:$0xf] }
  0x34   : > { %460 = vmatpush.bf16.msra.mxu0 %v720_v26  ;;  %v700_v45 = vor.u32 %v746_v42, %v697_v43  ;;  %v745_v47 = vld [vmem:[%s928_s5 + $0x24] sm:$0xf0]  ;;  %v744_v48 = vld [vmem:[%s928_s5 + $0x24] sm:$0xf]  ;;  %v689_v49 = vld [vmem:[%s928_s5 + $0x28] sm:$0xf0] }
  0x35   : > { %474 = vmatpush.bf16.msra.mxu1 %v724_v27  ;;  %v688_v50 = vor.u32 %v745_v47, %v687_v46  ;;  %v692_v51 = vor.u32 %v744_v48, %v689_v49  ;;  %v679_v52 = vld [vmem:[%s928_s5 + $0x10] sm:$0xf]  ;;  %v743_v53 = vld [vmem:[%s928_s5 + $0x14] sm:$0xf0]  ;;  %v742_v54 = vld [vmem:[%s928_s5 + $0x14] sm:$0xf] }
  0x36   : > { %v681_v55 = vld [vmem:[%s928_s5 + $0x18] sm:$0xf0]  ;;  %v680_v56 = vor.u32 %v743_v53, %v679_v52  ;;  %v671_v58 = vld [vmem:[%s928_s5] sm:$0xf]  ;;  %v741_v59 = vld [vmem:[%s928_s5 + $0x4] sm:$0xf0] }
  0x37   : > { %v684_v57 = vor.u32 %v742_v54, %v681_v55  ;;  %v740_v60 = vld [vmem:[%s928_s5 + $0x4] sm:$0xf]  ;;  %v673_v61 = vld [vmem:[%s928_s5 + $0x8] sm:$0xf0]  ;;  %v672_v62 = vor.u32 %v741_v59, %v671_v58  ;;  %s1004_s8 = smov (!%p337_p11, %s664_s8), 3  ;;  %s756_s12 = sshll.u32 (%p892_p6), %s827_s14, 4 }
  0x38   : > { %461 = vmatpush.bf16.msra.mxu0 %v712_v32  ;;  %v676_v63 = vor.u32 %v740_v60, %v673_v61  ;;  %v739_v0 = vld [vmem:[%s992_s0] sm:$0xff]  ;;  %s339_s11 = scalar_lea.vmem %s994_s2, %s1004_s8  ;;  %s528_s24 = scalar_lea.vmem (%p892_p6), %s995_s3, %s756_s12 }
  0x39   : > { %475 = vmatpush.bf16.msra.mxu1 %v716_v33  ;;  %v502_v1 = vld [vmem:[%s339_s11] sm:$0x3] }
  0x3a   : > { %v504_v2 = vperm.slane %v502_v1, 0  ;;  %v505_v3 = vperm.slane %v502_v1, 1 }
  0x3c   : > { %462 = vmatpush.bf16.msra.mxu0 %v704_v38 }
  0x3d   : > { %476 = vmatpush.bf16.msra.mxu1 %v708_v39 }
  0x40   : > { %463 = vmatpush.bf16.msra.mxu0 %v696_v44 }
  0x41   : > { %477 = vmatpush.bf16.msra.mxu1 %v700_v45 }
  0x44   : > { %464 = vmatpush.bf16.msra.mxu0 %v688_v50 }
  0x45   : > { %478 = vmatpush.bf16.msra.mxu1 %v692_v51 }
  0x48   : > { %465 = vmatpush.bf16.msra.mxu0 %v680_v56 }
  0x49   : > { %479 = vmatpush.bf16.msra.mxu1 %v684_v57 }
  0x4c   : > { %466 = vmatpush.bf16.msra.mxu0 %v672_v62 }
  0x4d   : > { %480 = vmatpush.bf16.msra.mxu1 %v676_v63 }
  0x4f   : > { %467 = vmatmul.bf16.vlgmr.msra.gmra.mxu0 %v739_v0 }
  0x50   : > { %481 = vmatmul.bf16.vlgmr.msra.gmra.mxu1 %v739_v0 }
  0xcc   : > { %v468_v4 = vpop.f32.mrf.mxu0 }
  0xcd   : > { %v508_v5 = vadd.f32 %v504_v2, %v468_v4  ;;  %v482_v6 = vpop.f32.mrf.mxu1 }
  0xce   : > { %v509_v7 = vadd.f32 %v505_v3, %v482_v6 }
  0xcf   : > { %512 = vst [vmem:[%s324_s19] sm:$0xff] %v508_v5 }
  0xd0   : > { %513 = vst [vmem:[%s324_s19 + $0x8] sm:$0xff] %v509_v7 }
  0xd4   : > { %v470_v8 = vpop.f32.mrf.mxu0  ;;  %522 = sbr.rel (!%p892_p6) target bundleno = 225 (0xe1), region = 82 }
  0xd5   : > { %v510_v9 = vadd.f32 %v504_v2, %v470_v8  ;;  %v484_v10 = vpop.f32.mrf.mxu1 }
  0xd6   : > { %v511_v11 = vadd.f32 %v505_v3, %v484_v10  ;;  %v541_v12 = vld [vmem:[%s324_s19] sm:$0xff] (%p892_p6) }
  0xd7   : > { %514 = vst [vmem:[%s324_s19 + $0x10] sm:$0xff] %v510_v9  ;;  %v543_v13 = vld [vmem:[%s324_s19 + $0x8] sm:$0xff] (%p892_p6) }
  0xd8   : > { %515 = vst [vmem:[%s324_s19 + $0x18] sm:$0xff] %v511_v11 }
  0xd9   : > { %542 = vst [vmem:[%s528_s24] sm:$0xff] %v541_v12 }
  0xda   : > { %544 = vst [vmem:[%s528_s24 + $0x8] sm:$0xff] %v543_v13 }
  0xde   : > { %v545_v14 = vld [vmem:[%s324_s19 + $0x10] sm:$0xff] }
  0xdf   : > { %v547_v15 = vld [vmem:[%s324_s19 + $0x18] sm:$0xff]  ;;  %546 = vst [vmem:[%s528_s24 + $0x20] sm:$0xff] %v545_v14 }
  0xe0   : > { %548 = vst [vmem:[%s528_s24 + $0x28] sm:$0xff] %v547_v15 }
  0xe1 PF: > { %s13_s16 = sadd.s32 1, %s835_s16   ;;  %s997_s12 = smov %s823_s13 }
  0xe2   : > { %p10_p12 = scmp.ge.s32.totalorder %s13_s16, 4   ;;  %s998_s13 = smov %s897_s22 }
  0xe3   : > { %s999_s14 = smov %s831_s15  ;;  %s1000_s15 = smov %s1002_s17 }
  0xe4   :  { %12 = sbr.rel (!%p10_p12) target bundleno = 3 (0x3), region = 142 }

// kernel: generator_forward.26
= control target key start
LH: loop header
LB: loop body
LE: loop exit
PB: predicated region body
PF: predicated region fallthrough
CT: control target
= control target key end

     0   :  { %vm14_vm0 = vcmask 253952   ;;  %vm22_vm1 = vcmask 261120   ;;  %v68_v0 = vmov 0.0   ;;  %s126_s0 = inlined_call_operand.vmem [shape: f32[32,32], index: 0, kind: input, shape index: {}]   ;;  %s127_s1 = inlined_call_operand.vmem [shape: f32[1,32], index: 1, kind: output, shape index: {0}]   ;;  %s128_s2 = inlined_call_operand.vmem [shape: f32[1,32], index: 2, kind: output, shape index: {1}]  }
   0x1   :  { %15 = vst.msk [vmem:[%s127_s1] sm:$0x1] %vm14_vm0, %v68_v0  ;;  %v17_v1 = vld [vmem:[%s126_s0] sm:$0xff]  ;;  %v18_v2 = vld [vmem:[%s126_s0 + $0x8] sm:$0xff]  ;;  %v19_v3 = vld [vmem:[%s126_s0 + $0x10] sm:$0xff] }
   0x2   :  { %v20_v4 = vld [vmem:[%s126_s0 + $0x18] sm:$0xff]  ;;  %v23_v5 = vsel %vm22_vm1, %v17_v1, 0.0  ;;  %v24_v6 = vsel %vm22_vm1, %v18_v2, 0.0  ;;  %v26_v7 = vsel %vm22_vm1, %v19_v3, 0.0  ;;  %16 = vst.msk [vmem:[%s128_s2] sm:$0x1] %vm14_vm0, %v68_v0  ;;  %v40_v8 = vmul.f32 %v17_v1, %v17_v1 }
   0x3   :  { %v25_v9 = vadd.f32 %v24_v6, %v23_v5  ;;  %v41_v10 = vmul.f32 %v18_v2, %v18_v2  ;;  %v42_v11 = vmul.f32 %v19_v3, %v19_v3  ;;  %v28_v12 = vsel %vm22_vm1, %v20_v4, 0.0 }
   0x4   :  { %v43_v13 = vmul.f32 %v20_v4, %v20_v4  ;;  %v44_v14 = vsel %vm22_vm1, %v40_v8, 0.0 }
   0x5   :  { %v27_v15 = vadd.f32 %v26_v7, %v25_v9  ;;  %v45_v16 = vsel %vm22_vm1, %v41_v10, 0.0  ;;  %v47_v17 = vsel %vm22_vm1, %v42_v11, 0.0 }
   0x6   :  { %v46_v18 = vadd.f32 %v45_v16, %v44_v14  ;;  %v49_v20 = vsel %vm22_vm1, %v43_v13, 0.0 }
   0x7   :  { %v29_v19 = vadd.f32 %v28_v12, %v27_v15 }
   0x8   :  { %v48_v21 = vadd.f32 %v47_v17, %v46_v18  ;;  %v21_v31 = vld [vmem:[%s127_s1] sm:$0x1] }
   0x9   :  { %v30_v22 = vrot.slane %v29_v19, 4  ;;  %v39_v36 = vld [vmem:[%s128_s2] sm:$0x1] }
   0xa   :  { %v50_v23 = vadd.f32 %v49_v20, %v48_v21 }
   0xb   :  { %v31_v24 = vadd.f32 %v30_v22, %v29_v19 }
   0xc   :  { %v51_v25 = vrot.slane %v50_v23, 4 }
   0xd   :  { %v32_v26 = vrot.slane %v31_v24, 2 }
   0xe   :  { %v52_v27 = vadd.f32 %v51_v25, %v50_v23 }
   0xf   :  { %v33_v28 = vadd.f32 %v32_v26, %v31_v24 }
  0x10   :  { %v53_v29 = vrot.slane %v52_v27, 2 }
  0x11   :  { %v34_v30 = vrot.slane %v33_v28, 1 }
  0x12   :  { %v54_v32 = vadd.f32 %v53_v29, %v52_v27 }
  0x13   :  { %v35_v33 = vadd.f32 %v34_v30, %v33_v28 }
  0x14   :  { %v55_v34 = vrot.slane %v54_v32, 1 }
  0x15   :  { %v36_v35 = vadd.f32 %v35_v33, %v21_v31 }
  0x16   :  { %v56_v37 = vadd.f32 %v55_v34, %v54_v32 }
  0x17   :  { %38 = vst.msk [vmem:[%s127_s1] sm:$0x1] %vm14_vm0, %v36_v35 }
  0x18   :  { %v57_v38 = vadd.f32 %v56_v37, %v39_v36 }
  0x1a   :  { %58 = vst.msk [vmem:[%s128_s2] sm:$0x1] %vm14_vm0, %v57_v38 }

// kernel: generator_forward.28
= control target key start
LH: loop header
LB: loop body
LE: loop exit
PB: predicated region body
PF: predicated region fallthrough
CT: control target
= control target key end

     0   :  { %s280_s1 = inlined_call_operand.vmem [shape: bf16[128,128], index: 1, kind: input, shape index: {}]   ;;  %s281_s2 = inlined_call_operand.vmem [shape: f32[1,128], index: 2, kind: input, shape index: {}]   ;;  %s282_s0 = inlined_call_operand.vmem [shape: bf16[32,128], index: 0, kind: input, shape index: {}]   ;;  %s283_s3 = inlined_call_operand.vmem [shape: f32[32,128], index: 3, kind: output, shape index: {}]  }
   0x1   :  { %v205_v0 = vld [vmem:[%s280_s1 + $0x38] sm:$0xff]  ;;  %v204_v1 = vld [vmem:[%s280_s1 + $0x30] sm:$0xff]  ;;  %v203_v2 = vld [vmem:[%s280_s1 + $0x28] sm:$0xff] }
   0x2   :  { %106 = vmatpush.bf16.msra.mxu0 %v205_v0  ;;  %206 = vmatpush.bf16.msra.mxu1 %v205_v0  ;;  %v202_v3 = vld [vmem:[%s280_s1 + $0x20] sm:$0xff]  ;;  %v201_v4 = vld [vmem:[%s280_s1 + $0x18] sm:$0xff]  ;;  %v200_v5 = vld [vmem:[%s280_s1 + $0x10] sm:$0xff] }
   0x3   :  { %v199_v6 = vld [vmem:[%s280_s1 + $0x8] sm:$0xff]  ;;  %v198_v7 = vld [vmem:[%s280_s1] sm:$0xff] }
   0x4   :  { %v196_v8 = vld [vmem:[%s282_s0] sm:$0xff]  ;;  %v197_v9 = vld [vmem:[%s282_s0 + $0x8] sm:$0xff] }
   0x5   :  { %v214_v10 = vld [vmem:[%s281_s2] ss:$0 sm:$0xff] }
   0x6   :  { %107 = vmatpush.bf16.msra.mxu0 %v204_v1  ;;  %207 = vmatpush.bf16.msra.mxu1 %v204_v1 }
   0xa   :  { %108 = vmatpush.bf16.msra.mxu0 %v203_v2  ;;  %208 = vmatpush.bf16.msra.mxu1 %v203_v2 }
   0xe   :  { %109 = vmatpush.bf16.msra.mxu0 %v202_v3  ;;  %209 = vmatpush.bf16.msra.mxu1 %v202_v3 }
  0x12   :  { %110 = vmatpush.bf16.msra.mxu0 %v201_v4  ;;  %210 = vmatpush.bf16.msra.mxu1 %v201_v4 }
  0x16   :  { %111 = vmatpush.bf16.msra.mxu0 %v200_v5  ;;  %211 = vmatpush.bf16.msra.mxu1 %v200_v5 }
  0x1a   :  { %112 = vmatpush.bf16.msra.mxu0 %v199_v6  ;;  %212 = vmatpush.bf16.msra.mxu1 %v199_v6 }
  0x1e   :  { %113 = vmatpush.bf16.msra.mxu0 %v198_v7  ;;  %213 = vmatpush.bf16.msra.mxu1 %v198_v7 }
  0x21   :  { %114 = vmatmul.bf16.vlgmr.msra.gmra.mxu0 %v196_v8  ;;  %119 = vmatmul.bf16.vlgmr.msra.gmra.mxu1 %v197_v9 }
  0x9e   :  { %v115_v11 = vpop.f32.mrf.mxu0  ;;  %v120_v12 = vpop.f32.mrf.mxu1 }
  0x9f   :  { %v144_v13 = vadd.f32 %v214_v10, %v115_v11  ;;  %v146_v14 = vadd.f32 %v214_v10, %v120_v12 }
  0xa1   :  { %148 = vst [vmem:[%s283_s3] sm:$0xff] %v144_v13 }
  0xa2   :  { %150 = vst [vmem:[%s283_s3 + $0x10] sm:$0xff] %v146_v14 }
  0xa6   :  { %v117_v15 = vpop.f32.mrf.mxu0  ;;  %v122_v16 = vpop.f32.mrf.mxu1 }
  0xa7   :  { %v145_v17 = vadd.f32 %v214_v10, %v117_v15  ;;  %v147_v18 = vadd.f32 %v214_v10, %v122_v16 }
  0xa9   :  { %149 = vst [vmem:[%s283_s3 + $0x8] sm:$0xff] %v145_v17 }
  0xaa   :  { %151 = vst [vmem:[%s283_s3 + $0x18] sm:$0xff] %v147_v18 }

// kernel: generator_forward.32
= control target key start
LH: loop header
LB: loop body
LE: loop exit
PB: predicated region body
PF: predicated region fallthrough
CT: control target
= control target key end

     0   :  { %vm14_vm0 = vcmask 122880   ;;  %vm34_vm1 = vcmask 130048   ;;  %v140_v0 = vmov 0.0   ;;  %s258_s0 = inlined_call_operand.vmem [shape: f32[128,16], index: 0, kind: input, shape index: {}]   ;;  %s259_s1 = inlined_call_operand.vmem [shape: f32[1,16], index: 1, kind: output, shape index: {0}]   ;;  %s260_s2 = inlined_call_operand.vmem [shape: f32[1,16], index: 2, kind: output, shape index: {1}]  }
   0x1   :  { %15 = vst.msk [vmem:[%s259_s1] sm:$0x1] %vm14_vm0, %v140_v0  ;;  %v17_v1 = vld [vmem:[%s258_s0] sm:$0xff]  ;;  %v18_v2 = vld [vmem:[%s258_s0 + $0x8] sm:$0xff]  ;;  %v19_v3 = vld [vmem:[%s258_s0 + $0x10] sm:$0xff] }
   0x2   :  { %v35_v4 = vsel %vm34_vm1, %v17_v1, 0.0  ;;  %v36_v5 = vsel %vm34_vm1, %v18_v2, 0.0  ;;  %v38_v6 = vsel %vm34_vm1, %v19_v3, 0.0  ;;  %v20_v7 = vld [vmem:[%s258_s0 + $0x18] sm:$0xff]  ;;  %v21_v10 = vld [vmem:[%s258_s0 + $0x20] sm:$0xff]  ;;  %v22_v13 = vld [vmem:[%s258_s0 + $0x28] sm:$0xff]  ;;  %v76_v15 = vmul.f32 %v17_v1, %v17_v1 }
   0x3   :  { %v37_v8 = vadd.f32 %v36_v5, %v35_v4  ;;  %v40_v9 = vsel %vm34_vm1, %v20_v7, 0.0  ;;  %v42_v12 = vsel %vm34_vm1, %v21_v10, 0.0  ;;  %16 = vst.msk [vmem:[%s260_s2] sm:$0x1] %vm14_vm0, %v140_v0  ;;  %v77_v16 = vmul.f32 %v18_v2, %v18_v2  ;;  %v23_v19 = vld [vmem:[%s258_s0 + $0x30] sm:$0xff]  ;;  %v24_v24 = vld [vmem:[%s258_s0 + $0x38] sm:$0xff] }
   0x4   :  { %v78_v17 = vmul.f32 %v19_v3, %v19_v3  ;;  %v44_v18 = vsel %vm34_vm1, %v22_v13, 0.0  ;;  %v79_v21 = vmul.f32 %v20_v7, %v20_v7  ;;  %v46_v22 = vsel %vm34_vm1, %v23_v19, 0.0  ;;  %v25_v31 = vld [vmem:[%s258_s0 + $0x40] sm:$0xff]  ;;  %v26_v37 = vld [vmem:[%s258_s0 + $0x48] sm:$0xff]  ;;  %v27_v43 = vld [vmem:[%s258_s0 + $0x50] sm:$0xff] }
   0x5   :  { %v39_v11 = vadd.f32 %v38_v6, %v37_v8  ;;  %v80_v23 = vmul.f32 %v21_v10, %v21_v10  ;;  %v92_v26 = vsel %vm34_vm1, %v76_v15, 0.0  ;;  %v93_v27 = vsel %vm34_vm1, %v77_v16, 0.0  ;;  %v28_v49 = vld [vmem:[%s258_s0 + $0x58] sm:$0xff]  ;;  %v29_v55 = vld [vmem:[%s258_s0 + $0x60] sm:$0xff]  ;;  %v30_v61 = vld [vmem:[%s258_s0 + $0x68] sm:$0xff] }
   0x6   :  { %v95_v28 = vsel %vm34_vm1, %v78_v17, 0.0  ;;  %v48_v29 = vsel %vm34_vm1, %v24_v24, 0.0  ;;  %v94_v30 = vadd.f32 %v93_v27, %v92_v26  ;;  %v81_v33 = vmul.f32 %v22_v13, %v22_v13  ;;  %v31_v3 = vld [vmem:[%s258_s0 + $0x70] sm:$0xff] }
   0x7   :  { %v41_v14 = vadd.f32 %v40_v9, %v39_v11  ;;  %v97_v34 = vsel %vm34_vm1, %v79_v21, 0.0  ;;  %v50_v35 = vsel %vm34_vm1, %v25_v31, 0.0  ;;  %v82_v39 = vmul.f32 %v23_v19, %v23_v19  ;;  %v32_v9 = vld [vmem:[%s258_s0 + $0x78] sm:$0xff] }
   0x8   :  { %v96_v36 = vadd.f32 %v95_v28, %v94_v30  ;;  %v99_v40 = vsel %vm34_vm1, %v80_v23, 0.0  ;;  %v52_v41 = vsel %vm34_vm1, %v26_v37, 0.0  ;;  %v83_v45 = vmul.f32 %v24_v24, %v24_v24 }
   0x9   :  { %v43_v20 = vadd.f32 %v42_v12, %v41_v14  ;;  %v101_v46 = vsel %vm34_vm1, %v81_v33, 0.0  ;;  %v54_v47 = vsel %vm34_vm1, %v27_v43, 0.0  ;;  %v84_v51 = vmul.f32 %v25_v31, %v25_v31 }
   0xa   :  { %v98_v42 = vadd.f32 %v97_v34, %v96_v36  ;;  %v103_v52 = vsel %vm34_vm1, %v82_v39, 0.0  ;;  %v56_v53 = vsel %vm34_vm1, %v28_v49, 0.0  ;;  %v85_v57 = vmul.f32 %v26_v37, %v26_v37  ;;  %v33_v36 = vld [vmem:[%s259_s1] sm:$0x1] }
   0xb   :  { %v45_v25 = vadd.f32 %v44_v18, %v43_v20  ;;  %v105_v58 = vsel %vm34_vm1, %v83_v45, 0.0  ;;  %v58_v59 = vsel %vm34_vm1, %v29_v55, 0.0  ;;  %v86_v63 = vmul.f32 %v27_v43, %v27_v43 }
   0xc   :  { %v100_v48 = vadd.f32 %v99_v40, %v98_v42  ;;  %v107_v0 = vsel %vm34_vm1, %v84_v51, 0.0  ;;  %v60_v1 = vsel %vm34_vm1, %v30_v61, 0.0  ;;  %v87_v5 = vmul.f32 %v28_v49, %v28_v49 }
   0xd   :  { %v47_v32 = vadd.f32 %v46_v22, %v45_v25  ;;  %v109_v6 = vsel %vm34_vm1, %v85_v57, 0.0  ;;  %v62_v7 = vsel %vm34_vm1, %v31_v3, 0.0  ;;  %v88_v11 = vmul.f32 %v29_v55, %v29_v55 }
   0xe   :  { %v102_v54 = vadd.f32 %v101_v46, %v100_v48  ;;  %v111_v12 = vsel %vm34_vm1, %v86_v63, 0.0  ;;  %v64_v13 = vsel %vm34_vm1, %v32_v9, 0.0  ;;  %v89_v16 = vmul.f32 %v30_v61, %v30_v61 }
   0xf   :  { %v49_v38 = vadd.f32 %v48_v29, %v47_v32  ;;  %v113_v17 = vsel %vm34_vm1, %v87_v5, 0.0  ;;  %v90_v20 = vmul.f32 %v31_v3, %v31_v3  ;;  %v115_v21 = vsel %vm34_vm1, %v88_v11, 0.0 }
  0x10   :  { %v104_v60 = vadd.f32 %v103_v52, %v102_v54  ;;  %v91_v24 = vmul.f32 %v32_v9, %v32_v9  ;;  %v117_v25 = vsel %vm34_vm1, %v89_v16, 0.0 }
  0x11   :  { %v51_v44 = vadd.f32 %v50_v35, %v49_v38  ;;  %v119_v28 = vsel %vm34_vm1, %v90_v20, 0.0 }
  0x12   :  { %v106_v2 = vadd.f32 %v105_v58, %v104_v60  ;;  %v121_v31 = vsel %vm34_vm1, %v91_v24, 0.0 }
  0x13   :  { %v53_v50 = vadd.f32 %v52_v41, %v51_v44  ;;  %v75_v44 = vld [vmem:[%s260_s2] sm:$0x1] }
  0x14   :  { %v108_v8 = vadd.f32 %v107_v0, %v106_v2 }
  0x15   :  { %v55_v56 = vadd.f32 %v54_v47, %v53_v50 }
  0x16   :  { %v110_v14 = vadd.f32 %v109_v6, %v108_v8 }
  0x17   :  { %v57_v62 = vadd.f32 %v56_v53, %v55_v56 }
  0x18   :  { %v112_v18 = vadd.f32 %v111_v12, %v110_v14 }
  0x19   :  { %v59_v4 = vadd.f32 %v58_v59, %v57_v62 }
  0x1a   :  { %v114_v22 = vadd.f32 %v113_v17, %v112_v18 }
  0x1b   :  { %v61_v10 = vadd.f32 %v60_v1, %v59_v4 }
  0x1c   :  { %v116_v26 = vadd.f32 %v115_v21, %v114_v22 }
  0x1d   :  { %v63_v15 = vadd.f32 %v62_v7, %v61_v10 }
  0x1e   :  { %v118_v29 = vadd.f32 %v117_v25, %v116_v26 }
  0x1f   :  { %v65_v19 = vadd.f32 %v64_v13, %v63_v15 }
  0x20   :  { %v120_v32 = vadd.f32 %v119_v28, %v118_v29 }
  0x21   :  { %v66_v23 = vrot.slane %v65_v19, 4 }
  0x22   :  { %v122_v34 = vadd.f32 %v121_v31, %v120_v32 }
  0x23   :  { %v67_v27 = vadd.f32 %v66_v23, %v65_v19 }
  0x24   :  { %v123_v37 = vrot.slane %v122_v34, 4 }
  0x25   :  { %v68_v30 = vrot.slane %v67_v27, 2 }
  0x26   :  { %v124_v39 = vadd.f32 %v123_v37, %v122_v34 }
  0x27   :  { %v69_v33 = vadd.f32 %v68_v30, %v67_v27 }
  0x28   :  { %v125_v41 = vrot.slane %v124_v39, 2 }
  0x29   :  { %v70_v35 = vrot.slane %v69_v33, 1 }
  0x2a   :  { %v126_v42 = vadd.f32 %v125_v41, %v124_v39 }
  0x2b   :  { %v71_v38 = vadd.f32 %v70_v35, %v69_v33 }
  0x2c   :  { %v127_v43 = vrot.slane %v126_v42, 1 }
  0x2d   :  { %v72_v40 = vadd.f32 %v71_v38, %v33_v36 }
  0x2e   :  { %v128_v45 = vadd.f32 %v127_v43, %v126_v42 }
  0x2f   :  { %74 = vst.msk [vmem:[%s259_s1] sm:$0x1] %vm14_vm0, %v72_v40 }
  0x30   :  { %v129_v46 = vadd.f32 %v128_v45, %v75_v44 }
  0x32   :  { %130 = vst.msk [vmem:[%s260_s2] sm:$0x1] %vm14_vm0, %v129_v46 }

// kernel: generator_forward.33
= control target key start
LH: loop header
LB: loop body
LE: loop exit
PB: predicated region body
PF: predicated region fallthrough
CT: control target
= control target key end

     0   :  { %vm70_vm0 = vcmask 130048   ;;  %s231_s0 = inlined_call_operand.vmem [shape: f32[128,16], index: 0, kind: input, shape index: {}]   ;;  %s232_s1 = inlined_call_operand.vmem [shape: f32[1,16], index: 1, kind: input, shape index: {}]   ;;  %s233_s2 = inlined_call_operand.vmem [shape: f32[1,16], index: 2, kind: input, shape index: {}]   ;;  %s234_s3 = inlined_call_operand.vmem [shape: f32[128,16], index: 3, kind: output, shape index: {}]  }
   0x1   :  { %v14_v0 = vld [vmem:[%s231_s0] sm:$0xff]  ;;  %v15_v3 = vld [vmem:[%s231_s0 + $0x8] sm:$0xff]  ;;  %v16_v6 = vld [vmem:[%s231_s0 + $0x10] sm:$0xff] }
   0x2   :  { %v91_v1 = vld [vmem:[%s232_s1] ss:$0 sm:$0xff]  ;;  %v17_v7 = vld [vmem:[%s231_s0 + $0x18] sm:$0xff]  ;;  %v19_v12 = vld [vmem:[%s231_s0 + $0x28] sm:$0xff] }
   0x3   :  { %v92_v2 = vld [vmem:[%s233_s2] ss:$0 sm:$0xff]  ;;  %v34_v4 = vmul.f32 %v91_v1, %v14_v0  ;;  %v35_v5 = vmul.f32 %v91_v1, %v15_v3  ;;  %v36_v9 = vmul.f32 %v91_v1, %v16_v6  ;;  %v37_v10 = vmul.f32 %v91_v1, %v17_v7  ;;  %v20_v13 = vld [vmem:[%s231_s0 + $0x30] sm:$0xff]  ;;  %v21_v14 = vld [vmem:[%s231_s0 + $0x38] sm:$0xff] }
   0x4   :  { %v18_v8 = vld [vmem:[%s231_s0 + $0x20] sm:$0xff]  ;;  %v39_v17 = vmul.f32 %v91_v1, %v19_v12  ;;  %v40_v18 = vmul.f32 %v91_v1, %v20_v13  ;;  %v23_v20 = vld [vmem:[%s231_s0 + $0x48] sm:$0xff]  ;;  %v41_v23 = vmul.f32 %v91_v1, %v21_v14  ;;  %v24_v24 = vld [vmem:[%s231_s0 + $0x50] sm:$0xff] }
   0x5   :  { %v38_v11 = vmul.f32 %v91_v1, %v18_v8  ;;  %v54_v15 = vadd.f32 %v92_v2, %v34_v4  ;;  %v55_v16 = vadd.f32 %v92_v2, %v35_v5  ;;  %v22_v19 = vld [vmem:[%s231_s0 + $0x40] sm:$0xff]  ;;  %v56_v21 = vadd.f32 %v92_v2, %v36_v9  ;;  %v25_v27 = vld [vmem:[%s231_s0 + $0x58] sm:$0xff]  ;;  %v27_v33 = vld [vmem:[%s231_s0 + $0x68] sm:$0xff] }
   0x6   :  { %v57_v22 = vadd.f32 %v92_v2, %v37_v10  ;;  %v42_v26 = vmul.f32 %v91_v1, %v22_v19  ;;  %v59_v28 = vadd.f32 %v92_v2, %v39_v17  ;;  %v43_v29 = vmul.f32 %v91_v1, %v23_v20  ;;  %v26_v30 = vld [vmem:[%s231_s0 + $0x60] sm:$0xff]  ;;  %v28_v36 = vld [vmem:[%s231_s0 + $0x70] sm:$0xff]  ;;  %v29_v39 = vld [vmem:[%s231_s0 + $0x78] sm:$0xff] }
   0x7   :  { %71 = vst.msk [vmem:[%s234_s3] sm:$0xff] %vm70_vm0, %v54_v15  ;;  %v58_v25 = vadd.f32 %v92_v2, %v38_v11  ;;  %v60_v31 = vadd.f32 %v92_v2, %v40_v18  ;;  %v44_v32 = vmul.f32 %v91_v1, %v24_v24  ;;  %v61_v34 = vadd.f32 %v92_v2, %v41_v23 }
   0x8   :  { %72 = vst.msk [vmem:[%s234_s3 + $0x8] sm:$0xff] %vm70_vm0, %v55_v16  ;;  %v45_v35 = vmul.f32 %v91_v1, %v25_v27  ;;  %v62_v37 = vadd.f32 %v92_v2, %v42_v26  ;;  %v46_v38 = vmul.f32 %v91_v1, %v26_v30  ;;  %v63_v40 = vadd.f32 %v92_v2, %v43_v29 }
   0x9   :  { %73 = vst.msk [vmem:[%s234_s3 + $0x10] sm:$0xff] %vm70_vm0, %v56_v21  ;;  %v47_v41 = vmul.f32 %v91_v1, %v27_v33  ;;  %v64_v42 = vadd.f32 %v92_v2, %v44_v32  ;;  %v48_v43 = vmul.f32 %v91_v1, %v28_v36  ;;  %v49_v45 = vmul.f32 %v91_v1, %v29_v39 }
   0xa   :  { %74 = vst.msk [vmem:[%s234_s3 + $0x18] sm:$0xff] %vm70_vm0, %v57_v22  ;;  %v65_v44 = vadd.f32 %v92_v2, %v45_v35  ;;  %v66_v46 = vadd.f32 %v92_v2, %v46_v38 }
   0xb   :  { %75 = vst.msk [vmem:[%s234_s3 + $0x20] sm:$0xff] %vm70_vm0, %v58_v25  ;;  %v67_v47 = vadd.f32 %v92_v2, %v47_v41  ;;  %v68_v48 = vadd.f32 %v92_v2, %v48_v43  ;;  %v69_v49 = vadd.f32 %v92_v2, %v49_v45 }
   0xc   :  { %76 = vst.msk [vmem:[%s234_s3 + $0x28] sm:$0xff] %vm70_vm0, %v59_v28 }
   0xd   :  { %77 = vst.msk [vmem:[%s234_s3 + $0x30] sm:$0xff] %vm70_vm0, %v60_v31 }
   0xe   :  { %78 = vst.msk [vmem:[%s234_s3 + $0x38] sm:$0xff] %vm70_vm0, %v61_v34 }
   0xf   :  { %79 = vst.msk [vmem:[%s234_s3 + $0x40] sm:$0xff] %vm70_vm0, %v62_v37 }
  0x10   :  { %80 = vst.msk [vmem:[%s234_s3 + $0x48] sm:$0xff] %vm70_vm0, %v63_v40 }
  0x11   :  { %81 = vst.msk [vmem:[%s234_s3 + $0x50] sm:$0xff] %vm70_vm0, %v64_v42 }
  0x12   :  { %82 = vst.msk [vmem:[%s234_s3 + $0x58] sm:$0xff] %vm70_vm0, %v65_v44 }
  0x13   :  { %83 = vst.msk [vmem:[%s234_s3 + $0x60] sm:$0xff] %vm70_vm0, %v66_v46 }
  0x14   :  { %84 = vst.msk [vmem:[%s234_s3 + $0x68] sm:$0xff] %vm70_vm0, %v67_v47 }
  0x15   :  { %85 = vst.msk [vmem:[%s234_s3 + $0x70] sm:$0xff] %vm70_vm0, %v68_v48 }
  0x16   :  { %86 = vst.msk [vmem:[%s234_s3 + $0x78] sm:$0xff] %vm70_vm0, %v69_v49 }

// kernel: generator_forward.34
= control target key start
LH: loop header
LB: loop body
LE: loop exit
PB: predicated region body
PF: predicated region fallthrough
CT: control target
= control target key end

     0   :  { %s542_s1 = inlined_call_operand.vmem [shape: bf16[128,128], index: 1, kind: input, shape index: {}]   ;;  %s543_s2 = inlined_call_operand.vmem [shape: f32[1,128], index: 2, kind: input, shape index: {}]   ;;  %s544_s0 = inlined_call_operand.vmem [shape: bf16[128,128], index: 0, kind: input, shape index: {}]   ;;  %s545_s3 = inlined_call_operand.vmem [shape: f32[128,128], index: 3, kind: output, shape index: {}]  }
   0x1   :  { %v397_v0 = vld [vmem:[%s542_s1 + $0x38] sm:$0xff]  ;;  %v396_v1 = vld [vmem:[%s542_s1 + $0x30] sm:$0xff]  ;;  %v395_v2 = vld [vmem:[%s542_s1 + $0x28] sm:$0xff] }
   0x2   :  { %178 = vmatpush.bf16.msra.mxu0 %v397_v0  ;;  %398 = vmatpush.bf16.msra.mxu1 %v397_v0  ;;  %v394_v3 = vld [vmem:[%s542_s1 + $0x20] sm:$0xff]  ;;  %v393_v4 = vld [vmem:[%s542_s1 + $0x18] sm:$0xff]  ;;  %v392_v5 = vld [vmem:[%s542_s1 + $0x10] sm:$0xff] }
   0x3   :  { %399 = vmatpush.bf16.msra.mxu2 %v397_v0  ;;  %400 = vmatpush.bf16.msra.mxu3 %v397_v0  ;;  %v391_v6 = vld [vmem:[%s542_s1 + $0x8] sm:$0xff]  ;;  %v390_v7 = vld [vmem:[%s542_s1] sm:$0xff]  ;;  %v384_v9 = vld [vmem:[%s544_s0 + $0x10] sm:$0xff] }
   0x4   :  { %v382_v8 = vld [vmem:[%s544_s0] sm:$0xff]  ;;  %v388_v11 = vld [vmem:[%s544_s0 + $0x30] sm:$0xff]  ;;  %v383_v12 = vld [vmem:[%s544_s0 + $0x8] sm:$0xff] }
   0x5   :  { %v386_v10 = vld [vmem:[%s544_s0 + $0x20] sm:$0xff]  ;;  %v385_v13 = vld [vmem:[%s544_s0 + $0x18] sm:$0xff]  ;;  %v387_v14 = vld [vmem:[%s544_s0 + $0x28] sm:$0xff] }
   0x6   :  { %179 = vmatpush.bf16.msra.mxu0 %v396_v1  ;;  %401 = vmatpush.bf16.msra.mxu1 %v396_v1  ;;  %v389_v15 = vld [vmem:[%s544_s0 + $0x38] sm:$0xff]  ;;  %v422_v16 = vld [vmem:[%s543_s2] ss:$0 sm:$0xff] }
   0x7   :  { %402 = vmatpush.bf16.msra.mxu2 %v396_v1  ;;  %403 = vmatpush.bf16.msra.mxu3 %v396_v1 }
   0xa   :  { %180 = vmatpush.bf16.msra.mxu0 %v395_v2  ;;  %404 = vmatpush.bf16.msra.mxu1 %v395_v2 }
   0xb   :  { %405 = vmatpush.bf16.msra.mxu2 %v395_v2  ;;  %406 = vmatpush.bf16.msra.mxu3 %v395_v2 }
   0xe   :  { %181 = vmatpush.bf16.msra.mxu0 %v394_v3  ;;  %407 = vmatpush.bf16.msra.mxu1 %v394_v3 }
   0xf   :  { %408 = vmatpush.bf16.msra.mxu2 %v394_v3  ;;  %409 = vmatpush.bf16.msra.mxu3 %v394_v3 }
  0x12   :  { %182 = vmatpush.bf16.msra.mxu0 %v393_v4  ;;  %410 = vmatpush.bf16.msra.mxu1 %v393_v4 }
  0x13   :  { %411 = vmatpush.bf16.msra.mxu2 %v393_v4  ;;  %412 = vmatpush.bf16.msra.mxu3 %v393_v4 }
  0x16   :  { %183 = vmatpush.bf16.msra.mxu0 %v392_v5  ;;  %413 = vmatpush.bf16.msra.mxu1 %v392_v5 }
  0x17   :  { %414 = vmatpush.bf16.msra.mxu2 %v392_v5  ;;  %415 = vmatpush.bf16.msra.mxu3 %v392_v5 }
  0x1a   :  { %184 = vmatpush.bf16.msra.mxu0 %v391_v6  ;;  %416 = vmatpush.bf16.msra.mxu1 %v391_v6 }
  0x1b   :  { %417 = vmatpush.bf16.msra.mxu2 %v391_v6  ;;  %418 = vmatpush.bf16.msra.mxu3 %v391_v6 }
  0x1e   :  { %185 = vmatpush.bf16.msra.mxu0 %v390_v7  ;;  %419 = vmatpush.bf16.msra.mxu1 %v390_v7 }
  0x1f   :  { %420 = vmatpush.bf16.msra.mxu2 %v390_v7  ;;  %421 = vmatpush.bf16.msra.mxu3 %v390_v7 }
  0x21   :  { %186 = vmatmul.bf16.vlgmr.msra.gmra.mxu0 %v382_v8  ;;  %196 = vmatmul.bf16.vlgmr.msra.gmra.mxu1 %v384_v9 }
  0x22   :  { %206 = vmatmul.bf16.vlgmr.msra.gmra.mxu2 %v386_v10  ;;  %216 = vmatmul.bf16.vlgmr.msra.gmra.mxu3 %v388_v11 }
  0x31   :  { %191 = vmatmul.bf16.gmra.mxu0 %v383_v12  ;;  %201 = vmatmul.bf16.gmra.mxu1 %v385_v13 }
  0x32   :  { %211 = vmatmul.bf16.gmra.mxu2 %v387_v14  ;;  %221 = vmatmul.bf16.gmra.mxu3 %v389_v15 }
  0x9e   :  { %v187_v17 = vpop.f32.mrf.mxu0  ;;  %v197_v18 = vpop.f32.mrf.mxu1 }
  0x9f   :  { %v282_v19 = vadd.f32 %v422_v16, %v187_v17  ;;  %v286_v20 = vadd.f32 %v422_v16, %v197_v18 }
  0xa1   :  { %298 = vst [vmem:[%s545_s3] sm:$0xff] %v282_v19 }
  0xa2   :  { %302 = vst [vmem:[%s545_s3 + $0x20] sm:$0xff] %v286_v20 }
  0xa5   :  { %v207_v21 = vpop.f32.mrf.mxu2  ;;  %v217_v22 = vpop.f32.mrf.mxu3 }
  0xa6   :  { %v290_v23 = vadd.f32 %v422_v16, %v207_v21  ;;  %v294_v24 = vadd.f32 %v422_v16, %v217_v22  ;;  %v189_v25 = vpop.f32.mrf.mxu0  ;;  %v199_v26 = vpop.f32.mrf.mxu1 }
  0xa7   :  { %v283_v27 = vadd.f32 %v422_v16, %v189_v25  ;;  %v287_v28 = vadd.f32 %v422_v16, %v199_v26 }
  0xa8   :  { %306 = vst [vmem:[%s545_s3 + $0x40] sm:$0xff] %v290_v23 }
  0xa9   :  { %310 = vst [vmem:[%s545_s3 + $0x60] sm:$0xff] %v294_v24 }
  0xaa   :  { %299 = vst [vmem:[%s545_s3 + $0x8] sm:$0xff] %v283_v27 }
  0xab   :  { %303 = vst [vmem:[%s545_s3 + $0x28] sm:$0xff] %v287_v28 }
  0xad   :  { %v209_v29 = vpop.f32.mrf.mxu2  ;;  %v219_v30 = vpop.f32.mrf.mxu3 }
  0xae   :  { %v291_v31 = vadd.f32 %v422_v16, %v209_v29  ;;  %v295_v32 = vadd.f32 %v422_v16, %v219_v30  ;;  %v192_v33 = vpop.f32.mrf.mxu0  ;;  %v202_v34 = vpop.f32.mrf.mxu1 }
  0xaf   :  { %v284_v35 = vadd.f32 %v422_v16, %v192_v33  ;;  %v288_v36 = vadd.f32 %v422_v16, %v202_v34 }
  0xb0   :  { %307 = vst [vmem:[%s545_s3 + $0x48] sm:$0xff] %v291_v31 }
  0xb1   :  { %311 = vst [vmem:[%s545_s3 + $0x68] sm:$0xff] %v295_v32 }
  0xb2   :  { %300 = vst [vmem:[%s545_s3 + $0x10] sm:$0xff] %v284_v35 }
  0xb3   :  { %304 = vst [vmem:[%s545_s3 + $0x30] sm:$0xff] %v288_v36 }
  0xb5   :  { %v212_v37 = vpop.f32.mrf.mxu2  ;;  %v222_v38 = vpop.f32.mrf.mxu3 }
  0xb6   :  { %v292_v39 = vadd.f32 %v422_v16, %v212_v37  ;;  %v296_v40 = vadd.f32 %v422_v16, %v222_v38  ;;  %v194_v41 = vpop.f32.mrf.mxu0  ;;  %v204_v42 = vpop.f32.mrf.mxu1 }
  0xb7   :  { %v285_v43 = vadd.f32 %v422_v16, %v194_v41  ;;  %v289_v44 = vadd.f32 %v422_v16, %v204_v42 }
  0xb8   :  { %308 = vst [vmem:[%s545_s3 + $0x50] sm:$0xff] %v292_v39 }
  0xb9   :  { %312 = vst [vmem:[%s545_s3 + $0x70] sm:$0xff] %v296_v40 }
  0xba   :  { %301 = vst [vmem:[%s545_s3 + $0x18] sm:$0xff] %v285_v43 }
  0xbb   :  { %305 = vst [vmem:[%s545_s3 + $0x38] sm:$0xff] %v289_v44 }
  0xbd   :  { %v214_v45 = vpop.f32.mrf.mxu2  ;;  %v224_v46 = vpop.f32.mrf.mxu3 }
  0xbe   :  { %v293_v47 = vadd.f32 %v422_v16, %v214_v45  ;;  %v297_v48 = vadd.f32 %v422_v16, %v224_v46 }
  0xc0   :  { %309 = vst [vmem:[%s545_s3 + $0x58] sm:$0xff] %v293_v47 }
  0xc1   :  { %313 = vst [vmem:[%s545_s3 + $0x78] sm:$0xff] %v297_v48 }

// kernel: generator_forward.38
= control target key start
LH: loop header
LB: loop body
LE: loop exit
PB: predicated region body
PF: predicated region fallthrough
CT: control target
= control target key end

     0   :  { %vm14_vm0 = vcmask 57344   ;;  %vm82_vm1 = vcmask 64512   ;;  %v428_v0 = vmov 0.0   ;;  %s786_s0 = inlined_call_operand.vmem [shape: f32[512,8], index: 0, kind: input, shape index: {}]   ;;  %s787_s1 = inlined_call_operand.vmem [shape: f32[1,8], index: 1, kind: output, shape index: {0}]   ;;  %s788_s2 = inlined_call_operand.vmem [shape: f32[1,8], index: 2, kind: output, shape index: {1}]  }
   0x1   :  { %15 = vst.msk [vmem:[%s787_s1] sm:$0x1] %vm14_vm0, %v428_v0  ;;  %v17_v1 = vld [vmem:[%s786_s0] sm:$0xff]  ;;  %v18_v2 = vld [vmem:[%s786_s0 + $0x8] sm:$0xff]  ;;  %v19_v3 = vld [vmem:[%s786_s0 + $0x10] sm:$0xff] }
   0x2   :  { %16 = vst.msk [vmem:[%s788_s2] sm:$0x1] %vm14_vm0, %v428_v0  ;;  %v83_v4 = vsel %vm82_vm1, %v17_v1, 0.0  ;;  %v84_v5 = vsel %vm82_vm1, %v18_v2, 0.0  ;;  %v86_v6 = vsel %vm82_vm1, %v19_v3, 0.0  ;;  %v20_v7 = vld [vmem:[%s786_s0 + $0x18] sm:$0xff]  ;;  %v220_v19 = vmul.f32 %v17_v1, %v17_v1 }
   0x3   :  { %v85_v8 = vadd.f32 %v84_v5, %v83_v4  ;;  %v88_v9 = vsel %vm82_vm1, %v20_v7, 0.0  ;;  %v21_v10 = vld [vmem:[%s786_s0 + $0x20] sm:$0xff]  ;;  %v22_v13 = vld [vmem:[%s786_s0 + $0x28] sm:$0xff]  ;;  %v23_v16 = vld [vmem:[%s786_s0 + $0x30] sm:$0xff]  ;;  %v221_v20 = vmul.f32 %v18_v2, %v18_v2  ;;  %v222_v24 = vmul.f32 %v19_v3, %v19_v3 }
   0x4   :  { %v90_v12 = vsel %vm82_vm1, %v21_v10, 0.0  ;;  %v92_v15 = vsel %vm82_vm1, %v22_v13, 0.0  ;;  %v94_v18 = vsel %vm82_vm1, %v23_v16, 0.0  ;;  %v24_v21 = vld [vmem:[%s786_s0 + $0x38] sm:$0xff]  ;;  %v223_v25 = vmul.f32 %v20_v7, %v20_v7  ;;  %v25_v26 = vld [vmem:[%s786_s0 + $0x40] sm:$0xff]  ;;  %v26_v32 = vld [vmem:[%s786_s0 + $0x48] sm:$0xff] }
   0x5   :  { %v87_v11 = vadd.f32 %v86_v6, %v85_v8  ;;  %v96_v23 = vsel %vm82_vm1, %v24_v21, 0.0  ;;  %v98_v28 = vsel %vm82_vm1, %v25_v26, 0.0  ;;  %v224_v29 = vmul.f32 %v21_v10, %v21_v10  ;;  %v27_v39 = vld [vmem:[%s786_s0 + $0x50] sm:$0xff]  ;;  %v28_v45 = vld [vmem:[%s786_s0 + $0x58] sm:$0xff]  ;;  %v29_v51 = vld [vmem:[%s786_s0 + $0x60] sm:$0xff] }
   0x6   :  { %v284_v30 = vsel %vm82_vm1, %v220_v19, 0.0  ;;  %v285_v31 = vsel %vm82_vm1, %v221_v20, 0.0  ;;  %v100_v35 = vsel %vm82_vm1, %v26_v32, 0.0  ;;  %v225_v36 = vmul.f32 %v22_v13, %v22_v13  ;;  %v30_v57 = vld [vmem:[%s786_s0 + $0x68] sm:$0xff]  ;;  %v31_v63 = vld [vmem:[%s786_s0 + $0x70] sm:$0xff]  ;;  %v32_v5 = vld [vmem:[%s786_s0 + $0x78] sm:$0xff] }
   0x7   :  { %v89_v14 = vadd.f32 %v88_v9, %v87_v11  ;;  %v286_v34 = vadd.f32 %v285_v31, %v284_v30  ;;  %v287_v37 = vsel %vm82_vm1, %v222_v24, 0.0  ;;  %v289_v38 = vsel %vm82_vm1, %v223_v25, 0.0  ;;  %v33_v11 = vld [vmem:[%s786_s0 + $0x80] sm:$0xff] }
   0x8   :  { %v102_v42 = vsel %vm82_vm1, %v27_v39, 0.0  ;;  %v226_v43 = vmul.f32 %v23_v16, %v23_v16  ;;  %v291_v44 = vsel %vm82_vm1, %v224_v29, 0.0  ;;  %v104_v48 = vsel %vm82_vm1, %v28_v45, 0.0  ;;  %v36_v29 = vld [vmem:[%s786_s0 + $0x98] sm:$0xff] }
   0x9   :  { %v91_v17 = vadd.f32 %v90_v12, %v89_v14  ;;  %v288_v41 = vadd.f32 %v287_v37, %v286_v34  ;;  %v227_v49 = vmul.f32 %v24_v21, %v24_v21  ;;  %v293_v50 = vsel %vm82_vm1, %v225_v36, 0.0 }
   0xa   :  { %v106_v54 = vsel %vm82_vm1, %v29_v51, 0.0  ;;  %v228_v55 = vmul.f32 %v25_v26, %v25_v26  ;;  %v295_v56 = vsel %vm82_vm1, %v226_v43, 0.0  ;;  %v108_v60 = vsel %vm82_vm1, %v30_v57, 0.0 }
   0xb   :  { %v93_v22 = vadd.f32 %v92_v15, %v91_v17  ;;  %v290_v47 = vadd.f32 %v289_v38, %v288_v41  ;;  %v229_v61 = vmul.f32 %v26_v32, %v26_v32  ;;  %v297_v62 = vsel %vm82_vm1, %v227_v49, 0.0  ;;  %v34_v17 = vld [vmem:[%s786_s0 + $0x88] sm:$0xff] }
   0xc   :  { %v110_v2 = vsel %vm82_vm1, %v31_v63, 0.0  ;;  %v230_v3 = vmul.f32 %v27_v39, %v27_v39  ;;  %v299_v4 = vsel %vm82_vm1, %v228_v55, 0.0  ;;  %v112_v8 = vsel %vm82_vm1, %v32_v5, 0.0  ;;  %v38_v41 = vld [vmem:[%s786_s0 + $0xa8] sm:$0xff] }
   0xd   :  { %v95_v27 = vadd.f32 %v94_v18, %v93_v22  ;;  %v292_v53 = vadd.f32 %v291_v44, %v290_v47  ;;  %v231_v9 = vmul.f32 %v28_v45, %v28_v45  ;;  %v301_v10 = vsel %vm82_vm1, %v229_v61, 0.0  ;;  %v39_v47 = vld [vmem:[%s786_s0 + $0xb0] sm:$0xff] }
   0xe   :  { %v114_v14 = vsel %vm82_vm1, %v33_v11, 0.0  ;;  %v232_v15 = vmul.f32 %v29_v51, %v29_v51  ;;  %v303_v16 = vsel %vm82_vm1, %v230_v3, 0.0  ;;  %v116_v20 = vsel %vm82_vm1, %v34_v17, 0.0 }
   0xf   :  { %v97_v33 = vadd.f32 %v96_v23, %v95_v27  ;;  %v294_v59 = vadd.f32 %v293_v50, %v292_v53  ;;  %v233_v21 = vmul.f32 %v30_v57, %v30_v57  ;;  %v305_v22 = vsel %vm82_vm1, %v231_v9, 0.0  ;;  %v35_v23 = vld [vmem:[%s786_s0 + $0x90] sm:$0xff]  ;;  %v40_v53 = vld [vmem:[%s786_s0 + $0xb8] sm:$0xff] }
  0x10   :  { %v118_v26 = vsel %vm82_vm1, %v35_v23, 0.0  ;;  %v234_v27 = vmul.f32 %v31_v63, %v31_v63  ;;  %v120_v32 = vsel %vm82_vm1, %v36_v29, 0.0  ;;  %v236_v39 = vmul.f32 %v33_v11, %v33_v11 }
  0x11   :  { %v99_v40 = vadd.f32 %v98_v28, %v97_v33  ;;  %v296_v1 = vadd.f32 %v295_v56, %v294_v59  ;;  %v307_v28 = vsel %vm82_vm1, %v232_v15, 0.0  ;;  %v235_v33 = vmul.f32 %v32_v5, %v32_v5  ;;  %v41_v59 = vld [vmem:[%s786_s0 + $0xc0] sm:$0xff] }
  0x12   :  { %v309_v34 = vsel %vm82_vm1, %v233_v21, 0.0  ;;  %v124_v44 = vsel %vm82_vm1, %v38_v41, 0.0  ;;  %v237_v45 = vmul.f32 %v34_v17, %v34_v17  ;;  %v126_v50 = vsel %vm82_vm1, %v39_v47, 0.0 }
  0x13   :  { %v101_v46 = vadd.f32 %v100_v35, %v99_v40  ;;  %v298_v7 = vadd.f32 %v297_v62, %v296_v1  ;;  %v37_v35 = vld [vmem:[%s786_s0 + $0xa0] sm:$0xff]  ;;  %v311_v40 = vsel %vm82_vm1, %v234_v27, 0.0  ;;  %v238_v51 = vmul.f32 %v35_v23, %v35_v23  ;;  %v42_v1 = vld [vmem:[%s786_s0 + $0xc8] sm:$0xff] }
  0x14   :  { %v122_v38 = vsel %vm82_vm1, %v37_v35, 0.0  ;;  %v128_v56 = vsel %vm82_vm1, %v40_v53, 0.0  ;;  %v239_v57 = vmul.f32 %v36_v29, %v36_v29  ;;  %v130_v62 = vsel %vm82_vm1, %v41_v59, 0.0 }
  0x15   :  { %v103_v52 = vadd.f32 %v102_v42, %v101_v46  ;;  %v300_v13 = vadd.f32 %v299_v4, %v298_v7  ;;  %v313_v46 = vsel %vm82_vm1, %v235_v33, 0.0  ;;  %v240_v63 = vmul.f32 %v37_v35, %v37_v35  ;;  %v43_v7 = vld [vmem:[%s786_s0 + $0xd0] sm:$0xff] }
  0x16   :  { %v132_v4 = vsel %vm82_vm1, %v42_v1, 0.0  ;;  %v241_v5 = vmul.f32 %v38_v41, %v38_v41  ;;  %v242_v11 = vmul.f32 %v39_v47, %v39_v47  ;;  %v243_v17 = vmul.f32 %v40_v53, %v40_v53 }
  0x17   :  { %v105_v58 = vadd.f32 %v104_v48, %v103_v52  ;;  %v302_v19 = vadd.f32 %v301_v10, %v300_v13  ;;  %v315_v52 = vsel %vm82_vm1, %v236_v39, 0.0  ;;  %v134_v10 = vsel %vm82_vm1, %v43_v7, 0.0  ;;  %v44_v13 = vld [vmem:[%s786_s0 + $0xd8] sm:$0xff] }
  0x18   :  { %v244_v23 = vmul.f32 %v41_v59, %v41_v59  ;;  %v245_v29 = vmul.f32 %v42_v1, %v42_v1  ;;  %v246_v35 = vmul.f32 %v43_v7, %v43_v7  ;;  %v247_v41 = vmul.f32 %v44_v13, %v44_v13 }
  0x19   :  { %v107_v0 = vadd.f32 %v106_v54, %v105_v58  ;;  %v304_v25 = vadd.f32 %v303_v16, %v302_v19  ;;  %v317_v58 = vsel %vm82_vm1, %v237_v45, 0.0  ;;  %v136_v16 = vsel %vm82_vm1, %v44_v13, 0.0  ;;  %v45_v19 = vld [vmem:[%s786_s0 + $0xe0] sm:$0xff] }
  0x1a   :  { %v248_v47 = vmul.f32 %v45_v19, %v45_v19 }
  0x1b   :  { %v109_v6 = vadd.f32 %v108_v60, %v107_v0  ;;  %v306_v31 = vadd.f32 %v305_v22, %v304_v25  ;;  %v319_v0 = vsel %vm82_vm1, %v238_v51, 0.0  ;;  %v138_v22 = vsel %vm82_vm1, %v45_v19, 0.0  ;;  %v46_v25 = vld [vmem:[%s786_s0 + $0xe8] sm:$0xff] }
  0x1c   :  { %v249_v53 = vmul.f32 %v46_v25, %v46_v25 }
  0x1d   :  { %v111_v12 = vadd.f32 %v110_v2, %v109_v6  ;;  %v308_v37 = vadd.f32 %v307_v28, %v306_v31  ;;  %v321_v6 = vsel %vm82_vm1, %v239_v57, 0.0  ;;  %v140_v28 = vsel %vm82_vm1, %v46_v25, 0.0  ;;  %v47_v31 = vld [vmem:[%s786_s0 + $0xf0] sm:$0xff] }
  0x1e   :  { %v250_v59 = vmul.f32 %v47_v31, %v47_v31 }
  0x1f   :  { %v113_v18 = vadd.f32 %v112_v8, %v111_v12  ;;  %v310_v43 = vadd.f32 %v309_v34, %v308_v37  ;;  %v323_v12 = vsel %vm82_vm1, %v240_v63, 0.0  ;;  %v142_v34 = vsel %vm82_vm1, %v47_v31, 0.0  ;;  %v48_v37 = vld [vmem:[%s786_s0 + $0xf8] sm:$0xff] }
  0x20   :  { %v251_v1 = vmul.f32 %v48_v37, %v48_v37 }
  0x21   :  { %v115_v24 = vadd.f32 %v114_v14, %v113_v18  ;;  %v312_v49 = vadd.f32 %v311_v40, %v310_v43  ;;  %v325_v18 = vsel %vm82_vm1, %v241_v5, 0.0  ;;  %v144_v40 = vsel %vm82_vm1, %v48_v37, 0.0  ;;  %v49_v43 = vld [vmem:[%s786_s0 + $0x100] sm:$0xff] }
  0x22   :  { %v252_v7 = vmul.f32 %v49_v43, %v49_v43 }
  0x23   :  { %v117_v30 = vadd.f32 %v116_v20, %v115_v24  ;;  %v314_v55 = vadd.f32 %v313_v46, %v312_v49  ;;  %v327_v24 = vsel %vm82_vm1, %v242_v11, 0.0  ;;  %v146_v46 = vsel %vm82_vm1, %v49_v43, 0.0  ;;  %v50_v49 = vld [vmem:[%s786_s0 + $0x108] sm:$0xff] }
  0x24   :  { %v253_v13 = vmul.f32 %v50_v49, %v50_v49 }
  0x25   :  { %v119_v36 = vadd.f32 %v118_v26, %v117_v30  ;;  %v316_v61 = vadd.f32 %v315_v52, %v314_v55  ;;  %v329_v30 = vsel %vm82_vm1, %v243_v17, 0.0  ;;  %v148_v52 = vsel %vm82_vm1, %v50_v49, 0.0  ;;  %v51_v55 = vld [vmem:[%s786_s0 + $0x110] sm:$0xff] }
  0x26   :  { %v254_v19 = vmul.f32 %v51_v55, %v51_v55 }
  0x27   :  { %v121_v42 = vadd.f32 %v120_v32, %v119_v36  ;;  %v318_v3 = vadd.f32 %v317_v58, %v316_v61  ;;  %v331_v36 = vsel %vm82_vm1, %v244_v23, 0.0  ;;  %v150_v58 = vsel %vm82_vm1, %v51_v55, 0.0  ;;  %v52_v61 = vld [vmem:[%s786_s0 + $0x118] sm:$0xff] }
  0x28   :  { %v255_v25 = vmul.f32 %v52_v61, %v52_v61 }
  0x29   :  { %v123_v48 = vadd.f32 %v122_v38, %v121_v42  ;;  %v320_v9 = vadd.f32 %v319_v0, %v318_v3  ;;  %v333_v42 = vsel %vm82_vm1, %v245_v29, 0.0  ;;  %v152_v0 = vsel %vm82_vm1, %v52_v61, 0.0  ;;  %v53_v3 = vld [vmem:[%s786_s0 + $0x120] sm:$0xff] }
  0x2a   :  { %v256_v31 = vmul.f32 %v53_v3, %v53_v3 }
  0x2b   :  { %v125_v54 = vadd.f32 %v124_v44, %v123_v48  ;;  %v322_v15 = vadd.f32 %v321_v6, %v320_v9  ;;  %v335_v48 = vsel %vm82_vm1, %v246_v35, 0.0  ;;  %v154_v6 = vsel %vm82_vm1, %v53_v3, 0.0  ;;  %v54_v9 = vld [vmem:[%s786_s0 + $0x128] sm:$0xff] }
  0x2c   :  { %v257_v37 = vmul.f32 %v54_v9, %v54_v9 }
  0x2d   :  { %v127_v60 = vadd.f32 %v126_v50, %v125_v54  ;;  %v324_v21 = vadd.f32 %v323_v12, %v322_v15  ;;  %v337_v54 = vsel %vm82_vm1, %v247_v41, 0.0  ;;  %v156_v12 = vsel %vm82_vm1, %v54_v9, 0.0  ;;  %v55_v15 = vld [vmem:[%s786_s0 + $0x130] sm:$0xff] }
  0x2e   :  { %v258_v43 = vmul.f32 %v55_v15, %v55_v15 }
  0x2f   :  { %v129_v2 = vadd.f32 %v128_v56, %v127_v60  ;;  %v326_v27 = vadd.f32 %v325_v18, %v324_v21  ;;  %v339_v60 = vsel %vm82_vm1, %v248_v47, 0.0  ;;  %v158_v18 = vsel %vm82_vm1, %v55_v15, 0.0  ;;  %v56_v21 = vld [vmem:[%s786_s0 + $0x138] sm:$0xff] }
  0x30   :  { %v259_v49 = vmul.f32 %v56_v21, %v56_v21 }
  0x31   :  { %v131_v8 = vadd.f32 %v130_v62, %v129_v2  ;;  %v328_v33 = vadd.f32 %v327_v24, %v326_v27  ;;  %v341_v2 = vsel %vm82_vm1, %v249_v53, 0.0  ;;  %v160_v24 = vsel %vm82_vm1, %v56_v21, 0.0  ;;  %v57_v27 = vld [vmem:[%s786_s0 + $0x140] sm:$0xff] }
  0x32   :  { %v260_v55 = vmul.f32 %v57_v27, %v57_v27 }
  0x33   :  { %v133_v14 = vadd.f32 %v132_v4, %v131_v8  ;;  %v330_v39 = vadd.f32 %v329_v30, %v328_v33  ;;  %v343_v8 = vsel %vm82_vm1, %v250_v59, 0.0  ;;  %v162_v30 = vsel %vm82_vm1, %v57_v27, 0.0  ;;  %v58_v33 = vld [vmem:[%s786_s0 + $0x148] sm:$0xff] }
  0x34   :  { %v261_v61 = vmul.f32 %v58_v33, %v58_v33 }
  0x35   :  { %v135_v20 = vadd.f32 %v134_v10, %v133_v14  ;;  %v332_v45 = vadd.f32 %v331_v36, %v330_v39  ;;  %v345_v14 = vsel %vm82_vm1, %v251_v1, 0.0  ;;  %v164_v36 = vsel %vm82_vm1, %v58_v33, 0.0  ;;  %v59_v39 = vld [vmem:[%s786_s0 + $0x150] sm:$0xff] }
  0x36   :  { %v262_v3 = vmul.f32 %v59_v39, %v59_v39 }
  0x37   :  { %v137_v26 = vadd.f32 %v136_v16, %v135_v20  ;;  %v334_v51 = vadd.f32 %v333_v42, %v332_v45  ;;  %v347_v20 = vsel %vm82_vm1, %v252_v7, 0.0  ;;  %v166_v42 = vsel %vm82_vm1, %v59_v39, 0.0  ;;  %v60_v45 = vld [vmem:[%s786_s0 + $0x158] sm:$0xff] }
  0x38   :  { %v263_v9 = vmul.f32 %v60_v45, %v60_v45 }
  0x39   :  { %v139_v32 = vadd.f32 %v138_v22, %v137_v26  ;;  %v336_v57 = vadd.f32 %v335_v48, %v334_v51  ;;  %v349_v26 = vsel %vm82_vm1, %v253_v13, 0.0  ;;  %v168_v48 = vsel %vm82_vm1, %v60_v45, 0.0  ;;  %v61_v51 = vld [vmem:[%s786_s0 + $0x160] sm:$0xff] }
  0x3a   :  { %v264_v15 = vmul.f32 %v61_v51, %v61_v51 }
  0x3b   :  { %v141_v38 = vadd.f32 %v140_v28, %v139_v32  ;;  %v338_v63 = vadd.f32 %v337_v54, %v336_v57  ;;  %v351_v32 = vsel %vm82_vm1, %v254_v19, 0.0  ;;  %v170_v54 = vsel %vm82_vm1, %v61_v51, 0.0  ;;  %v62_v57 = vld [vmem:[%s786_s0 + $0x168] sm:$0xff] }
  0x3c   :  { %v265_v21 = vmul.f32 %v62_v57, %v62_v57 }
  0x3d   :  { %v143_v44 = vadd.f32 %v142_v34, %v141_v38  ;;  %v340_v5 = vadd.f32 %v339_v60, %v338_v63  ;;  %v353_v38 = vsel %vm82_vm1, %v255_v25, 0.0  ;;  %v172_v60 = vsel %vm82_vm1, %v62_v57, 0.0  ;;  %v63_v63 = vld [vmem:[%s786_s0 + $0x170] sm:$0xff] }
  0x3e   :  { %v266_v27 = vmul.f32 %v63_v63, %v63_v63 }
  0x3f   :  { %v145_v50 = vadd.f32 %v144_v40, %v143_v44  ;;  %v342_v11 = vadd.f32 %v341_v2, %v340_v5  ;;  %v355_v44 = vsel %vm82_vm1, %v256_v31, 0.0  ;;  %v174_v2 = vsel %vm82_vm1, %v63_v63, 0.0  ;;  %v64_v5 = vld [vmem:[%s786_s0 + $0x178] sm:$0xff] }
  0x40   :  { %v267_v33 = vmul.f32 %v64_v5, %v64_v5 }
  0x41   :  { %v147_v56 = vadd.f32 %v146_v46, %v145_v50  ;;  %v344_v17 = vadd.f32 %v343_v8, %v342_v11  ;;  %v357_v50 = vsel %vm82_vm1, %v257_v37, 0.0  ;;  %v176_v8 = vsel %vm82_vm1, %v64_v5, 0.0  ;;  %v65_v11 = vld [vmem:[%s786_s0 + $0x180] sm:$0xff] }
  0x42   :  { %v268_v39 = vmul.f32 %v65_v11, %v65_v11 }
  0x43   :  { %v149_v62 = vadd.f32 %v148_v52, %v147_v56  ;;  %v346_v23 = vadd.f32 %v345_v14, %v344_v17  ;;  %v359_v56 = vsel %vm82_vm1, %v258_v43, 0.0  ;;  %v178_v14 = vsel %vm82_vm1, %v65_v11, 0.0  ;;  %v66_v17 = vld [vmem:[%s786_s0 + $0x188] sm:$0xff] }
  0x44   :  { %v269_v45 = vmul.f32 %v66_v17, %v66_v17 }
  0x45   :  { %v151_v4 = vadd.f32 %v150_v58, %v149_v62  ;;  %v348_v29 = vadd.f32 %v347_v20, %v346_v23  ;;  %v361_v62 = vsel %vm82_vm1, %v259_v49, 0.0  ;;  %v180_v20 = vsel %vm82_vm1, %v66_v17, 0.0  ;;  %v67_v23 = vld [vmem:[%s786_s0 + $0x190] sm:$0xff] }
  0x46   :  { %v270_v51 = vmul.f32 %v67_v23, %v67_v23 }
  0x47   :  { %v153_v10 = vadd.f32 %v152_v0, %v151_v4  ;;  %v350_v35 = vadd.f32 %v349_v26, %v348_v29  ;;  %v363_v4 = vsel %vm82_vm1, %v260_v55, 0.0  ;;  %v182_v26 = vsel %vm82_vm1, %v67_v23, 0.0  ;;  %v68_v29 = vld [vmem:[%s786_s0 + $0x198] sm:$0xff] }
  0x48   :  { %v271_v57 = vmul.f32 %v68_v29, %v68_v29 }
  0x49   :  { %v155_v16 = vadd.f32 %v154_v6, %v153_v10  ;;  %v352_v41 = vadd.f32 %v351_v32, %v350_v35  ;;  %v365_v10 = vsel %vm82_vm1, %v261_v61, 0.0  ;;  %v184_v32 = vsel %vm82_vm1, %v68_v29, 0.0  ;;  %v69_v35 = vld [vmem:[%s786_s0 + $0x1a0] sm:$0xff] }
  0x4a   :  { %v272_v63 = vmul.f32 %v69_v35, %v69_v35 }
  0x4b   :  { %v157_v22 = vadd.f32 %v156_v12, %v155_v16  ;;  %v354_v47 = vadd.f32 %v353_v38, %v352_v41  ;;  %v367_v16 = vsel %vm82_vm1, %v262_v3, 0.0  ;;  %v186_v38 = vsel %vm82_vm1, %v69_v35, 0.0  ;;  %v70_v41 = vld [vmem:[%s786_s0 + $0x1a8] sm:$0xff] }
  0x4c   :  { %v273_v5 = vmul.f32 %v70_v41, %v70_v41 }
  0x4d   :  { %v159_v28 = vadd.f32 %v158_v18, %v157_v22  ;;  %v356_v53 = vadd.f32 %v355_v44, %v354_v47  ;;  %v369_v22 = vsel %vm82_vm1, %v263_v9, 0.0  ;;  %v188_v44 = vsel %vm82_vm1, %v70_v41, 0.0  ;;  %v71_v47 = vld [vmem:[%s786_s0 + $0x1b0] sm:$0xff] }
  0x4e   :  { %v274_v11 = vmul.f32 %v71_v47, %v71_v47 }
  0x4f   :  { %v161_v34 = vadd.f32 %v160_v24, %v159_v28  ;;  %v358_v59 = vadd.f32 %v357_v50, %v356_v53  ;;  %v371_v28 = vsel %vm82_vm1, %v264_v15, 0.0  ;;  %v190_v50 = vsel %vm82_vm1, %v71_v47, 0.0  ;;  %v72_v53 = vld [vmem:[%s786_s0 + $0x1b8] sm:$0xff] }
  0x50   :  { %v275_v17 = vmul.f32 %v72_v53, %v72_v53 }
  0x51   :  { %v163_v40 = vadd.f32 %v162_v30, %v161_v34  ;;  %v360_v1 = vadd.f32 %v359_v56, %v358_v59  ;;  %v373_v34 = vsel %vm82_vm1, %v265_v21, 0.0  ;;  %v192_v56 = vsel %vm82_vm1, %v72_v53, 0.0  ;;  %v73_v59 = vld [vmem:[%s786_s0 + $0x1c0] sm:$0xff] }
  0x52   :  { %v276_v23 = vmul.f32 %v73_v59, %v73_v59 }
  0x53   :  { %v165_v46 = vadd.f32 %v164_v36, %v163_v40  ;;  %v362_v7 = vadd.f32 %v361_v62, %v360_v1  ;;  %v375_v40 = vsel %vm82_vm1, %v266_v27, 0.0  ;;  %v194_v62 = vsel %vm82_vm1, %v73_v59, 0.0  ;;  %v74_v1 = vld [vmem:[%s786_s0 + $0x1c8] sm:$0xff] }
  0x54   :  { %v277_v29 = vmul.f32 %v74_v1, %v74_v1 }
  0x55   :  { %v167_v52 = vadd.f32 %v166_v42, %v165_v46  ;;  %v364_v13 = vadd.f32 %v363_v4, %v362_v7  ;;  %v377_v46 = vsel %vm82_vm1, %v267_v33, 0.0  ;;  %v196_v4 = vsel %vm82_vm1, %v74_v1, 0.0  ;;  %v75_v7 = vld [vmem:[%s786_s0 + $0x1d0] sm:$0xff] }
  0x56   :  { %v278_v35 = vmul.f32 %v75_v7, %v75_v7 }
  0x57   :  { %v169_v58 = vadd.f32 %v168_v48, %v167_v52  ;;  %v366_v19 = vadd.f32 %v365_v10, %v364_v13  ;;  %v379_v52 = vsel %vm82_vm1, %v268_v39, 0.0  ;;  %v198_v10 = vsel %vm82_vm1, %v75_v7, 0.0  ;;  %v76_v13 = vld [vmem:[%s786_s0 + $0x1d8] sm:$0xff] }
  0x58   :  { %v279_v41 = vmul.f32 %v76_v13, %v76_v13 }
  0x59   :  { %v171_v0 = vadd.f32 %v170_v54, %v169_v58  ;;  %v368_v25 = vadd.f32 %v367_v16, %v366_v19  ;;  %v381_v58 = vsel %vm82_vm1, %v269_v45, 0.0  ;;  %v200_v16 = vsel %vm82_vm1, %v76_v13, 0.0  ;;  %v77_v19 = vld [vmem:[%s786_s0 + $0x1e0] sm:$0xff] }
  0x5a   :  { %v280_v45 = vmul.f32 %v77_v19, %v77_v19 }
  0x5b   :  { %v173_v6 = vadd.f32 %v172_v60, %v171_v0  ;;  %v370_v31 = vadd.f32 %v369_v22, %v368_v25  ;;  %v383_v0 = vsel %vm82_vm1, %v270_v51, 0.0  ;;  %v202_v22 = vsel %vm82_vm1, %v77_v19, 0.0  ;;  %v78_v25 = vld [vmem:[%s786_s0 + $0x1e8] sm:$0xff] }
  0x5d   :  { %v175_v12 = vadd.f32 %v174_v2, %v173_v6  ;;  %v372_v37 = vadd.f32 %v371_v28, %v370_v31  ;;  %v385_v6 = vsel %vm82_vm1, %v271_v57, 0.0  ;;  %v204_v28 = vsel %vm82_vm1, %v78_v25, 0.0  ;;  %v79_v31 = vld [vmem:[%s786_s0 + $0x1f0] sm:$0xff] }
  0x5e   :  { %v282_v53 = vmul.f32 %v79_v31, %v79_v31 }
  0x5f   :  { %v177_v18 = vadd.f32 %v176_v8, %v175_v12  ;;  %v374_v43 = vadd.f32 %v373_v34, %v372_v37  ;;  %v387_v12 = vsel %vm82_vm1, %v272_v63, 0.0  ;;  %v206_v34 = vsel %vm82_vm1, %v79_v31, 0.0  ;;  %v80_v37 = vld [vmem:[%s786_s0 + $0x1f8] sm:$0xff] }
  0x60   :  { %v283_v57 = vmul.f32 %v80_v37, %v80_v37 }
  0x61   :  { %v179_v24 = vadd.f32 %v178_v14, %v177_v18  ;;  %v376_v49 = vadd.f32 %v375_v40, %v374_v43  ;;  %v389_v18 = vsel %vm82_vm1, %v273_v5, 0.0  ;;  %v208_v40 = vsel %vm82_vm1, %v80_v37, 0.0 }
  0x63   :  { %v181_v30 = vadd.f32 %v180_v20, %v179_v24  ;;  %v378_v55 = vadd.f32 %v377_v46, %v376_v49  ;;  %v391_v24 = vsel %vm82_vm1, %v274_v11, 0.0  ;;  %v399_v46 = vsel %vm82_vm1, %v278_v35, 0.0 }
  0x64   :  { %v281_v49 = vmul.f32 %v78_v25, %v78_v25 }
  0x65   :  { %v183_v36 = vadd.f32 %v182_v26, %v181_v30  ;;  %v380_v61 = vadd.f32 %v379_v52, %v378_v55  ;;  %v393_v30 = vsel %vm82_vm1, %v275_v17, 0.0 }
  0x67   :  { %v185_v42 = vadd.f32 %v184_v32, %v183_v36  ;;  %v382_v3 = vadd.f32 %v381_v58, %v380_v61  ;;  %v395_v36 = vsel %vm82_vm1, %v276_v23, 0.0  ;;  %v405_v58 = vsel %vm82_vm1, %v281_v49, 0.0 }
  0x68   :  { %v407_v61 = vsel %vm82_vm1, %v282_v53, 0.0 }
  0x69   :  { %v187_v48 = vadd.f32 %v186_v38, %v185_v42  ;;  %v384_v9 = vadd.f32 %v383_v0, %v382_v3  ;;  %v397_v42 = vsel %vm82_vm1, %v277_v29, 0.0  ;;  %v409_v0 = vsel %vm82_vm1, %v283_v57, 0.0  ;;  %v81_v3 = vld [vmem:[%s787_s1] sm:$0x1] }
  0x6b   :  { %v189_v54 = vadd.f32 %v188_v44, %v187_v48  ;;  %v386_v15 = vadd.f32 %v385_v6, %v384_v9 }
  0x6d   :  { %v191_v60 = vadd.f32 %v190_v50, %v189_v54  ;;  %v388_v21 = vadd.f32 %v387_v12, %v386_v15  ;;  %v401_v50 = vsel %vm82_vm1, %v279_v41, 0.0  ;;  %v403_v54 = vsel %vm82_vm1, %v280_v45, 0.0  ;;  %v219_v12 = vld [vmem:[%s788_s2] sm:$0x1] }
  0x6f   :  { %v193_v2 = vadd.f32 %v192_v56, %v191_v60  ;;  %v390_v27 = vadd.f32 %v389_v18, %v388_v21 }
  0x71   :  { %v195_v8 = vadd.f32 %v194_v62, %v193_v2  ;;  %v392_v33 = vadd.f32 %v391_v24, %v390_v27 }
  0x73   :  { %v197_v14 = vadd.f32 %v196_v4, %v195_v8  ;;  %v394_v39 = vadd.f32 %v393_v30, %v392_v33 }
  0x75   :  { %v199_v20 = vadd.f32 %v198_v10, %v197_v14  ;;  %v396_v44 = vadd.f32 %v395_v36, %v394_v39 }
  0x77   :  { %v201_v26 = vadd.f32 %v200_v16, %v199_v20  ;;  %v398_v48 = vadd.f32 %v397_v42, %v396_v44 }
  0x79   :  { %v203_v32 = vadd.f32 %v202_v22, %v201_v26  ;;  %v400_v52 = vadd.f32 %v399_v46, %v398_v48 }
  0x7b   :  { %v205_v38 = vadd.f32 %v204_v28, %v203_v32  ;;  %v402_v56 = vadd.f32 %v401_v50, %v400_v52 }
  0x7d   :  { %v207_v43 = vadd.f32 %v206_v34, %v205_v38  ;;  %v404_v60 = vadd.f32 %v403_v54, %v402_v56 }
  0x7f   :  { %v209_v47 = vadd.f32 %v208_v40, %v207_v43  ;;  %v406_v63 = vadd.f32 %v405_v58, %v404_v60 }
  0x81   :  { %v210_v51 = vrot.slane %v209_v47, 4  ;;  %v408_v2 = vadd.f32 %v407_v61, %v406_v63 }
  0x83   :  { %v211_v55 = vadd.f32 %v210_v51, %v209_v47  ;;  %v410_v5 = vadd.f32 %v409_v0, %v408_v2 }
  0x85   :  { %v212_v59 = vrot.slane %v211_v55, 2  ;;  %v411_v7 = vrot.slane %v410_v5, 4 }
  0x87   :  { %v213_v62 = vadd.f32 %v212_v59, %v211_v55  ;;  %v412_v8 = vadd.f32 %v411_v7, %v410_v5 }
  0x89   :  { %v214_v1 = vrot.slane %v213_v62, 1  ;;  %v413_v9 = vrot.slane %v412_v8, 2 }
  0x8b   :  { %v215_v4 = vadd.f32 %v214_v1, %v213_v62  ;;  %v414_v10 = vadd.f32 %v413_v9, %v412_v8 }
  0x8d   :  { %v216_v6 = vadd.f32 %v215_v4, %v81_v3  ;;  %v415_v11 = vrot.slane %v414_v10, 1 }
  0x8f   :  { %218 = vst.msk [vmem:[%s787_s1] sm:$0x1] %vm14_vm0, %v216_v6  ;;  %v416_v13 = vadd.f32 %v415_v11, %v414_v10 }
  0x91   :  { %v417_v14 = vadd.f32 %v416_v13, %v219_v12 }
  0x93   :  { %418 = vst.msk [vmem:[%s788_s2] sm:$0x1] %vm14_vm0, %v417_v14 }

// kernel: generator_forward.39
= control target key start
LH: loop header
LB: loop body
LE: loop exit
PB: predicated region body
PF: predicated region fallthrough
CT: control target
= control target key end

     0   :  { %vm214_vm0 = vcmask 64512   ;;  %s894_s0 = inlined_call_operand.vmem [shape: f32[512,8], index: 0, kind: input, shape index: {}]   ;;  %s895_s1 = inlined_call_operand.vmem [shape: f32[1,8], index: 1, kind: input, shape index: {}]   ;;  %s896_s2 = inlined_call_operand.vmem [shape: f32[1,8], index: 2, kind: input, shape index: {}]   ;;  %s897_s3 = inlined_call_operand.vmem [shape: f32[512,8], index: 3, kind: output, shape index: {}]  }
   0x1   :  { %v14_v0 = vld [vmem:[%s894_s0] sm:$0xff]  ;;  %v15_v3 = vld [vmem:[%s894_s0 + $0x8] sm:$0xff]  ;;  %v16_v6 = vld [vmem:[%s894_s0 + $0x10] sm:$0xff] }
   0x2   :  { %v311_v1 = vld [vmem:[%s895_s1] ss:$0 sm:$0xff]  ;;  %v17_v7 = vld [vmem:[%s894_s0 + $0x18] sm:$0xff]  ;;  %v19_v12 = vld [vmem:[%s894_s0 + $0x28] sm:$0xff] }
   0x3   :  { %v316_v2 = vld [vmem:[%s896_s2] ss:$0 sm:$0xff]  ;;  %v82_v4 = vmul.f32 %v311_v1, %v14_v0  ;;  %v83_v5 = vmul.f32 %v311_v1, %v15_v3  ;;  %v84_v9 = vmul.f32 %v311_v1, %v16_v6  ;;  %v85_v10 = vmul.f32 %v311_v1, %v17_v7  ;;  %v20_v13 = vld [vmem:[%s894_s0 + $0x30] sm:$0xff]  ;;  %v21_v14 = vld [vmem:[%s894_s0 + $0x38] sm:$0xff] }
   0x4   :  { %v18_v8 = vld [vmem:[%s894_s0 + $0x20] sm:$0xff]  ;;  %v87_v17 = vmul.f32 %v311_v1, %v19_v12  ;;  %v88_v18 = vmul.f32 %v311_v1, %v20_v13  ;;  %v23_v20 = vld [vmem:[%s894_s0 + $0x48] sm:$0xff]  ;;  %v89_v23 = vmul.f32 %v311_v1, %v21_v14  ;;  %v24_v24 = vld [vmem:[%s894_s0 + $0x50] sm:$0xff] }
   0x5   :  { %v86_v11 = vmul.f32 %v311_v1, %v18_v8  ;;  %v150_v15 = vadd.f32 %v316_v2, %v82_v4  ;;  %v151_v16 = vadd.f32 %v316_v2, %v83_v5  ;;  %v22_v19 = vld [vmem:[%s894_s0 + $0x40] sm:$0xff]  ;;  %v152_v21 = vadd.f32 %v316_v2, %v84_v9  ;;  %v25_v27 = vld [vmem:[%s894_s0 + $0x58] sm:$0xff]  ;;  %v27_v33 = vld [vmem:[%s894_s0 + $0x68] sm:$0xff] }
   0x6   :  { %v153_v22 = vadd.f32 %v316_v2, %v85_v10  ;;  %v90_v26 = vmul.f32 %v311_v1, %v22_v19  ;;  %v155_v28 = vadd.f32 %v316_v2, %v87_v17  ;;  %v91_v29 = vmul.f32 %v311_v1, %v23_v20  ;;  %v26_v30 = vld [vmem:[%s894_s0 + $0x60] sm:$0xff]  ;;  %v28_v36 = vld [vmem:[%s894_s0 + $0x70] sm:$0xff]  ;;  %v29_v39 = vld [vmem:[%s894_s0 + $0x78] sm:$0xff] }
   0x7   :  { %215 = vst.msk [vmem:[%s897_s3] sm:$0xff] %vm214_vm0, %v150_v15  ;;  %v154_v25 = vadd.f32 %v316_v2, %v86_v11  ;;  %v156_v31 = vadd.f32 %v316_v2, %v88_v18  ;;  %v92_v32 = vmul.f32 %v311_v1, %v24_v24  ;;  %v157_v34 = vadd.f32 %v316_v2, %v89_v23  ;;  %v30_v42 = vld [vmem:[%s894_s0 + $0x80] sm:$0xff]  ;;  %v31_v45 = vld [vmem:[%s894_s0 + $0x88] sm:$0xff]  ;;  %v32_v48 = vld [vmem:[%s894_s0 + $0x90] sm:$0xff] }
   0x8   :  { %216 = vst.msk [vmem:[%s897_s3 + $0x8] sm:$0xff] %vm214_vm0, %v151_v16  ;;  %v93_v35 = vmul.f32 %v311_v1, %v25_v27  ;;  %v158_v37 = vadd.f32 %v316_v2, %v90_v26  ;;  %v94_v38 = vmul.f32 %v311_v1, %v26_v30  ;;  %v159_v40 = vadd.f32 %v316_v2, %v91_v29  ;;  %v33_v51 = vld [vmem:[%s894_s0 + $0x98] sm:$0xff]  ;;  %v34_v54 = vld [vmem:[%s894_s0 + $0xa0] sm:$0xff]  ;;  %v35_v57 = vld [vmem:[%s894_s0 + $0xa8] sm:$0xff] }
   0x9   :  { %217 = vst.msk [vmem:[%s897_s3 + $0x10] sm:$0xff] %vm214_vm0, %v152_v21  ;;  %v95_v41 = vmul.f32 %v311_v1, %v27_v33  ;;  %v160_v43 = vadd.f32 %v316_v2, %v92_v32  ;;  %v96_v44 = vmul.f32 %v311_v1, %v28_v36  ;;  %v97_v47 = vmul.f32 %v311_v1, %v29_v39  ;;  %v36_v60 = vld [vmem:[%s894_s0 + $0xb0] sm:$0xff]  ;;  %v37_v63 = vld [vmem:[%s894_s0 + $0xb8] sm:$0xff]  ;;  %v38_v4 = vld [vmem:[%s894_s0 + $0xc0] sm:$0xff] }
   0xa   :  { %218 = vst.msk [vmem:[%s897_s3 + $0x18] sm:$0xff] %vm214_vm0, %v153_v22  ;;  %v161_v46 = vadd.f32 %v316_v2, %v93_v35  ;;  %v162_v49 = vadd.f32 %v316_v2, %v94_v38  ;;  %v98_v50 = vmul.f32 %v311_v1, %v30_v42  ;;  %v99_v53 = vmul.f32 %v311_v1, %v31_v45  ;;  %v39_v7 = vld [vmem:[%s894_s0 + $0xc8] sm:$0xff]  ;;  %v40_v10 = vld [vmem:[%s894_s0 + $0xd0] sm:$0xff]  ;;  %v41_v13 = vld [vmem:[%s894_s0 + $0xd8] sm:$0xff] }
   0xb   :  { %219 = vst.msk [vmem:[%s897_s3 + $0x20] sm:$0xff] %vm214_vm0, %v154_v25  ;;  %v163_v52 = vadd.f32 %v316_v2, %v95_v41  ;;  %v164_v55 = vadd.f32 %v316_v2, %v96_v44  ;;  %v100_v56 = vmul.f32 %v311_v1, %v32_v48  ;;  %v165_v58 = vadd.f32 %v316_v2, %v97_v47  ;;  %v42_v16 = vld [vmem:[%s894_s0 + $0xe0] sm:$0xff]  ;;  %v43_v19 = vld [vmem:[%s894_s0 + $0xe8] sm:$0xff]  ;;  %v44_v22 = vld [vmem:[%s894_s0 + $0xf0] sm:$0xff] }
   0xc   :  { %220 = vst.msk [vmem:[%s897_s3 + $0x28] sm:$0xff] %vm214_vm0, %v155_v28  ;;  %v101_v59 = vmul.f32 %v311_v1, %v33_v51  ;;  %v166_v61 = vadd.f32 %v316_v2, %v98_v50  ;;  %v102_v62 = vmul.f32 %v311_v1, %v34_v54  ;;  %v167_v0 = vadd.f32 %v316_v2, %v99_v53  ;;  %v45_v25 = vld [vmem:[%s894_s0 + $0xf8] sm:$0xff]  ;;  %v46_v28 = vld [vmem:[%s894_s0 + $0x100] sm:$0xff]  ;;  %v51_v44 = vld [vmem:[%s894_s0 + $0x128] sm:$0xff] }
   0xd   :  { %221 = vst.msk [vmem:[%s897_s3 + $0x30] sm:$0xff] %vm214_vm0, %v156_v31  ;;  %v103_v3 = vmul.f32 %v311_v1, %v35_v57  ;;  %v168_v5 = vadd.f32 %v316_v2, %v100_v56  ;;  %v104_v6 = vmul.f32 %v311_v1, %v36_v60  ;;  %v105_v9 = vmul.f32 %v311_v1, %v37_v63  ;;  %v47_v31 = vld [vmem:[%s894_s0 + $0x108] sm:$0xff]  ;;  %v77_v41 = vld [vmem:[%s894_s0 + $0x1f8] sm:$0xff]  ;;  %v52_v47 = vld [vmem:[%s894_s0 + $0x130] sm:$0xff] }
   0xe   :  { %222 = vst.msk [vmem:[%s897_s3 + $0x38] sm:$0xff] %vm214_vm0, %v157_v34  ;;  %v169_v8 = vadd.f32 %v316_v2, %v101_v59  ;;  %v170_v11 = vadd.f32 %v316_v2, %v102_v62  ;;  %v106_v12 = vmul.f32 %v311_v1, %v38_v4  ;;  %v107_v15 = vmul.f32 %v311_v1, %v39_v7  ;;  %v48_v34 = vld [vmem:[%s894_s0 + $0x110] sm:$0xff]  ;;  %v53_v51 = vld [vmem:[%s894_s0 + $0x138] sm:$0xff]  ;;  %v54_v54 = vld [vmem:[%s894_s0 + $0x140] sm:$0xff] }
   0xf   :  { %223 = vst.msk [vmem:[%s897_s3 + $0x40] sm:$0xff] %vm214_vm0, %v158_v37  ;;  %v171_v14 = vadd.f32 %v316_v2, %v103_v3  ;;  %v172_v17 = vadd.f32 %v316_v2, %v104_v6  ;;  %v108_v18 = vmul.f32 %v311_v1, %v40_v10  ;;  %v173_v20 = vadd.f32 %v316_v2, %v105_v9  ;;  %v49_v37 = vld [vmem:[%s894_s0 + $0x118] sm:$0xff] }
  0x10   :  { %224 = vst.msk [vmem:[%s897_s3 + $0x48] sm:$0xff] %vm214_vm0, %v159_v40  ;;  %v109_v21 = vmul.f32 %v311_v1, %v41_v13  ;;  %v174_v23 = vadd.f32 %v316_v2, %v106_v12  ;;  %v110_v24 = vmul.f32 %v311_v1, %v42_v16  ;;  %v175_v26 = vadd.f32 %v316_v2, %v107_v15  ;;  %v50_v40 = vld [vmem:[%s894_s0 + $0x120] sm:$0xff] }
  0x11   :  { %225 = vst.msk [vmem:[%s897_s3 + $0x50] sm:$0xff] %vm214_vm0, %v160_v43  ;;  %v111_v27 = vmul.f32 %v311_v1, %v43_v19  ;;  %v176_v29 = vadd.f32 %v316_v2, %v108_v18  ;;  %v112_v30 = vmul.f32 %v311_v1, %v44_v22  ;;  %v113_v33 = vmul.f32 %v311_v1, %v45_v25 }
  0x12   :  { %226 = vst.msk [vmem:[%s897_s3 + $0x58] sm:$0xff] %vm214_vm0, %v161_v46  ;;  %v177_v32 = vadd.f32 %v316_v2, %v109_v21  ;;  %v178_v35 = vadd.f32 %v316_v2, %v110_v24  ;;  %v114_v36 = vmul.f32 %v311_v1, %v46_v28  ;;  %v115_v39 = vmul.f32 %v311_v1, %v47_v31 }
  0x13   :  { %227 = vst.msk [vmem:[%s897_s3 + $0x60] sm:$0xff] %vm214_vm0, %v162_v49  ;;  %v179_v38 = vadd.f32 %v316_v2, %v111_v27  ;;  %v180_v42 = vadd.f32 %v316_v2, %v112_v30  ;;  %v116_v43 = vmul.f32 %v311_v1, %v48_v34  ;;  %v181_v45 = vadd.f32 %v316_v2, %v113_v33 }
  0x14   :  { %228 = vst.msk [vmem:[%s897_s3 + $0x68] sm:$0xff] %vm214_vm0, %v163_v52  ;;  %v117_v46 = vmul.f32 %v311_v1, %v49_v37  ;;  %v145_v48 = vmul.f32 %v311_v1, %v77_v41  ;;  %v182_v49 = vadd.f32 %v316_v2, %v114_v36  ;;  %v118_v50 = vmul.f32 %v311_v1, %v50_v40  ;;  %v70_v41 = vld [vmem:[%s894_s0 + $0x1c0] sm:$0xff] }
  0x15   :  { %229 = vst.msk [vmem:[%s897_s3 + $0x70] sm:$0xff] %vm214_vm0, %v164_v55  ;;  %v183_v52 = vadd.f32 %v316_v2, %v115_v39  ;;  %v119_v53 = vmul.f32 %v311_v1, %v51_v44  ;;  %v184_v56 = vadd.f32 %v316_v2, %v116_v43  ;;  %v120_v57 = vmul.f32 %v311_v1, %v52_v47  ;;  %v71_v44 = vld [vmem:[%s894_s0 + $0x1c8] sm:$0xff]  ;;  %v72_v47 = vld [vmem:[%s894_s0 + $0x1d0] sm:$0xff] }
  0x16   :  { %230 = vst.msk [vmem:[%s897_s3 + $0x78] sm:$0xff] %vm214_vm0, %v165_v58  ;;  %v635_v55 = vadd.f32 %v316_v2, %v145_v48  ;;  %v55_v58 = vld [vmem:[%s894_s0 + $0x148] sm:$0xff]  ;;  %v185_v59 = vadd.f32 %v316_v2, %v117_v46  ;;  %v121_v60 = vmul.f32 %v311_v1, %v53_v51  ;;  %v186_v62 = vadd.f32 %v316_v2, %v118_v50  ;;  %v73_v50 = vld [vmem:[%s894_s0 + $0x1d8] sm:$0xff] }
  0x17   :  { %231 = vst.msk [vmem:[%s897_s3 + $0x80] sm:$0xff] %vm214_vm0, %v166_v61  ;;  %v56_v61 = vld [vmem:[%s894_s0 + $0x150] sm:$0xff]  ;;  %v122_v63 = vmul.f32 %v311_v1, %v54_v54  ;;  %v187_v3 = vadd.f32 %v316_v2, %v119_v53  ;;  %v123_v4 = vmul.f32 %v311_v1, %v55_v58  ;;  %v188_v6 = vadd.f32 %v316_v2, %v120_v57  ;;  %v74_v53 = vld [vmem:[%s894_s0 + $0x1e0] sm:$0xff]  ;;  %v75_v57 = vld [vmem:[%s894_s0 + $0x1e8] sm:$0xff] }
  0x18   :  { %232 = vst.msk [vmem:[%s897_s3 + $0x88] sm:$0xff] %vm214_vm0, %v167_v0  ;;  %v57_v0 = vld [vmem:[%s894_s0 + $0x158] sm:$0xff]  ;;  %v124_v7 = vmul.f32 %v311_v1, %v56_v61  ;;  %v189_v9 = vadd.f32 %v316_v2, %v121_v60  ;;  %v76_v60 = vld [vmem:[%s894_s0 + $0x1f0] sm:$0xff] }
  0x19   :  { %233 = vst.msk [vmem:[%s897_s3 + $0x90] sm:$0xff] %vm214_vm0, %v168_v5  ;;  %v58_v5 = vld [vmem:[%s894_s0 + $0x160] sm:$0xff]  ;;  %v125_v10 = vmul.f32 %v311_v1, %v57_v0  ;;  %v190_v12 = vadd.f32 %v316_v2, %v122_v63  ;;  %v191_v15 = vadd.f32 %v316_v2, %v123_v4  ;;  %v143_v0 = vmul.f32 %v311_v1, %v75_v57 }
  0x1a   :  { %234 = vst.msk [vmem:[%s897_s3 + $0x98] sm:$0xff] %vm214_vm0, %v169_v8  ;;  %v59_v8 = vld [vmem:[%s894_s0 + $0x168] sm:$0xff]  ;;  %v126_v13 = vmul.f32 %v311_v1, %v58_v5  ;;  %v192_v18 = vadd.f32 %v316_v2, %v124_v7  ;;  %v144_v4 = vmul.f32 %v311_v1, %v76_v60 }
  0x1b   :  { %235 = vst.msk [vmem:[%s897_s3 + $0xa0] sm:$0xff] %vm214_vm0, %v170_v11  ;;  %v60_v11 = vld [vmem:[%s894_s0 + $0x170] sm:$0xff]  ;;  %v127_v16 = vmul.f32 %v311_v1, %v59_v8  ;;  %v193_v21 = vadd.f32 %v316_v2, %v125_v10 }
  0x1c   :  { %236 = vst.msk [vmem:[%s897_s3 + $0xa8] sm:$0xff] %vm214_vm0, %v171_v14  ;;  %v61_v14 = vld [vmem:[%s894_s0 + $0x178] sm:$0xff]  ;;  %v128_v19 = vmul.f32 %v311_v1, %v60_v11  ;;  %v194_v24 = vadd.f32 %v316_v2, %v126_v13  ;;  %v212_v7 = vadd.f32 %v316_v2, %v144_v4 }
  0x1d   :  { %237 = vst.msk [vmem:[%s897_s3 + $0xb0] sm:$0xff] %vm214_vm0, %v172_v17  ;;  %v62_v17 = vld [vmem:[%s894_s0 + $0x180] sm:$0xff]  ;;  %v129_v22 = vmul.f32 %v311_v1, %v61_v14  ;;  %v195_v27 = vadd.f32 %v316_v2, %v127_v16 }
  0x1e   :  { %238 = vst.msk [vmem:[%s897_s3 + $0xb8] sm:$0xff] %vm214_vm0, %v173_v20  ;;  %v63_v20 = vld [vmem:[%s894_s0 + $0x188] sm:$0xff]  ;;  %v130_v25 = vmul.f32 %v311_v1, %v62_v17  ;;  %v196_v30 = vadd.f32 %v316_v2, %v128_v19 }
  0x1f   :  { %239 = vst.msk [vmem:[%s897_s3 + $0xc0] sm:$0xff] %vm214_vm0, %v174_v23  ;;  %v64_v23 = vld [vmem:[%s894_s0 + $0x190] sm:$0xff]  ;;  %v131_v28 = vmul.f32 %v311_v1, %v63_v20  ;;  %v197_v33 = vadd.f32 %v316_v2, %v129_v22 }
  0x20   :  { %240 = vst.msk [vmem:[%s897_s3 + $0xc8] sm:$0xff] %vm214_vm0, %v175_v26  ;;  %v65_v26 = vld [vmem:[%s894_s0 + $0x198] sm:$0xff]  ;;  %v132_v31 = vmul.f32 %v311_v1, %v64_v23  ;;  %v198_v36 = vadd.f32 %v316_v2, %v130_v25 }
  0x21   :  { %241 = vst.msk [vmem:[%s897_s3 + $0xd0] sm:$0xff] %vm214_vm0, %v176_v29  ;;  %v66_v29 = vld [vmem:[%s894_s0 + $0x1a0] sm:$0xff]  ;;  %v133_v34 = vmul.f32 %v311_v1, %v65_v26  ;;  %v199_v39 = vadd.f32 %v316_v2, %v131_v28 }
  0x22   :  { %242 = vst.msk [vmem:[%s897_s3 + $0xd8] sm:$0xff] %vm214_vm0, %v177_v32  ;;  %v67_v32 = vld [vmem:[%s894_s0 + $0x1a8] sm:$0xff]  ;;  %v134_v37 = vmul.f32 %v311_v1, %v66_v29 }
  0x23   :  { %243 = vst.msk [vmem:[%s897_s3 + $0xe0] sm:$0xff] %vm214_vm0, %v178_v35  ;;  %v68_v35 = vld [vmem:[%s894_s0 + $0x1b0] sm:$0xff]  ;;  %v135_v40 = vmul.f32 %v311_v1, %v67_v32 }
  0x24   :  { %244 = vst.msk [vmem:[%s897_s3 + $0xe8] sm:$0xff] %vm214_vm0, %v179_v38  ;;  %v69_v38 = vld [vmem:[%s894_s0 + $0x1b8] sm:$0xff]  ;;  %v136_v43 = vmul.f32 %v311_v1, %v68_v35  ;;  %v202_v48 = vadd.f32 %v316_v2, %v134_v37 }
  0x25   :  { %245 = vst.msk [vmem:[%s897_s3 + $0xf0] sm:$0xff] %vm214_vm0, %v180_v42  ;;  %v200_v42 = vadd.f32 %v316_v2, %v132_v31  ;;  %v137_v46 = vmul.f32 %v311_v1, %v69_v38  ;;  %v203_v51 = vadd.f32 %v316_v2, %v135_v40 }
  0x26   :  { %246 = vst.msk [vmem:[%s897_s3 + $0xf8] sm:$0xff] %vm214_vm0, %v181_v45  ;;  %v201_v45 = vadd.f32 %v316_v2, %v133_v34  ;;  %v204_v54 = vadd.f32 %v316_v2, %v136_v43 }
  0x27   :  { %247 = vst.msk [vmem:[%s897_s3 + $0x100] sm:$0xff] %vm214_vm0, %v182_v49  ;;  %v138_v49 = vmul.f32 %v311_v1, %v70_v41  ;;  %v205_v58 = vadd.f32 %v316_v2, %v137_v46 }
  0x28   :  { %248 = vst.msk [vmem:[%s897_s3 + $0x108] sm:$0xff] %vm214_vm0, %v183_v52  ;;  %v139_v52 = vmul.f32 %v311_v1, %v71_v44 }
  0x29   :  { %249 = vst.msk [vmem:[%s897_s3 + $0x110] sm:$0xff] %vm214_vm0, %v184_v56  ;;  %v140_v56 = vmul.f32 %v311_v1, %v72_v47  ;;  %v206_v61 = vadd.f32 %v316_v2, %v138_v49 }
  0x2a   :  { %250 = vst.msk [vmem:[%s897_s3 + $0x118] sm:$0xff] %vm214_vm0, %v185_v59  ;;  %v141_v59 = vmul.f32 %v311_v1, %v73_v50  ;;  %v207_v63 = vadd.f32 %v316_v2, %v139_v52 }
  0x2b   :  { %251 = vst.msk [vmem:[%s897_s3 + $0x120] sm:$0xff] %vm214_vm0, %v186_v62  ;;  %v142_v62 = vmul.f32 %v311_v1, %v74_v53  ;;  %v211_v1 = vadd.f32 %v316_v2, %v143_v0 }
  0x2c   :  { %252 = vst.msk [vmem:[%s897_s3 + $0x128] sm:$0xff] %vm214_vm0, %v187_v3  ;;  %v208_v3 = vadd.f32 %v316_v2, %v140_v56  ;;  %v209_v5 = vadd.f32 %v316_v2, %v141_v59 }
  0x2d   :  { %253 = vst.msk [vmem:[%s897_s3 + $0x130] sm:$0xff] %vm214_vm0, %v188_v6  ;;  %v210_v6 = vadd.f32 %v316_v2, %v142_v62 }
  0x2e   :  { %254 = vst.msk [vmem:[%s897_s3 + $0x138] sm:$0xff] %vm214_vm0, %v189_v9 }
  0x2f   :  { %255 = vst.msk [vmem:[%s897_s3 + $0x140] sm:$0xff] %vm214_vm0, %v190_v12 }
  0x30   :  { %256 = vst.msk [vmem:[%s897_s3 + $0x148] sm:$0xff] %vm214_vm0, %v191_v15 }
  0x31   :  { %257 = vst.msk [vmem:[%s897_s3 + $0x150] sm:$0xff] %vm214_vm0, %v192_v18 }
  0x32   :  { %258 = vst.msk [vmem:[%s897_s3 + $0x158] sm:$0xff] %vm214_vm0, %v193_v21 }
  0x33   :  { %259 = vst.msk [vmem:[%s897_s3 + $0x160] sm:$0xff] %vm214_vm0, %v194_v24 }
  0x34   :  { %260 = vst.msk [vmem:[%s897_s3 + $0x168] sm:$0xff] %vm214_vm0, %v195_v27 }
  0x35   :  { %261 = vst.msk [vmem:[%s897_s3 + $0x170] sm:$0xff] %vm214_vm0, %v196_v30 }
  0x36   :  { %262 = vst.msk [vmem:[%s897_s3 + $0x178] sm:$0xff] %vm214_vm0, %v197_v33 }
  0x37   :  { %263 = vst.msk [vmem:[%s897_s3 + $0x180] sm:$0xff] %vm214_vm0, %v198_v36 }
  0x38   :  { %264 = vst.msk [vmem:[%s897_s3 + $0x188] sm:$0xff] %vm214_vm0, %v199_v39 }
  0x39   :  { %265 = vst.msk [vmem:[%s897_s3 + $0x190] sm:$0xff] %vm214_vm0, %v200_v42 }
  0x3a   :  { %266 = vst.msk [vmem:[%s897_s3 + $0x198] sm:$0xff] %vm214_vm0, %v201_v45 }
  0x3b   :  { %267 = vst.msk [vmem:[%s897_s3 + $0x1a0] sm:$0xff] %vm214_vm0, %v202_v48 }
  0x3c   :  { %268 = vst.msk [vmem:[%s897_s3 + $0x1a8] sm:$0xff] %vm214_vm0, %v203_v51 }
  0x3d   :  { %269 = vst.msk [vmem:[%s897_s3 + $0x1b0] sm:$0xff] %vm214_vm0, %v204_v54 }
  0x3e   :  { %270 = vst.msk [vmem:[%s897_s3 + $0x1b8] sm:$0xff] %vm214_vm0, %v205_v58 }
  0x3f   :  { %271 = vst.msk [vmem:[%s897_s3 + $0x1c0] sm:$0xff] %vm214_vm0, %v206_v61 }
  0x40   :  { %272 = vst.msk [vmem:[%s897_s3 + $0x1c8] sm:$0xff] %vm214_vm0, %v207_v63 }
  0x41   :  { %273 = vst.msk [vmem:[%s897_s3 + $0x1d0] sm:$0xff] %vm214_vm0, %v208_v3 }
  0x42   :  { %274 = vst.msk [vmem:[%s897_s3 + $0x1d8] sm:$0xff] %vm214_vm0, %v209_v5 }
  0x43   :  { %275 = vst.msk [vmem:[%s897_s3 + $0x1e0] sm:$0xff] %vm214_vm0, %v210_v6 }
  0x44   :  { %276 = vst.msk [vmem:[%s897_s3 + $0x1e8] sm:$0xff] %vm214_vm0, %v211_v1 }
  0x45   :  { %277 = vst.msk [vmem:[%s897_s3 + $0x1f0] sm:$0xff] %vm214_vm0, %v212_v7 }
  0x46   :  { %278 = vst.msk [vmem:[%s897_s3 + $0x1f8] sm:$0xff] %vm214_vm0, %v635_v55 }

// kernel: generator_forward.40
= control target key start
LH: loop header
LB: loop body
LE: loop exit
PB: predicated region body
PF: predicated region fallthrough
CT: control target
= control target key end

     0   :  { %s1592_s1 = inlined_call_operand.vmem [shape: bf16[128,128], index: 1, kind: input, shape index: {}]   ;;  %s1593_s2 = inlined_call_operand.vmem [shape: f32[1,128], index: 2, kind: input, shape index: {}]   ;;  %s1594_s0 = inlined_call_operand.vmem [shape: bf16[512,128], index: 0, kind: input, shape index: {}]   ;;  %s1595_s3 = inlined_call_operand.vmem [shape: f32[512,128], index: 3, kind: output, shape index: {}]  }
   0x1   :  { %v1165_v0 = vld [vmem:[%s1592_s1 + $0x38] sm:$0xff]  ;;  %v1164_v1 = vld [vmem:[%s1592_s1 + $0x30] sm:$0xff]  ;;  %v1163_v2 = vld [vmem:[%s1592_s1 + $0x28] sm:$0xff] }
   0x2   :  { %466 = vmatpush.bf16.msra.mxu0 %v1165_v0  ;;  %1166 = vmatpush.bf16.msra.mxu1 %v1165_v0  ;;  %v1162_v3 = vld [vmem:[%s1592_s1 + $0x20] sm:$0xff]  ;;  %v1161_v4 = vld [vmem:[%s1592_s1 + $0x18] sm:$0xff]  ;;  %v1160_v5 = vld [vmem:[%s1592_s1 + $0x10] sm:$0xff] }
   0x3   :  { %1167 = vmatpush.bf16.msra.mxu2 %v1165_v0  ;;  %1168 = vmatpush.bf16.msra.mxu3 %v1165_v0  ;;  %v1159_v6 = vld [vmem:[%s1592_s1 + $0x8] sm:$0xff]  ;;  %v1158_v7 = vld [vmem:[%s1592_s1] sm:$0xff]  ;;  %v1128_v16 = vld [vmem:[%s1594_s0 + $0x10] sm:$0xff] }
   0x4   :  { %v1126_v8 = vld [vmem:[%s1594_s0] sm:$0xff]  ;;  %v1127_v12 = vld [vmem:[%s1594_s0 + $0x8] sm:$0xff]  ;;  %v1136_v17 = vld [vmem:[%s1594_s0 + $0x50] sm:$0xff] }
   0x5   :  { %v1134_v9 = vld [vmem:[%s1594_s0 + $0x40] sm:$0xff]  ;;  %v1135_v13 = vld [vmem:[%s1594_s0 + $0x48] sm:$0xff]  ;;  %v1144_v18 = vld [vmem:[%s1594_s0 + $0x90] sm:$0xff] }
   0x6   :  { %467 = vmatpush.bf16.msra.mxu0 %v1164_v1  ;;  %1169 = vmatpush.bf16.msra.mxu1 %v1164_v1  ;;  %v1142_v10 = vld [vmem:[%s1594_s0 + $0x80] sm:$0xff]  ;;  %v1143_v14 = vld [vmem:[%s1594_s0 + $0x88] sm:$0xff]  ;;  %v1152_v19 = vld [vmem:[%s1594_s0 + $0xd0] sm:$0xff] }
   0x7   :  { %1170 = vmatpush.bf16.msra.mxu2 %v1164_v1  ;;  %1171 = vmatpush.bf16.msra.mxu3 %v1164_v1  ;;  %v1150_v11 = vld [vmem:[%s1594_s0 + $0xc0] sm:$0xff]  ;;  %v1151_v15 = vld [vmem:[%s1594_s0 + $0xc8] sm:$0xff]  ;;  %v1129_v20 = vld [vmem:[%s1594_s0 + $0x18] sm:$0xff] }
   0x8   :  { %v1137_v21 = vld [vmem:[%s1594_s0 + $0x58] sm:$0xff]  ;;  %v1130_v24 = vld [vmem:[%s1594_s0 + $0x20] sm:$0xff]  ;;  %v1131_v28 = vld [vmem:[%s1594_s0 + $0x28] sm:$0xff] }
   0x9   :  { %v1145_v22 = vld [vmem:[%s1594_s0 + $0x98] sm:$0xff]  ;;  %v1138_v25 = vld [vmem:[%s1594_s0 + $0x60] sm:$0xff]  ;;  %v1139_v29 = vld [vmem:[%s1594_s0 + $0x68] sm:$0xff] }
   0xa   :  { %468 = vmatpush.bf16.msra.mxu0 %v1163_v2  ;;  %1172 = vmatpush.bf16.msra.mxu1 %v1163_v2  ;;  %v1153_v23 = vld [vmem:[%s1594_s0 + $0xd8] sm:$0xff]  ;;  %v1146_v26 = vld [vmem:[%s1594_s0 + $0xa0] sm:$0xff]  ;;  %v1147_v30 = vld [vmem:[%s1594_s0 + $0xa8] sm:$0xff] }
   0xb   :  { %1173 = vmatpush.bf16.msra.mxu2 %v1163_v2  ;;  %1174 = vmatpush.bf16.msra.mxu3 %v1163_v2  ;;  %v1154_v27 = vld [vmem:[%s1594_s0 + $0xe0] sm:$0xff]  ;;  %v1155_v31 = vld [vmem:[%s1594_s0 + $0xe8] sm:$0xff]  ;;  %v1132_v32 = vld [vmem:[%s1594_s0 + $0x30] sm:$0xff] }
   0xc   :  { %v1140_v33 = vld [vmem:[%s1594_s0 + $0x70] sm:$0xff]  ;;  %v1133_v36 = vld [vmem:[%s1594_s0 + $0x38] sm:$0xff]  ;;  %v1334_v40 = vld [vmem:[%s1593_s2] ss:$0 sm:$0xff] }
   0xd   :  { %v1148_v34 = vld [vmem:[%s1594_s0 + $0xb0] sm:$0xff]  ;;  %v1141_v37 = vld [vmem:[%s1594_s0 + $0x78] sm:$0xff] }
   0xe   :  { %469 = vmatpush.bf16.msra.mxu0 %v1162_v3  ;;  %1175 = vmatpush.bf16.msra.mxu1 %v1162_v3  ;;  %v1156_v35 = vld [vmem:[%s1594_s0 + $0xf0] sm:$0xff]  ;;  %v1149_v38 = vld [vmem:[%s1594_s0 + $0xb8] sm:$0xff] }
   0xf   :  { %1176 = vmatpush.bf16.msra.mxu2 %v1162_v3  ;;  %1177 = vmatpush.bf16.msra.mxu3 %v1162_v3  ;;  %v1157_v39 = vld [vmem:[%s1594_s0 + $0xf8] sm:$0xff] }
  0x12   :  { %470 = vmatpush.bf16.msra.mxu0 %v1161_v4  ;;  %1178 = vmatpush.bf16.msra.mxu1 %v1161_v4 }
  0x13   :  { %1179 = vmatpush.bf16.msra.mxu2 %v1161_v4  ;;  %1180 = vmatpush.bf16.msra.mxu3 %v1161_v4 }
  0x16   :  { %471 = vmatpush.bf16.msra.mxu0 %v1160_v5  ;;  %1181 = vmatpush.bf16.msra.mxu1 %v1160_v5 }
  0x17   :  { %1182 = vmatpush.bf16.msra.mxu2 %v1160_v5  ;;  %1183 = vmatpush.bf16.msra.mxu3 %v1160_v5 }
  0x1a   :  { %472 = vmatpush.bf16.msra.mxu0 %v1159_v6  ;;  %1184 = vmatpush.bf16.msra.mxu1 %v1159_v6 }
  0x1b   :  { %1185 = vmatpush.bf16.msra.mxu2 %v1159_v6  ;;  %1186 = vmatpush.bf16.msra.mxu3 %v1159_v6 }
  0x1e   :  { %473 = vmatpush.bf16.msra.mxu0 %v1158_v7  ;;  %1187 = vmatpush.bf16.msra.mxu1 %v1158_v7 }
  0x1f   :  { %1188 = vmatpush.bf16.msra.mxu2 %v1158_v7  ;;  %1189 = vmatpush.bf16.msra.mxu3 %v1158_v7 }
  0x21   :  { %474 = vmatmul.bf16.vlgmr.msra.gmra.mxu0 %v1126_v8  ;;  %514 = vmatmul.bf16.vlgmr.msra.gmra.mxu1 %v1134_v9 }
  0x22   :  { %554 = vmatmul.bf16.vlgmr.msra.gmra.mxu2 %v1142_v10  ;;  %594 = vmatmul.bf16.vlgmr.msra.gmra.mxu3 %v1150_v11 }
  0x31   :  { %479 = vmatmul.bf16.gmra.mxu0 %v1127_v12  ;;  %519 = vmatmul.bf16.gmra.mxu1 %v1135_v13 }
  0x32   :  { %559 = vmatmul.bf16.gmra.mxu2 %v1143_v14  ;;  %599 = vmatmul.bf16.gmra.mxu3 %v1151_v15 }
  0x41   :  { %484 = vmatmul.bf16.gmra.mxu0 %v1128_v16  ;;  %524 = vmatmul.bf16.gmra.mxu1 %v1136_v17 }
  0x42   :  { %564 = vmatmul.bf16.gmra.mxu2 %v1144_v18  ;;  %604 = vmatmul.bf16.gmra.mxu3 %v1152_v19 }
  0x51   :  { %489 = vmatmul.bf16.gmra.mxu0 %v1129_v20  ;;  %529 = vmatmul.bf16.gmra.mxu1 %v1137_v21 }
  0x52   :  { %569 = vmatmul.bf16.gmra.mxu2 %v1145_v22  ;;  %609 = vmatmul.bf16.gmra.mxu3 %v1153_v23 }
  0x61   :  { %494 = vmatmul.bf16.gmra.mxu0 %v1130_v24  ;;  %534 = vmatmul.bf16.gmra.mxu1 %v1138_v25 }
  0x62   :  { %574 = vmatmul.bf16.gmra.mxu2 %v1146_v26  ;;  %614 = vmatmul.bf16.gmra.mxu3 %v1154_v27 }
  0x71   :  { %499 = vmatmul.bf16.gmra.mxu0 %v1131_v28  ;;  %539 = vmatmul.bf16.gmra.mxu1 %v1139_v29 }
  0x72   :  { %579 = vmatmul.bf16.gmra.mxu2 %v1147_v30  ;;  %619 = vmatmul.bf16.gmra.mxu3 %v1155_v31 }
  0x81   :  { %504 = vmatmul.bf16.gmra.mxu0 %v1132_v32  ;;  %544 = vmatmul.bf16.gmra.mxu1 %v1140_v33 }
  0x82   :  { %584 = vmatmul.bf16.gmra.mxu2 %v1148_v34  ;;  %624 = vmatmul.bf16.gmra.mxu3 %v1156_v35 }
  0x91   :  { %509 = vmatmul.bf16.gmra.mxu0 %v1133_v36  ;;  %549 = vmatmul.bf16.gmra.mxu1 %v1141_v37 }
  0x92   :  { %589 = vmatmul.bf16.gmra.mxu2 %v1149_v38  ;;  %629 = vmatmul.bf16.gmra.mxu3 %v1157_v39 }
  0x9e   :  { %v475_v41 = vpop.f32.mrf.mxu0  ;;  %v515_v42 = vpop.f32.mrf.mxu1 }
  0x9f   :  { %v834_v43 = vadd.f32 %v1334_v40, %v475_v41  ;;  %v850_v44 = vadd.f32 %v1334_v40, %v515_v42 }
  0xa1   :  { %898 = vst [vmem:[%s1595_s3] sm:$0xff] %v834_v43 }
  0xa2   :  { %914 = vst [vmem:[%s1595_s3 + $0x80] sm:$0xff] %v850_v44 }
  0xa5   :  { %v555_v45 = vpop.f32.mrf.mxu2  ;;  %v595_v46 = vpop.f32.mrf.mxu3 }
  0xa6   :  { %v866_v47 = vadd.f32 %v1334_v40, %v555_v45  ;;  %v882_v48 = vadd.f32 %v1334_v40, %v595_v46  ;;  %v477_v49 = vpop.f32.mrf.mxu0  ;;  %v517_v50 = vpop.f32.mrf.mxu1 }
  0xa7   :  { %v835_v51 = vadd.f32 %v1334_v40, %v477_v49  ;;  %v851_v52 = vadd.f32 %v1334_v40, %v517_v50 }
  0xa8   :  { %930 = vst [vmem:[%s1595_s3 + $0x100] sm:$0xff] %v866_v47 }
  0xa9   :  { %946 = vst [vmem:[%s1595_s3 + $0x180] sm:$0xff] %v882_v48 }
  0xaa   :  { %899 = vst [vmem:[%s1595_s3 + $0x8] sm:$0xff] %v835_v51 }
  0xab   :  { %915 = vst [vmem:[%s1595_s3 + $0x88] sm:$0xff] %v851_v52 }
  0xad   :  { %v557_v53 = vpop.f32.mrf.mxu2  ;;  %v597_v54 = vpop.f32.mrf.mxu3 }
  0xae   :  { %v867_v55 = vadd.f32 %v1334_v40, %v557_v53  ;;  %v883_v56 = vadd.f32 %v1334_v40, %v597_v54  ;;  %v480_v57 = vpop.f32.mrf.mxu0  ;;  %v520_v58 = vpop.f32.mrf.mxu1 }
  0xaf   :  { %v836_v59 = vadd.f32 %v1334_v40, %v480_v57  ;;  %v852_v60 = vadd.f32 %v1334_v40, %v520_v58 }
  0xb0   :  { %931 = vst [vmem:[%s1595_s3 + $0x108] sm:$0xff] %v867_v55 }
  0xb1   :  { %947 = vst [vmem:[%s1595_s3 + $0x188] sm:$0xff] %v883_v56 }
  0xb2   :  { %900 = vst [vmem:[%s1595_s3 + $0x10] sm:$0xff] %v836_v59 }
  0xb3   :  { %916 = vst [vmem:[%s1595_s3 + $0x90] sm:$0xff] %v852_v60 }
  0xb5   :  { %v560_v61 = vpop.f32.mrf.mxu2  ;;  %v600_v62 = vpop.f32.mrf.mxu3 }
  0xb6   :  { %v868_v63 = vadd.f32 %v1334_v40, %v560_v61  ;;  %v884_v0 = vadd.f32 %v1334_v40, %v600_v62  ;;  %v482_v1 = vpop.f32.mrf.mxu0  ;;  %v522_v2 = vpop.f32.mrf.mxu1 }
  0xb7   :  { %v837_v3 = vadd.f32 %v1334_v40, %v482_v1  ;;  %v853_v4 = vadd.f32 %v1334_v40, %v522_v2 }
  0xb8   :  { %932 = vst [vmem:[%s1595_s3 + $0x110] sm:$0xff] %v868_v63 }
  0xb9   :  { %948 = vst [vmem:[%s1595_s3 + $0x190] sm:$0xff] %v884_v0 }
  0xba   :  { %901 = vst [vmem:[%s1595_s3 + $0x18] sm:$0xff] %v837_v3 }
  0xbb   :  { %917 = vst [vmem:[%s1595_s3 + $0x98] sm:$0xff] %v853_v4 }
  0xbd   :  { %v562_v5 = vpop.f32.mrf.mxu2  ;;  %v602_v6 = vpop.f32.mrf.mxu3 }
  0xbe   :  { %v869_v7 = vadd.f32 %v1334_v40, %v562_v5  ;;  %v885_v8 = vadd.f32 %v1334_v40, %v602_v6  ;;  %v485_v9 = vpop.f32.mrf.mxu0  ;;  %v525_v10 = vpop.f32.mrf.mxu1 }
  0xbf   :  { %v838_v11 = vadd.f32 %v1334_v40, %v485_v9  ;;  %v854_v12 = vadd.f32 %v1334_v40, %v525_v10 }
  0xc0   :  { %933 = vst [vmem:[%s1595_s3 + $0x118] sm:$0xff] %v869_v7 }
  0xc1   :  { %949 = vst [vmem:[%s1595_s3 + $0x198] sm:$0xff] %v885_v8 }
  0xc2   :  { %902 = vst [vmem:[%s1595_s3 + $0x20] sm:$0xff] %v838_v11 }
  0xc3   :  { %918 = vst [vmem:[%s1595_s3 + $0xa0] sm:$0xff] %v854_v12 }
  0xc5   :  { %v565_v13 = vpop.f32.mrf.mxu2  ;;  %v605_v14 = vpop.f32.mrf.mxu3 }
  0xc6   :  { %v870_v15 = vadd.f32 %v1334_v40, %v565_v13  ;;  %v886_v16 = vadd.f32 %v1334_v40, %v605_v14  ;;  %v487_v17 = vpop.f32.mrf.mxu0  ;;  %v527_v18 = vpop.f32.mrf.mxu1 }
  0xc7   :  { %v839_v19 = vadd.f32 %v1334_v40, %v487_v17  ;;  %v855_v20 = vadd.f32 %v1334_v40, %v527_v18 }
  0xc8   :  { %934 = vst [vmem:[%s1595_s3 + $0x120] sm:$0xff] %v870_v15 }
  0xc9   :  { %950 = vst [vmem:[%s1595_s3 + $0x1a0] sm:$0xff] %v886_v16 }
  0xca   :  { %903 = vst [vmem:[%s1595_s3 + $0x28] sm:$0xff] %v839_v19 }
  0xcb   :  { %919 = vst [vmem:[%s1595_s3 + $0xa8] sm:$0xff] %v855_v20 }
  0xcd   :  { %v567_v21 = vpop.f32.mrf.mxu2  ;;  %v607_v22 = vpop.f32.mrf.mxu3 }
  0xce   :  { %v871_v23 = vadd.f32 %v1334_v40, %v567_v21  ;;  %v887_v24 = vadd.f32 %v1334_v40, %v607_v22  ;;  %v490_v25 = vpop.f32.mrf.mxu0  ;;  %v530_v26 = vpop.f32.mrf.mxu1 }
  0xcf   :  { %v840_v27 = vadd.f32 %v1334_v40, %v490_v25  ;;  %v856_v28 = vadd.f32 %v1334_v40, %v530_v26 }
  0xd0   :  { %935 = vst [vmem:[%s1595_s3 + $0x128] sm:$0xff] %v871_v23 }
  0xd1   :  { %951 = vst [vmem:[%s1595_s3 + $0x1a8] sm:$0xff] %v887_v24 }
  0xd2   :  { %904 = vst [vmem:[%s1595_s3 + $0x30] sm:$0xff] %v840_v27 }
  0xd3   :  { %920 = vst [vmem:[%s1595_s3 + $0xb0] sm:$0xff] %v856_v28 }
  0xd5   :  { %v570_v29 = vpop.f32.mrf.mxu2  ;;  %v610_v30 = vpop.f32.mrf.mxu3 }
  0xd6   :  { %v872_v31 = vadd.f32 %v1334_v40, %v570_v29  ;;  %v888_v32 = vadd.f32 %v1334_v40, %v610_v30  ;;  %v492_v33 = vpop.f32.mrf.mxu0  ;;  %v532_v34 = vpop.f32.mrf.mxu1 }
  0xd7   :  { %v841_v35 = vadd.f32 %v1334_v40, %v492_v33  ;;  %v857_v36 = vadd.f32 %v1334_v40, %v532_v34 }
  0xd8   :  { %936 = vst [vmem:[%s1595_s3 + $0x130] sm:$0xff] %v872_v31 }
  0xd9   :  { %952 = vst [vmem:[%s1595_s3 + $0x1b0] sm:$0xff] %v888_v32 }
  0xda   :  { %905 = vst [vmem:[%s1595_s3 + $0x38] sm:$0xff] %v841_v35 }
  0xdb   :  { %921 = vst [vmem:[%s1595_s3 + $0xb8] sm:$0xff] %v857_v36 }
  0xdd   :  { %v572_v37 = vpop.f32.mrf.mxu2  ;;  %v612_v38 = vpop.f32.mrf.mxu3 }
  0xde   :  { %v873_v39 = vadd.f32 %v1334_v40, %v572_v37  ;;  %v889_v41 = vadd.f32 %v1334_v40, %v612_v38  ;;  %v495_v42 = vpop.f32.mrf.mxu0  ;;  %v535_v43 = vpop.f32.mrf.mxu1 }
  0xdf   :  { %v842_v44 = vadd.f32 %v1334_v40, %v495_v42  ;;  %v858_v45 = vadd.f32 %v1334_v40, %v535_v43 }
  0xe0   :  { %937 = vst [vmem:[%s1595_s3 + $0x138] sm:$0xff] %v873_v39 }
  0xe1   :  { %953 = vst [vmem:[%s1595_s3 + $0x1b8] sm:$0xff] %v889_v41 }
  0xe2   :  { %906 = vst [vmem:[%s1595_s3 + $0x40] sm:$0xff] %v842_v44 }
  0xe3   :  { %922 = vst [vmem:[%s1595_s3 + $0xc0] sm:$0xff] %v858_v45 }
  0xe5   :  { %v575_v46 = vpop.f32.mrf.mxu2  ;;  %v615_v47 = vpop.f32.mrf.mxu3 }
  0xe6   :  { %v874_v48 = vadd.f32 %v1334_v40, %v575_v46  ;;  %v890_v49 = vadd.f32 %v1334_v40, %v615_v47  ;;  %v497_v50 = vpop.f32.mrf.mxu0  ;;  %v537_v51 = vpop.f32.mrf.mxu1 }
  0xe7   :  { %v843_v52 = vadd.f32 %v1334_v40, %v497_v50  ;;  %v859_v53 = vadd.f32 %v1334_v40, %v537_v51 }
  0xe8   :  { %938 = vst [vmem:[%s1595_s3 + $0x140] sm:$0xff] %v874_v48 }
  0xe9   :  { %954 = vst [vmem:[%s1595_s3 + $0x1c0] sm:$0xff] %v890_v49 }
  0xea   :  { %907 = vst [vmem:[%s1595_s3 + $0x48] sm:$0xff] %v843_v52 }
  0xeb   :  { %923 = vst [vmem:[%s1595_s3 + $0xc8] sm:$0xff] %v859_v53 }
  0xed   :  { %v577_v54 = vpop.f32.mrf.mxu2  ;;  %v617_v55 = vpop.f32.mrf.mxu3 }
  0xee   :  { %v875_v56 = vadd.f32 %v1334_v40, %v577_v54  ;;  %v891_v57 = vadd.f32 %v1334_v40, %v617_v55  ;;  %v500_v58 = vpop.f32.mrf.mxu0  ;;  %v540_v59 = vpop.f32.mrf.mxu1 }
  0xef   :  { %v844_v60 = vadd.f32 %v1334_v40, %v500_v58  ;;  %v860_v61 = vadd.f32 %v1334_v40, %v540_v59 }
  0xf0   :  { %939 = vst [vmem:[%s1595_s3 + $0x148] sm:$0xff] %v875_v56 }
  0xf1   :  { %955 = vst [vmem:[%s1595_s3 + $0x1c8] sm:$0xff] %v891_v57 }
  0xf2   :  { %908 = vst [vmem:[%s1595_s3 + $0x50] sm:$0xff] %v844_v60 }
  0xf3   :  { %924 = vst [vmem:[%s1595_s3 + $0xd0] sm:$0xff] %v860_v61 }
  0xf5   :  { %v580_v62 = vpop.f32.mrf.mxu2  ;;  %v620_v63 = vpop.f32.mrf.mxu3 }
  0xf6   :  { %v876_v0 = vadd.f32 %v1334_v40, %v580_v62  ;;  %v892_v1 = vadd.f32 %v1334_v40, %v620_v63  ;;  %v502_v2 = vpop.f32.mrf.mxu0  ;;  %v542_v3 = vpop.f32.mrf.mxu1 }
  0xf7   :  { %v845_v4 = vadd.f32 %v1334_v40, %v502_v2  ;;  %v861_v5 = vadd.f32 %v1334_v40, %v542_v3 }
  0xf8   :  { %940 = vst [vmem:[%s1595_s3 + $0x150] sm:$0xff] %v876_v0 }
  0xf9   :  { %956 = vst [vmem:[%s1595_s3 + $0x1d0] sm:$0xff] %v892_v1 }
  0xfa   :  { %909 = vst [vmem:[%s1595_s3 + $0x58] sm:$0xff] %v845_v4 }
  0xfb   :  { %925 = vst [vmem:[%s1595_s3 + $0xd8] sm:$0xff] %v861_v5 }
  0xfd   :  { %v582_v6 = vpop.f32.mrf.mxu2  ;;  %v622_v7 = vpop.f32.mrf.mxu3 }
  0xfe   :  { %v877_v8 = vadd.f32 %v1334_v40, %v582_v6  ;;  %v893_v9 = vadd.f32 %v1334_v40, %v622_v7  ;;  %v505_v10 = vpop.f32.mrf.mxu0  ;;  %v545_v11 = vpop.f32.mrf.mxu1 }
  0xff   :  { %v846_v12 = vadd.f32 %v1334_v40, %v505_v10  ;;  %v862_v13 = vadd.f32 %v1334_v40, %v545_v11 }
 0x100   :  { %941 = vst [vmem:[%s1595_s3 + $0x158] sm:$0xff] %v877_v8 }
 0x101   :  { %957 = vst [vmem:[%s1595_s3 + $0x1d8] sm:$0xff] %v893_v9 }
 0x102   :  { %910 = vst [vmem:[%s1595_s3 + $0x60] sm:$0xff] %v846_v12 }
 0x103   :  { %926 = vst [vmem:[%s1595_s3 + $0xe0] sm:$0xff] %v862_v13 }
 0x105   :  { %v585_v14 = vpop.f32.mrf.mxu2  ;;  %v625_v15 = vpop.f32.mrf.mxu3 }
 0x106   :  { %v878_v16 = vadd.f32 %v1334_v40, %v585_v14  ;;  %v894_v17 = vadd.f32 %v1334_v40, %v625_v15  ;;  %v507_v18 = vpop.f32.mrf.mxu0  ;;  %v547_v19 = vpop.f32.mrf.mxu1 }
 0x107   :  { %v847_v20 = vadd.f32 %v1334_v40, %v507_v18  ;;  %v863_v21 = vadd.f32 %v1334_v40, %v547_v19 }
 0x108   :  { %942 = vst [vmem:[%s1595_s3 + $0x160] sm:$0xff] %v878_v16 }
 0x109   :  { %958 = vst [vmem:[%s1595_s3 + $0x1e0] sm:$0xff] %v894_v17 }
 0x10a   :  { %911 = vst [vmem:[%s1595_s3 + $0x68] sm:$0xff] %v847_v20 }
 0x10b   :  { %927 = vst [vmem:[%s1595_s3 + $0xe8] sm:$0xff] %v863_v21 }
 0x10d   :  { %v587_v22 = vpop.f32.mrf.mxu2  ;;  %v627_v23 = vpop.f32.mrf.mxu3 }
 0x10e   :  { %v879_v24 = vadd.f32 %v1334_v40, %v587_v22  ;;  %v895_v25 = vadd.f32 %v1334_v40, %v627_v23  ;;  %v510_v26 = vpop.f32.mrf.mxu0  ;;  %v550_v27 = vpop.f32.mrf.mxu1 }
 0x10f   :  { %v848_v28 = vadd.f32 %v1334_v40, %v510_v26  ;;  %v864_v29 = vadd.f32 %v1334_v40, %v550_v27 }
 0x110   :  { %943 = vst [vmem:[%s1595_s3 + $0x168] sm:$0xff] %v879_v24 }
 0x111   :  { %959 = vst [vmem:[%s1595_s3 + $0x1e8] sm:$0xff] %v895_v25 }
 0x112   :  { %912 = vst [vmem:[%s1595_s3 + $0x70] sm:$0xff] %v848_v28 }
 0x113   :  { %928 = vst [vmem:[%s1595_s3 + $0xf0] sm:$0xff] %v864_v29 }
 0x115   :  { %v590_v30 = vpop.f32.mrf.mxu2  ;;  %v630_v31 = vpop.f32.mrf.mxu3 }
 0x116   :  { %v880_v32 = vadd.f32 %v1334_v40, %v590_v30  ;;  %v896_v33 = vadd.f32 %v1334_v40, %v630_v31  ;;  %v512_v34 = vpop.f32.mrf.mxu0  ;;  %v552_v35 = vpop.f32.mrf.mxu1 }
 0x117   :  { %v849_v36 = vadd.f32 %v1334_v40, %v512_v34  ;;  %v865_v37 = vadd.f32 %v1334_v40, %v552_v35 }
 0x118   :  { %944 = vst [vmem:[%s1595_s3 + $0x170] sm:$0xff] %v880_v32 }
 0x119   :  { %960 = vst [vmem:[%s1595_s3 + $0x1f0] sm:$0xff] %v896_v33 }
 0x11a   :  { %913 = vst [vmem:[%s1595_s3 + $0x78] sm:$0xff] %v849_v36 }
 0x11b   :  { %929 = vst [vmem:[%s1595_s3 + $0xf8] sm:$0xff] %v865_v37 }
 0x11d   :  { %v592_v38 = vpop.f32.mrf.mxu2  ;;  %v632_v39 = vpop.f32.mrf.mxu3 }
 0x11e   :  { %v881_v41 = vadd.f32 %v1334_v40, %v592_v38  ;;  %v897_v42 = vadd.f32 %v1334_v40, %v632_v39 }
 0x120   :  { %945 = vst [vmem:[%s1595_s3 + $0x178] sm:$0xff] %v881_v41 }
 0x121   :  { %961 = vst [vmem:[%s1595_s3 + $0x1f8] sm:$0xff] %v897_v42 }

// kernel: generator_forward.44
= control target key start
LH: loop header
LB: loop body
LE: loop exit
PB: predicated region body
PF: predicated region fallthrough
CT: control target
= control target key end

     0   :  { %s998_s9 = smov 0   ;;  %s1416_s0 = inlined_call_operand.vmem [shape: f32[2048,8], index: 0, kind: input, shape index: {}]   ;;  %s1417_s1 = inlined_call_operand.vmem [shape: f32[1,8], index: 1, kind: output, shape index: {0}]   ;;  %s1418_s2 = inlined_call_operand.vmem [shape: f32[1,8], index: 2, kind: output, shape index: {1}]  }
   0x1 LB: > { %s956_s10 = sadd.s32 4294967295, %s980_s9   ;;  %p959_p0 = scmp.ge.s32.totalorder %s980_s9, 1  ;;  %s980_s9 = sphi %s998_s9, %s13_s9  }
   0x2   : > { %p106_p1 = scmp.lt.s32.totalorder %s980_s9, 3 }
   0x4   : > { %p107_p2 = pnand %p959_p0, %p106_p1 }
   0x5   : > { %s960_s11 = sshll.u32 (!%p107_p2), %s956_s10, 7  ;;  %p962_p4 = scmp.ne.s32.totalorder (!%p107_p2), %s956_s10, 0 }
   0x6   : > { %110 = sbr.rel (%p107_p2) target bundleno = 294 (0x126), region = 24  ;;  %p124_p3 = scmp.lt.s32.totalorder (!%p107_p2), %s960_s11, 255 }
   0xb   : > { %s1420_s11 = smov (!%p124_p3, %s960_s11), 255  ;;  %132 = sbr.rel (%p962_p4) target bundleno = 19 (0x13), region = 28 }
   0xc   : > { %s961_s12 = sshll.u32 %s1420_s11, 3 }
   0xd   : > { %s1009_s15 = scalar_lea.vmem %s1416_s0, %s961_s12 }
  0x10   : > { %vm133_vm0 = vcmask 57344   ;;  %v982_v0 = vmov 0.0  }
  0x11   : > { %134 = vst.msk [vmem:[%s1417_s1] sm:$0x1] %vm133_vm0, %v982_v0 }
  0x12   : > { %135 = vst.msk [vmem:[%s1418_s2] sm:$0x1] %vm133_vm0, %v982_v0 }
  0x13 PF: > { %v136_v1 = vld [vmem:[%s1009_s15] sm:$0xff]  ;;  %v137_v2 = vld [vmem:[%s1009_s15 + $0x8] sm:$0xff]  ;;  %v138_v3 = vld [vmem:[%s1009_s15 + $0x10] sm:$0xff]  ;;  %vm265_vm1 = vcmask 64512   ;;  %vm528_vm2 = vcmask 57344  }
  0x14   : > { %v266_v4 = vsel %vm265_vm1, %v136_v1, 0.0  ;;  %v267_v5 = vsel %vm265_vm1, %v137_v2, 0.0  ;;  %v269_v6 = vsel %vm265_vm1, %v138_v3, 0.0  ;;  %v139_v7 = vld [vmem:[%s1009_s15 + $0x18] sm:$0xff]  ;;  %v140_v10 = vld [vmem:[%s1009_s15 + $0x20] sm:$0xff]  ;;  %v141_v13 = vld [vmem:[%s1009_s15 + $0x28] sm:$0xff]  ;;  %v531_v21 = vmul.f32 %v136_v1, %v136_v1 }
  0x15   : > { %v268_v8 = vadd.f32 %v267_v5, %v266_v4  ;;  %v271_v9 = vsel %vm265_vm1, %v139_v7, 0.0  ;;  %v273_v12 = vsel %vm265_vm1, %v140_v10, 0.0  ;;  %v275_v15 = vsel %vm265_vm1, %v141_v13, 0.0  ;;  %v142_v16 = vld [vmem:[%s1009_s15 + $0x30] sm:$0xff]  ;;  %v143_v19 = vld [vmem:[%s1009_s15 + $0x38] sm:$0xff]  ;;  %v144_v25 = vld [vmem:[%s1009_s15 + $0x40] sm:$0xff] }
  0x16   : > { %v277_v18 = vsel %vm265_vm1, %v142_v16, 0.0  ;;  %v279_v22 = vsel %vm265_vm1, %v143_v19, 0.0  ;;  %v532_v23 = vmul.f32 %v137_v2, %v137_v2  ;;  %v533_v24 = vmul.f32 %v138_v3, %v138_v3  ;;  %v145_v29 = vld [vmem:[%s1009_s15 + $0x48] sm:$0xff]  ;;  %v146_v36 = vld [vmem:[%s1009_s15 + $0x50] sm:$0xff]  ;;  %v147_v42 = vld [vmem:[%s1009_s15 + $0x58] sm:$0xff] }
  0x17   : > { %v270_v11 = vadd.f32 %v269_v6, %v268_v8  ;;  %v281_v27 = vsel %vm265_vm1, %v144_v25, 0.0  ;;  %v534_v28 = vmul.f32 %v139_v7, %v139_v7  ;;  %v659_v31 = vsel %vm265_vm1, %v531_v21, 0.0  ;;  %v148_v48 = vld [vmem:[%s1009_s15 + $0x60] sm:$0xff]  ;;  %v149_v54 = vld [vmem:[%s1009_s15 + $0x68] sm:$0xff]  ;;  %v150_v60 = vld [vmem:[%s1009_s15 + $0x70] sm:$0xff] }
  0x18   : > { %v283_v32 = vsel %vm265_vm1, %v145_v29, 0.0  ;;  %v535_v33 = vmul.f32 %v140_v10, %v140_v10  ;;  %v660_v34 = vsel %vm265_vm1, %v532_v23, 0.0  ;;  %v662_v35 = vsel %vm265_vm1, %v533_v24, 0.0  ;;  %v151_v2 = vld [vmem:[%s1009_s15 + $0x78] sm:$0xff]  ;;  %v152_v8 = vld [vmem:[%s1009_s15 + $0x80] sm:$0xff] }
  0x19   : > { %v272_v14 = vadd.f32 %v271_v9, %v270_v11  ;;  %v661_v38 = vadd.f32 %v660_v34, %v659_v31  ;;  %v285_v39 = vsel %vm265_vm1, %v146_v36, 0.0  ;;  %v536_v40 = vmul.f32 %v141_v13, %v141_v13 }
  0x1a   : > { %v664_v41 = vsel %vm265_vm1, %v534_v28, 0.0  ;;  %v287_v45 = vsel %vm265_vm1, %v147_v42, 0.0  ;;  %v537_v46 = vmul.f32 %v142_v16, %v142_v16  ;;  %v666_v47 = vsel %vm265_vm1, %v535_v33, 0.0 }
  0x1b   : > { %v274_v17 = vadd.f32 %v273_v12, %v272_v14  ;;  %v663_v44 = vadd.f32 %v662_v35, %v661_v38  ;;  %v289_v51 = vsel %vm265_vm1, %v148_v48, 0.0  ;;  %v538_v52 = vmul.f32 %v143_v19, %v143_v19  ;;  %v153_v14 = vld [vmem:[%s1009_s15 + $0x88] sm:$0xff] }
  0x1c   : > { %v668_v53 = vsel %vm265_vm1, %v536_v40, 0.0  ;;  %v291_v57 = vsel %vm265_vm1, %v149_v54, 0.0  ;;  %v539_v58 = vmul.f32 %v144_v25, %v144_v25  ;;  %v670_v59 = vsel %vm265_vm1, %v537_v46, 0.0  ;;  %v157_v38 = vld [vmem:[%s1009_s15 + $0xa8] sm:$0xff] }
  0x1d   : > { %v276_v20 = vadd.f32 %v275_v15, %v274_v17  ;;  %v665_v50 = vadd.f32 %v664_v41, %v663_v44  ;;  %v293_v63 = vsel %vm265_vm1, %v150_v60, 0.0  ;;  %v540_v0 = vmul.f32 %v145_v29, %v145_v29  ;;  %v158_v44 = vld [vmem:[%s1009_s15 + $0xb0] sm:$0xff] }
  0x1e   : > { %v672_v1 = vsel %vm265_vm1, %v538_v52, 0.0  ;;  %v295_v5 = vsel %vm265_vm1, %v151_v2, 0.0  ;;  %v541_v6 = vmul.f32 %v146_v36, %v146_v36  ;;  %v674_v7 = vsel %vm265_vm1, %v539_v58, 0.0 }
  0x1f   : > { %v278_v26 = vadd.f32 %v277_v18, %v276_v20  ;;  %v667_v56 = vadd.f32 %v666_v47, %v665_v50  ;;  %v297_v11 = vsel %vm265_vm1, %v152_v8, 0.0  ;;  %v542_v12 = vmul.f32 %v147_v42, %v147_v42  ;;  %v154_v20 = vld [vmem:[%s1009_s15 + $0x90] sm:$0xff]  ;;  %v159_v50 = vld [vmem:[%s1009_s15 + $0xb8] sm:$0xff] }
  0x20   : > { %v676_v13 = vsel %vm265_vm1, %v540_v0, 0.0  ;;  %v299_v17 = vsel %vm265_vm1, %v153_v14, 0.0  ;;  %v543_v18 = vmul.f32 %v148_v48, %v148_v48  ;;  %v678_v19 = vsel %vm265_vm1, %v541_v6, 0.0 }
  0x21   : > { %v280_v30 = vadd.f32 %v279_v22, %v278_v26  ;;  %v669_v62 = vadd.f32 %v668_v53, %v667_v56  ;;  %v301_v23 = vsel %vm265_vm1, %v154_v20, 0.0  ;;  %v544_v24 = vmul.f32 %v149_v54, %v149_v54  ;;  %v155_v26 = vld [vmem:[%s1009_s15 + $0x98] sm:$0xff]  ;;  %v160_v56 = vld [vmem:[%s1009_s15 + $0xc0] sm:$0xff] }
  0x22   : > { %v680_v25 = vsel %vm265_vm1, %v542_v12, 0.0  ;;  %v303_v29 = vsel %vm265_vm1, %v155_v26, 0.0  ;;  %v682_v31 = vsel %vm265_vm1, %v543_v18, 0.0  ;;  %v546_v36 = vmul.f32 %v151_v2, %v151_v2 }
  0x23   : > { %v282_v37 = vadd.f32 %v281_v27, %v280_v30  ;;  %v671_v4 = vadd.f32 %v670_v59, %v669_v62  ;;  %v545_v30 = vmul.f32 %v150_v60, %v150_v60  ;;  %v307_v41 = vsel %vm265_vm1, %v157_v38, 0.0  ;;  %v161_v62 = vld [vmem:[%s1009_s15 + $0xc8] sm:$0xff] }
  0x24   : > { %v547_v42 = vmul.f32 %v152_v8, %v152_v8  ;;  %v309_v47 = vsel %vm265_vm1, %v158_v44, 0.0  ;;  %v548_v48 = vmul.f32 %v153_v14, %v153_v14  ;;  %v311_v53 = vsel %vm265_vm1, %v159_v50, 0.0 }
  0x25   : > { %v284_v43 = vadd.f32 %v283_v32, %v282_v37  ;;  %v673_v10 = vadd.f32 %v672_v1, %v671_v4  ;;  %v156_v32 = vld [vmem:[%s1009_s15 + $0xa0] sm:$0xff]  ;;  %v684_v37 = vsel %vm265_vm1, %v544_v24, 0.0  ;;  %v549_v54 = vmul.f32 %v154_v20, %v154_v20  ;;  %v162_v4 = vld [vmem:[%s1009_s15 + $0xd0] sm:$0xff] }
  0x26   : > { %v305_v35 = vsel %vm265_vm1, %v156_v32, 0.0  ;;  %v313_v59 = vsel %vm265_vm1, %v160_v56, 0.0  ;;  %v550_v60 = vmul.f32 %v155_v26, %v155_v26  ;;  %v315_v1 = vsel %vm265_vm1, %v161_v62, 0.0 }
  0x27   : > { %v286_v49 = vadd.f32 %v285_v39, %v284_v43  ;;  %v675_v16 = vadd.f32 %v674_v7, %v673_v10  ;;  %v686_v43 = vsel %vm265_vm1, %v545_v30, 0.0  ;;  %v551_v2 = vmul.f32 %v156_v32, %v156_v32  ;;  %v163_v10 = vld [vmem:[%s1009_s15 + $0xd8] sm:$0xff] }
  0x28   : > { %v317_v7 = vsel %vm265_vm1, %v162_v4, 0.0  ;;  %v552_v8 = vmul.f32 %v157_v38, %v157_v38  ;;  %v553_v14 = vmul.f32 %v158_v44, %v158_v44  ;;  %v554_v20 = vmul.f32 %v159_v50, %v159_v50 }
  0x29   : > { %v288_v55 = vadd.f32 %v287_v45, %v286_v49  ;;  %v677_v22 = vadd.f32 %v676_v13, %v675_v16  ;;  %v688_v49 = vsel %vm265_vm1, %v546_v36, 0.0  ;;  %v319_v13 = vsel %vm265_vm1, %v163_v10, 0.0  ;;  %v164_v16 = vld [vmem:[%s1009_s15 + $0xe0] sm:$0xff] }
  0x2a   : > { %v555_v26 = vmul.f32 %v160_v56, %v160_v56  ;;  %v556_v32 = vmul.f32 %v161_v62, %v161_v62  ;;  %v557_v38 = vmul.f32 %v162_v4, %v162_v4  ;;  %v558_v44 = vmul.f32 %v163_v10, %v163_v10 }
  0x2b   : > { %v290_v61 = vadd.f32 %v289_v51, %v288_v55  ;;  %v679_v28 = vadd.f32 %v678_v19, %v677_v22  ;;  %v690_v55 = vsel %vm265_vm1, %v547_v42, 0.0  ;;  %v321_v19 = vsel %vm265_vm1, %v164_v16, 0.0  ;;  %v165_v22 = vld [vmem:[%s1009_s15 + $0xe8] sm:$0xff] }
  0x2c   : > { %v559_v50 = vmul.f32 %v164_v16, %v164_v16  ;;  %v560_v56 = vmul.f32 %v165_v22, %v165_v22 }
  0x2d   : > { %v292_v3 = vadd.f32 %v291_v57, %v290_v61  ;;  %v681_v34 = vadd.f32 %v680_v25, %v679_v28  ;;  %v692_v61 = vsel %vm265_vm1, %v548_v48, 0.0  ;;  %v323_v25 = vsel %vm265_vm1, %v165_v22, 0.0  ;;  %v166_v28 = vld [vmem:[%s1009_s15 + $0xf0] sm:$0xff] }
  0x2e   : > { %v561_v62 = vmul.f32 %v166_v28, %v166_v28 }
  0x2f   : > { %v294_v9 = vadd.f32 %v293_v63, %v292_v3  ;;  %v683_v40 = vadd.f32 %v682_v31, %v681_v34  ;;  %v694_v3 = vsel %vm265_vm1, %v549_v54, 0.0  ;;  %v325_v31 = vsel %vm265_vm1, %v166_v28, 0.0  ;;  %v167_v34 = vld [vmem:[%s1009_s15 + $0xf8] sm:$0xff] }
  0x30   : > { %v562_v4 = vmul.f32 %v167_v34, %v167_v34 }
  0x31   : > { %v296_v15 = vadd.f32 %v295_v5, %v294_v9  ;;  %v685_v46 = vadd.f32 %v684_v37, %v683_v40  ;;  %v696_v9 = vsel %vm265_vm1, %v550_v60, 0.0  ;;  %v327_v37 = vsel %vm265_vm1, %v167_v34, 0.0  ;;  %v168_v40 = vld [vmem:[%s1009_s15 + $0x100] sm:$0xff] }
  0x32   : > { %v563_v10 = vmul.f32 %v168_v40, %v168_v40 }
  0x33   : > { %v298_v21 = vadd.f32 %v297_v11, %v296_v15  ;;  %v687_v52 = vadd.f32 %v686_v43, %v685_v46  ;;  %v698_v15 = vsel %vm265_vm1, %v551_v2, 0.0  ;;  %v329_v43 = vsel %vm265_vm1, %v168_v40, 0.0  ;;  %v169_v46 = vld [vmem:[%s1009_s15 + $0x108] sm:$0xff] }
  0x34   : > { %v564_v16 = vmul.f32 %v169_v46, %v169_v46 }
  0x35   : > { %v300_v27 = vadd.f32 %v299_v17, %v298_v21  ;;  %v689_v58 = vadd.f32 %v688_v49, %v687_v52  ;;  %v700_v21 = vsel %vm265_vm1, %v552_v8, 0.0  ;;  %v331_v49 = vsel %vm265_vm1, %v169_v46, 0.0  ;;  %v170_v52 = vld [vmem:[%s1009_s15 + $0x110] sm:$0xff] }
  0x36   : > { %v565_v22 = vmul.f32 %v170_v52, %v170_v52 }
  0x37   : > { %v302_v33 = vadd.f32 %v301_v23, %v300_v27  ;;  %v691_v0 = vadd.f32 %v690_v55, %v689_v58  ;;  %v702_v27 = vsel %vm265_vm1, %v553_v14, 0.0  ;;  %v333_v55 = vsel %vm265_vm1, %v170_v52, 0.0  ;;  %v171_v58 = vld [vmem:[%s1009_s15 + $0x118] sm:$0xff] }
  0x38   : > { %v566_v28 = vmul.f32 %v171_v58, %v171_v58 }
  0x39   : > { %v304_v39 = vadd.f32 %v303_v29, %v302_v33  ;;  %v693_v6 = vadd.f32 %v692_v61, %v691_v0  ;;  %v704_v33 = vsel %vm265_vm1, %v554_v20, 0.0  ;;  %v335_v61 = vsel %vm265_vm1, %v171_v58, 0.0  ;;  %v172_v0 = vld [vmem:[%s1009_s15 + $0x120] sm:$0xff] }
  0x3a   : > { %v567_v34 = vmul.f32 %v172_v0, %v172_v0 }
  0x3b   : > { %v306_v45 = vadd.f32 %v305_v35, %v304_v39  ;;  %v695_v12 = vadd.f32 %v694_v3, %v693_v6  ;;  %v706_v39 = vsel %vm265_vm1, %v555_v26, 0.0  ;;  %v337_v3 = vsel %vm265_vm1, %v172_v0, 0.0  ;;  %v173_v6 = vld [vmem:[%s1009_s15 + $0x128] sm:$0xff] }
  0x3c   : > { %v568_v40 = vmul.f32 %v173_v6, %v173_v6 }
  0x3d   : > { %v308_v51 = vadd.f32 %v307_v41, %v306_v45  ;;  %v697_v18 = vadd.f32 %v696_v9, %v695_v12  ;;  %v708_v45 = vsel %vm265_vm1, %v556_v32, 0.0  ;;  %v339_v9 = vsel %vm265_vm1, %v173_v6, 0.0  ;;  %v174_v12 = vld [vmem:[%s1009_s15 + $0x130] sm:$0xff] }
  0x3e   : > { %v569_v46 = vmul.f32 %v174_v12, %v174_v12 }
  0x3f   : > { %v310_v57 = vadd.f32 %v309_v47, %v308_v51  ;;  %v699_v24 = vadd.f32 %v698_v15, %v697_v18  ;;  %v710_v51 = vsel %vm265_vm1, %v557_v38, 0.0  ;;  %v341_v15 = vsel %vm265_vm1, %v174_v12, 0.0  ;;  %v175_v18 = vld [vmem:[%s1009_s15 + $0x138] sm:$0xff] }
  0x40   : > { %v570_v52 = vmul.f32 %v175_v18, %v175_v18 }
  0x41   : > { %v312_v63 = vadd.f32 %v311_v53, %v310_v57  ;;  %v701_v30 = vadd.f32 %v700_v21, %v699_v24  ;;  %v712_v57 = vsel %vm265_vm1, %v558_v44, 0.0  ;;  %v343_v21 = vsel %vm265_vm1, %v175_v18, 0.0  ;;  %v176_v24 = vld [vmem:[%s1009_s15 + $0x140] sm:$0xff] }
  0x42   : > { %v571_v58 = vmul.f32 %v176_v24, %v176_v24 }
  0x43   : > { %v314_v5 = vadd.f32 %v313_v59, %v312_v63  ;;  %v703_v36 = vadd.f32 %v702_v27, %v701_v30  ;;  %v714_v63 = vsel %vm265_vm1, %v559_v50, 0.0  ;;  %v345_v27 = vsel %vm265_vm1, %v176_v24, 0.0  ;;  %v177_v30 = vld [vmem:[%s1009_s15 + $0x148] sm:$0xff] }
  0x44   : > { %v572_v0 = vmul.f32 %v177_v30, %v177_v30 }
  0x45   : > { %v316_v11 = vadd.f32 %v315_v1, %v314_v5  ;;  %v705_v42 = vadd.f32 %v704_v33, %v703_v36  ;;  %v716_v5 = vsel %vm265_vm1, %v560_v56, 0.0  ;;  %v347_v33 = vsel %vm265_vm1, %v177_v30, 0.0  ;;  %v178_v36 = vld [vmem:[%s1009_s15 + $0x150] sm:$0xff] }
  0x46   : > { %v573_v6 = vmul.f32 %v178_v36, %v178_v36 }
  0x47   : > { %v318_v17 = vadd.f32 %v317_v7, %v316_v11  ;;  %v707_v48 = vadd.f32 %v706_v39, %v705_v42  ;;  %v718_v11 = vsel %vm265_vm1, %v561_v62, 0.0  ;;  %v349_v39 = vsel %vm265_vm1, %v178_v36, 0.0  ;;  %v179_v42 = vld [vmem:[%s1009_s15 + $0x158] sm:$0xff] }
  0x48   : > { %v574_v12 = vmul.f32 %v179_v42, %v179_v42 }
  0x49   : > { %v320_v23 = vadd.f32 %v319_v13, %v318_v17  ;;  %v709_v54 = vadd.f32 %v708_v45, %v707_v48  ;;  %v720_v17 = vsel %vm265_vm1, %v562_v4, 0.0  ;;  %v351_v45 = vsel %vm265_vm1, %v179_v42, 0.0  ;;  %v180_v48 = vld [vmem:[%s1009_s15 + $0x160] sm:$0xff] }
  0x4a   : > { %v575_v18 = vmul.f32 %v180_v48, %v180_v48 }
  0x4b   : > { %v322_v29 = vadd.f32 %v321_v19, %v320_v23  ;;  %v711_v60 = vadd.f32 %v710_v51, %v709_v54  ;;  %v722_v23 = vsel %vm265_vm1, %v563_v10, 0.0  ;;  %v353_v51 = vsel %vm265_vm1, %v180_v48, 0.0  ;;  %v181_v54 = vld [vmem:[%s1009_s15 + $0x168] sm:$0xff] }
  0x4c   : > { %v576_v24 = vmul.f32 %v181_v54, %v181_v54 }
  0x4d   : > { %v324_v35 = vadd.f32 %v323_v25, %v322_v29  ;;  %v713_v2 = vadd.f32 %v712_v57, %v711_v60  ;;  %v724_v29 = vsel %vm265_vm1, %v564_v16, 0.0  ;;  %v355_v57 = vsel %vm265_vm1, %v181_v54, 0.0  ;;  %v182_v60 = vld [vmem:[%s1009_s15 + $0x170] sm:$0xff] }
  0x4e   : > { %v577_v30 = vmul.f32 %v182_v60, %v182_v60 }
  0x4f   : > { %v326_v41 = vadd.f32 %v325_v31, %v324_v35  ;;  %v715_v8 = vadd.f32 %v714_v63, %v713_v2  ;;  %v726_v35 = vsel %vm265_vm1, %v565_v22, 0.0  ;;  %v357_v63 = vsel %vm265_vm1, %v182_v60, 0.0  ;;  %v183_v2 = vld [vmem:[%s1009_s15 + $0x178] sm:$0xff] }
  0x50   : > { %v578_v36 = vmul.f32 %v183_v2, %v183_v2 }
  0x51   : > { %v328_v47 = vadd.f32 %v327_v37, %v326_v41  ;;  %v717_v14 = vadd.f32 %v716_v5, %v715_v8  ;;  %v728_v41 = vsel %vm265_vm1, %v566_v28, 0.0  ;;  %v359_v5 = vsel %vm265_vm1, %v183_v2, 0.0  ;;  %v184_v8 = vld [vmem:[%s1009_s15 + $0x180] sm:$0xff] }
  0x52   : > { %v579_v42 = vmul.f32 %v184_v8, %v184_v8 }
  0x53   : > { %v330_v53 = vadd.f32 %v329_v43, %v328_v47  ;;  %v719_v20 = vadd.f32 %v718_v11, %v717_v14  ;;  %v730_v47 = vsel %vm265_vm1, %v567_v34, 0.0  ;;  %v361_v11 = vsel %vm265_vm1, %v184_v8, 0.0  ;;  %v185_v14 = vld [vmem:[%s1009_s15 + $0x188] sm:$0xff] }
  0x54   : > { %v580_v48 = vmul.f32 %v185_v14, %v185_v14 }
  0x55   : > { %v332_v59 = vadd.f32 %v331_v49, %v330_v53  ;;  %v721_v26 = vadd.f32 %v720_v17, %v719_v20  ;;  %v732_v53 = vsel %vm265_vm1, %v568_v40, 0.0  ;;  %v363_v17 = vsel %vm265_vm1, %v185_v14, 0.0  ;;  %v186_v20 = vld [vmem:[%s1009_s15 + $0x190] sm:$0xff] }
  0x56   : > { %v581_v54 = vmul.f32 %v186_v20, %v186_v20 }
  0x57   : > { %v334_v1 = vadd.f32 %v333_v55, %v332_v59  ;;  %v723_v32 = vadd.f32 %v722_v23, %v721_v26  ;;  %v734_v59 = vsel %vm265_vm1, %v569_v46, 0.0  ;;  %v365_v23 = vsel %vm265_vm1, %v186_v20, 0.0  ;;  %v187_v26 = vld [vmem:[%s1009_s15 + $0x198] sm:$0xff] }
  0x58   : > { %v582_v60 = vmul.f32 %v187_v26, %v187_v26 }
  0x59   : > { %v336_v7 = vadd.f32 %v335_v61, %v334_v1  ;;  %v725_v38 = vadd.f32 %v724_v29, %v723_v32  ;;  %v736_v1 = vsel %vm265_vm1, %v570_v52, 0.0  ;;  %v367_v29 = vsel %vm265_vm1, %v187_v26, 0.0  ;;  %v188_v32 = vld [vmem:[%s1009_s15 + $0x1a0] sm:$0xff] }
  0x5a   : > { %v583_v2 = vmul.f32 %v188_v32, %v188_v32 }
  0x5b   : > { %v338_v13 = vadd.f32 %v337_v3, %v336_v7  ;;  %v727_v44 = vadd.f32 %v726_v35, %v725_v38  ;;  %v738_v7 = vsel %vm265_vm1, %v571_v58, 0.0  ;;  %v369_v35 = vsel %vm265_vm1, %v188_v32, 0.0  ;;  %v189_v38 = vld [vmem:[%s1009_s15 + $0x1a8] sm:$0xff] }
  0x5c   : > { %v584_v8 = vmul.f32 %v189_v38, %v189_v38 }
  0x5d   : > { %v340_v19 = vadd.f32 %v339_v9, %v338_v13  ;;  %v729_v50 = vadd.f32 %v728_v41, %v727_v44  ;;  %v740_v13 = vsel %vm265_vm1, %v572_v0, 0.0  ;;  %v371_v41 = vsel %vm265_vm1, %v189_v38, 0.0  ;;  %v190_v44 = vld [vmem:[%s1009_s15 + $0x1b0] sm:$0xff] }
  0x5e   : > { %v585_v14 = vmul.f32 %v190_v44, %v190_v44 }
  0x5f   : > { %v342_v25 = vadd.f32 %v341_v15, %v340_v19  ;;  %v731_v56 = vadd.f32 %v730_v47, %v729_v50  ;;  %v742_v19 = vsel %vm265_vm1, %v573_v6, 0.0  ;;  %v373_v47 = vsel %vm265_vm1, %v190_v44, 0.0  ;;  %v191_v50 = vld [vmem:[%s1009_s15 + $0x1b8] sm:$0xff] }
  0x60   : > { %v586_v20 = vmul.f32 %v191_v50, %v191_v50 }
  0x61   : > { %v344_v31 = vadd.f32 %v343_v21, %v342_v25  ;;  %v733_v62 = vadd.f32 %v732_v53, %v731_v56  ;;  %v744_v25 = vsel %vm265_vm1, %v574_v12, 0.0  ;;  %v375_v53 = vsel %vm265_vm1, %v191_v50, 0.0  ;;  %v192_v56 = vld [vmem:[%s1009_s15 + $0x1c0] sm:$0xff] }
  0x62   : > { %v587_v26 = vmul.f32 %v192_v56, %v192_v56 }
  0x63   : > { %v346_v37 = vadd.f32 %v345_v27, %v344_v31  ;;  %v735_v4 = vadd.f32 %v734_v59, %v733_v62  ;;  %v746_v31 = vsel %vm265_vm1, %v575_v18, 0.0  ;;  %v377_v59 = vsel %vm265_vm1, %v192_v56, 0.0  ;;  %v193_v62 = vld [vmem:[%s1009_s15 + $0x1c8] sm:$0xff] }
  0x64   : > { %v588_v32 = vmul.f32 %v193_v62, %v193_v62 }
  0x65   : > { %v348_v43 = vadd.f32 %v347_v33, %v346_v37  ;;  %v737_v10 = vadd.f32 %v736_v1, %v735_v4  ;;  %v748_v37 = vsel %vm265_vm1, %v576_v24, 0.0  ;;  %v379_v1 = vsel %vm265_vm1, %v193_v62, 0.0  ;;  %v194_v4 = vld [vmem:[%s1009_s15 + $0x1d0] sm:$0xff] }
  0x66   : > { %v589_v38 = vmul.f32 %v194_v4, %v194_v4 }
  0x67   : > { %v350_v49 = vadd.f32 %v349_v39, %v348_v43  ;;  %v739_v16 = vadd.f32 %v738_v7, %v737_v10  ;;  %v750_v43 = vsel %vm265_vm1, %v577_v30, 0.0  ;;  %v381_v7 = vsel %vm265_vm1, %v194_v4, 0.0  ;;  %v195_v10 = vld [vmem:[%s1009_s15 + $0x1d8] sm:$0xff] }
  0x68   : > { %v590_v44 = vmul.f32 %v195_v10, %v195_v10 }
  0x69   : > { %v352_v55 = vadd.f32 %v351_v45, %v350_v49  ;;  %v741_v22 = vadd.f32 %v740_v13, %v739_v16  ;;  %v752_v49 = vsel %vm265_vm1, %v578_v36, 0.0  ;;  %v383_v13 = vsel %vm265_vm1, %v195_v10, 0.0  ;;  %v196_v16 = vld [vmem:[%s1009_s15 + $0x1e0] sm:$0xff] }
  0x6a   : > { %v591_v50 = vmul.f32 %v196_v16, %v196_v16 }
  0x6b   : > { %v354_v61 = vadd.f32 %v353_v51, %v352_v55  ;;  %v743_v28 = vadd.f32 %v742_v19, %v741_v22  ;;  %v754_v55 = vsel %vm265_vm1, %v579_v42, 0.0  ;;  %v385_v19 = vsel %vm265_vm1, %v196_v16, 0.0  ;;  %v197_v22 = vld [vmem:[%s1009_s15 + $0x1e8] sm:$0xff] }
  0x6c   : > { %v592_v56 = vmul.f32 %v197_v22, %v197_v22 }
  0x6d   : > { %v356_v3 = vadd.f32 %v355_v57, %v354_v61  ;;  %v745_v34 = vadd.f32 %v744_v25, %v743_v28  ;;  %v756_v61 = vsel %vm265_vm1, %v580_v48, 0.0  ;;  %v387_v25 = vsel %vm265_vm1, %v197_v22, 0.0  ;;  %v198_v28 = vld [vmem:[%s1009_s15 + $0x1f0] sm:$0xff] }
  0x6e   : > { %v593_v62 = vmul.f32 %v198_v28, %v198_v28 }
  0x6f   : > { %v358_v9 = vadd.f32 %v357_v63, %v356_v3  ;;  %v747_v40 = vadd.f32 %v746_v31, %v745_v34  ;;  %v758_v3 = vsel %vm265_vm1, %v581_v54, 0.0  ;;  %v389_v31 = vsel %vm265_vm1, %v198_v28, 0.0  ;;  %v199_v34 = vld [vmem:[%s1009_s15 + $0x1f8] sm:$0xff] }
  0x70   : > { %v594_v4 = vmul.f32 %v199_v34, %v199_v34 }
  0x71   : > { %v360_v15 = vadd.f32 %v359_v5, %v358_v9  ;;  %v749_v46 = vadd.f32 %v748_v37, %v747_v40  ;;  %v760_v9 = vsel %vm265_vm1, %v582_v60, 0.0  ;;  %v391_v37 = vsel %vm265_vm1, %v199_v34, 0.0  ;;  %v200_v40 = vld [vmem:[%s1009_s15 + $0x200] sm:$0xff] }
  0x72   : > { %v595_v10 = vmul.f32 %v200_v40, %v200_v40 }
  0x73   : > { %v362_v21 = vadd.f32 %v361_v11, %v360_v15  ;;  %v751_v52 = vadd.f32 %v750_v43, %v749_v46  ;;  %v762_v15 = vsel %vm265_vm1, %v583_v2, 0.0  ;;  %v393_v43 = vsel %vm265_vm1, %v200_v40, 0.0  ;;  %v201_v46 = vld [vmem:[%s1009_s15 + $0x208] sm:$0xff] }
  0x74   : > { %v596_v16 = vmul.f32 %v201_v46, %v201_v46 }
  0x75   : > { %v364_v27 = vadd.f32 %v363_v17, %v362_v21  ;;  %v753_v58 = vadd.f32 %v752_v49, %v751_v52  ;;  %v764_v21 = vsel %vm265_vm1, %v584_v8, 0.0  ;;  %v395_v49 = vsel %vm265_vm1, %v201_v46, 0.0  ;;  %v202_v52 = vld [vmem:[%s1009_s15 + $0x210] sm:$0xff] }
  0x76   : > { %v597_v22 = vmul.f32 %v202_v52, %v202_v52 }
  0x77   : > { %v366_v33 = vadd.f32 %v365_v23, %v364_v27  ;;  %v755_v0 = vadd.f32 %v754_v55, %v753_v58  ;;  %v766_v27 = vsel %vm265_vm1, %v585_v14, 0.0  ;;  %v397_v55 = vsel %vm265_vm1, %v202_v52, 0.0  ;;  %v203_v58 = vld [vmem:[%s1009_s15 + $0x218] sm:$0xff] }
  0x78   : > { %v598_v28 = vmul.f32 %v203_v58, %v203_v58 }
  0x79   : > { %v368_v39 = vadd.f32 %v367_v29, %v366_v33  ;;  %v757_v6 = vadd.f32 %v756_v61, %v755_v0  ;;  %v768_v33 = vsel %vm265_vm1, %v586_v20, 0.0  ;;  %v399_v61 = vsel %vm265_vm1, %v203_v58, 0.0  ;;  %v204_v0 = vld [vmem:[%s1009_s15 + $0x220] sm:$0xff] }
  0x7a   : > { %v599_v34 = vmul.f32 %v204_v0, %v204_v0 }
  0x7b   : > { %v370_v45 = vadd.f32 %v369_v35, %v368_v39  ;;  %v759_v12 = vadd.f32 %v758_v3, %v757_v6  ;;  %v770_v39 = vsel %vm265_vm1, %v587_v26, 0.0  ;;  %v401_v3 = vsel %vm265_vm1, %v204_v0, 0.0  ;;  %v205_v6 = vld [vmem:[%s1009_s15 + $0x228] sm:$0xff] }
  0x7c   : > { %v600_v40 = vmul.f32 %v205_v6, %v205_v6 }
  0x7d   : > { %v372_v51 = vadd.f32 %v371_v41, %v370_v45  ;;  %v761_v18 = vadd.f32 %v760_v9, %v759_v12  ;;  %v772_v45 = vsel %vm265_vm1, %v588_v32, 0.0  ;;  %v403_v9 = vsel %vm265_vm1, %v205_v6, 0.0  ;;  %v206_v12 = vld [vmem:[%s1009_s15 + $0x230] sm:$0xff] }
  0x7e   : > { %v601_v46 = vmul.f32 %v206_v12, %v206_v12 }
  0x7f   : > { %v374_v57 = vadd.f32 %v373_v47, %v372_v51  ;;  %v763_v24 = vadd.f32 %v762_v15, %v761_v18  ;;  %v774_v51 = vsel %vm265_vm1, %v589_v38, 0.0  ;;  %v405_v15 = vsel %vm265_vm1, %v206_v12, 0.0  ;;  %v207_v18 = vld [vmem:[%s1009_s15 + $0x238] sm:$0xff] }
  0x80   : > { %v602_v52 = vmul.f32 %v207_v18, %v207_v18 }
  0x81   : > { %v376_v63 = vadd.f32 %v375_v53, %v374_v57  ;;  %v765_v30 = vadd.f32 %v764_v21, %v763_v24  ;;  %v776_v57 = vsel %vm265_vm1, %v590_v44, 0.0  ;;  %v407_v21 = vsel %vm265_vm1, %v207_v18, 0.0  ;;  %v208_v24 = vld [vmem:[%s1009_s15 + $0x240] sm:$0xff] }
  0x82   : > { %v603_v58 = vmul.f32 %v208_v24, %v208_v24 }
  0x83   : > { %v378_v5 = vadd.f32 %v377_v59, %v376_v63  ;;  %v767_v36 = vadd.f32 %v766_v27, %v765_v30  ;;  %v778_v63 = vsel %vm265_vm1, %v591_v50, 0.0  ;;  %v409_v27 = vsel %vm265_vm1, %v208_v24, 0.0  ;;  %v209_v30 = vld [vmem:[%s1009_s15 + $0x248] sm:$0xff] }
  0x84   : > { %v604_v0 = vmul.f32 %v209_v30, %v209_v30 }
  0x85   : > { %v380_v11 = vadd.f32 %v379_v1, %v378_v5  ;;  %v769_v42 = vadd.f32 %v768_v33, %v767_v36  ;;  %v780_v5 = vsel %vm265_vm1, %v592_v56, 0.0  ;;  %v411_v33 = vsel %vm265_vm1, %v209_v30, 0.0  ;;  %v210_v36 = vld [vmem:[%s1009_s15 + $0x250] sm:$0xff] }
  0x86   : > { %v605_v6 = vmul.f32 %v210_v36, %v210_v36 }
  0x87   : > { %v382_v17 = vadd.f32 %v381_v7, %v380_v11  ;;  %v771_v48 = vadd.f32 %v770_v39, %v769_v42  ;;  %v782_v11 = vsel %vm265_vm1, %v593_v62, 0.0  ;;  %v413_v39 = vsel %vm265_vm1, %v210_v36, 0.0  ;;  %v211_v42 = vld [vmem:[%s1009_s15 + $0x258] sm:$0xff] }
  0x88   : > { %v606_v12 = vmul.f32 %v211_v42, %v211_v42 }
  0x89   : > { %v384_v23 = vadd.f32 %v383_v13, %v382_v17  ;;  %v773_v54 = vadd.f32 %v772_v45, %v771_v48  ;;  %v784_v17 = vsel %vm265_vm1, %v594_v4, 0.0  ;;  %v415_v45 = vsel %vm265_vm1, %v211_v42, 0.0  ;;  %v212_v48 = vld [vmem:[%s1009_s15 + $0x260] sm:$0xff] }
  0x8a   : > { %v607_v18 = vmul.f32 %v212_v48, %v212_v48 }
  0x8b   : > { %v386_v29 = vadd.f32 %v385_v19, %v384_v23  ;;  %v775_v60 = vadd.f32 %v774_v51, %v773_v54  ;;  %v786_v23 = vsel %vm265_vm1, %v595_v10, 0.0  ;;  %v417_v51 = vsel %vm265_vm1, %v212_v48, 0.0  ;;  %v213_v54 = vld [vmem:[%s1009_s15 + $0x268] sm:$0xff] }
  0x8c   : > { %v608_v24 = vmul.f32 %v213_v54, %v213_v54 }
  0x8d   : > { %v388_v35 = vadd.f32 %v387_v25, %v386_v29  ;;  %v777_v2 = vadd.f32 %v776_v57, %v775_v60  ;;  %v788_v29 = vsel %vm265_vm1, %v596_v16, 0.0  ;;  %v419_v57 = vsel %vm265_vm1, %v213_v54, 0.0  ;;  %v214_v60 = vld [vmem:[%s1009_s15 + $0x270] sm:$0xff] }
  0x8e   : > { %v609_v30 = vmul.f32 %v214_v60, %v214_v60 }
  0x8f   : > { %v390_v41 = vadd.f32 %v389_v31, %v388_v35  ;;  %v779_v8 = vadd.f32 %v778_v63, %v777_v2  ;;  %v790_v35 = vsel %vm265_vm1, %v597_v22, 0.0  ;;  %v421_v63 = vsel %vm265_vm1, %v214_v60, 0.0  ;;  %v215_v2 = vld [vmem:[%s1009_s15 + $0x278] sm:$0xff] }
  0x90   : > { %v610_v36 = vmul.f32 %v215_v2, %v215_v2 }
  0x91   : > { %v392_v47 = vadd.f32 %v391_v37, %v390_v41  ;;  %v781_v14 = vadd.f32 %v780_v5, %v779_v8  ;;  %v792_v41 = vsel %vm265_vm1, %v598_v28, 0.0  ;;  %v423_v5 = vsel %vm265_vm1, %v215_v2, 0.0  ;;  %v216_v8 = vld [vmem:[%s1009_s15 + $0x280] sm:$0xff] }
  0x92   : > { %v611_v42 = vmul.f32 %v216_v8, %v216_v8 }
  0x93   : > { %v394_v53 = vadd.f32 %v393_v43, %v392_v47  ;;  %v783_v20 = vadd.f32 %v782_v11, %v781_v14  ;;  %v794_v47 = vsel %vm265_vm1, %v599_v34, 0.0  ;;  %v425_v11 = vsel %vm265_vm1, %v216_v8, 0.0  ;;  %v217_v14 = vld [vmem:[%s1009_s15 + $0x288] sm:$0xff] }
  0x94   : > { %v612_v48 = vmul.f32 %v217_v14, %v217_v14 }
  0x95   : > { %v396_v59 = vadd.f32 %v395_v49, %v394_v53  ;;  %v785_v26 = vadd.f32 %v784_v17, %v783_v20  ;;  %v796_v53 = vsel %vm265_vm1, %v600_v40, 0.0  ;;  %v427_v17 = vsel %vm265_vm1, %v217_v14, 0.0  ;;  %v218_v20 = vld [vmem:[%s1009_s15 + $0x290] sm:$0xff] }
  0x96   : > { %v613_v54 = vmul.f32 %v218_v20, %v218_v20 }
  0x97   : > { %v398_v1 = vadd.f32 %v397_v55, %v396_v59  ;;  %v787_v32 = vadd.f32 %v786_v23, %v785_v26  ;;  %v798_v59 = vsel %vm265_vm1, %v601_v46, 0.0  ;;  %v429_v23 = vsel %vm265_vm1, %v218_v20, 0.0  ;;  %v219_v26 = vld [vmem:[%s1009_s15 + $0x298] sm:$0xff] }
  0x98   : > { %v614_v60 = vmul.f32 %v219_v26, %v219_v26 }
  0x99   : > { %v400_v7 = vadd.f32 %v399_v61, %v398_v1  ;;  %v789_v38 = vadd.f32 %v788_v29, %v787_v32  ;;  %v800_v1 = vsel %vm265_vm1, %v602_v52, 0.0  ;;  %v431_v29 = vsel %vm265_vm1, %v219_v26, 0.0  ;;  %v220_v32 = vld [vmem:[%s1009_s15 + $0x2a0] sm:$0xff] }
  0x9a   : > { %v615_v2 = vmul.f32 %v220_v32, %v220_v32 }
  0x9b   : > { %v402_v13 = vadd.f32 %v401_v3, %v400_v7  ;;  %v791_v44 = vadd.f32 %v790_v35, %v789_v38  ;;  %v802_v7 = vsel %vm265_vm1, %v603_v58, 0.0  ;;  %v433_v35 = vsel %vm265_vm1, %v220_v32, 0.0  ;;  %v221_v38 = vld [vmem:[%s1009_s15 + $0x2a8] sm:$0xff] }
  0x9c   : > { %v616_v8 = vmul.f32 %v221_v38, %v221_v38 }
  0x9d   : > { %v404_v19 = vadd.f32 %v403_v9, %v402_v13  ;;  %v793_v50 = vadd.f32 %v792_v41, %v791_v44  ;;  %v804_v13 = vsel %vm265_vm1, %v604_v0, 0.0  ;;  %v435_v41 = vsel %vm265_vm1, %v221_v38, 0.0  ;;  %v222_v44 = vld [vmem:[%s1009_s15 + $0x2b0] sm:$0xff] }
  0x9e   : > { %v617_v14 = vmul.f32 %v222_v44, %v222_v44 }
  0x9f   : > { %v406_v25 = vadd.f32 %v405_v15, %v404_v19  ;;  %v795_v56 = vadd.f32 %v794_v47, %v793_v50  ;;  %v806_v19 = vsel %vm265_vm1, %v605_v6, 0.0  ;;  %v437_v47 = vsel %vm265_vm1, %v222_v44, 0.0  ;;  %v223_v50 = vld [vmem:[%s1009_s15 + $0x2b8] sm:$0xff] }
  0xa0   : > { %v618_v20 = vmul.f32 %v223_v50, %v223_v50 }
  0xa1   : > { %v408_v31 = vadd.f32 %v407_v21, %v406_v25  ;;  %v797_v62 = vadd.f32 %v796_v53, %v795_v56  ;;  %v808_v25 = vsel %vm265_vm1, %v606_v12, 0.0  ;;  %v439_v53 = vsel %vm265_vm1, %v223_v50, 0.0  ;;  %v224_v56 = vld [vmem:[%s1009_s15 + $0x2c0] sm:$0xff] }
  0xa2   : > { %v619_v26 = vmul.f32 %v224_v56, %v224_v56 }
  0xa3   : > { %v410_v37 = vadd.f32 %v409_v27, %v408_v31  ;;  %v799_v4 = vadd.f32 %v798_v59, %v797_v62  ;;  %v810_v31 = vsel %vm265_vm1, %v607_v18, 0.0  ;;  %v441_v59 = vsel %vm265_vm1, %v224_v56, 0.0  ;;  %v225_v62 = vld [vmem:[%s1009_s15 + $0x2c8] sm:$0xff] }
  0xa4   : > { %v620_v32 = vmul.f32 %v225_v62, %v225_v62 }
  0xa5   : > { %v412_v43 = vadd.f32 %v411_v33, %v410_v37  ;;  %v801_v10 = vadd.f32 %v800_v1, %v799_v4  ;;  %v812_v37 = vsel %vm265_vm1, %v608_v24, 0.0  ;;  %v443_v1 = vsel %vm265_vm1, %v225_v62, 0.0  ;;  %v226_v4 = vld [vmem:[%s1009_s15 + $0x2d0] sm:$0xff] }
  0xa6   : > { %v621_v38 = vmul.f32 %v226_v4, %v226_v4 }
  0xa7   : > { %v414_v49 = vadd.f32 %v413_v39, %v412_v43  ;;  %v803_v16 = vadd.f32 %v802_v7, %v801_v10  ;;  %v814_v43 = vsel %vm265_vm1, %v609_v30, 0.0  ;;  %v445_v7 = vsel %vm265_vm1, %v226_v4, 0.0  ;;  %v227_v10 = vld [vmem:[%s1009_s15 + $0x2d8] sm:$0xff] }
  0xa8   : > { %v622_v44 = vmul.f32 %v227_v10, %v227_v10 }
  0xa9   : > { %v416_v55 = vadd.f32 %v415_v45, %v414_v49  ;;  %v805_v22 = vadd.f32 %v804_v13, %v803_v16  ;;  %v816_v49 = vsel %vm265_vm1, %v610_v36, 0.0  ;;  %v447_v13 = vsel %vm265_vm1, %v227_v10, 0.0  ;;  %v228_v16 = vld [vmem:[%s1009_s15 + $0x2e0] sm:$0xff] }
  0xaa   : > { %v623_v50 = vmul.f32 %v228_v16, %v228_v16 }
  0xab   : > { %v418_v61 = vadd.f32 %v417_v51, %v416_v55  ;;  %v807_v28 = vadd.f32 %v806_v19, %v805_v22  ;;  %v818_v55 = vsel %vm265_vm1, %v611_v42, 0.0  ;;  %v449_v19 = vsel %vm265_vm1, %v228_v16, 0.0  ;;  %v229_v22 = vld [vmem:[%s1009_s15 + $0x2e8] sm:$0xff] }
  0xac   : > { %v624_v56 = vmul.f32 %v229_v22, %v229_v22 }
  0xad   : > { %v420_v3 = vadd.f32 %v419_v57, %v418_v61  ;;  %v809_v34 = vadd.f32 %v808_v25, %v807_v28  ;;  %v820_v61 = vsel %vm265_vm1, %v612_v48, 0.0  ;;  %v451_v25 = vsel %vm265_vm1, %v229_v22, 0.0  ;;  %v230_v28 = vld [vmem:[%s1009_s15 + $0x2f0] sm:$0xff] }
  0xae   : > { %v625_v62 = vmul.f32 %v230_v28, %v230_v28 }
  0xaf   : > { %v422_v9 = vadd.f32 %v421_v63, %v420_v3  ;;  %v811_v40 = vadd.f32 %v810_v31, %v809_v34  ;;  %v822_v3 = vsel %vm265_vm1, %v613_v54, 0.0  ;;  %v453_v31 = vsel %vm265_vm1, %v230_v28, 0.0  ;;  %v231_v34 = vld [vmem:[%s1009_s15 + $0x2f8] sm:$0xff] }
  0xb0   : > { %v626_v4 = vmul.f32 %v231_v34, %v231_v34 }
  0xb1   : > { %v424_v15 = vadd.f32 %v423_v5, %v422_v9  ;;  %v813_v46 = vadd.f32 %v812_v37, %v811_v40  ;;  %v824_v9 = vsel %vm265_vm1, %v614_v60, 0.0  ;;  %v455_v37 = vsel %vm265_vm1, %v231_v34, 0.0  ;;  %v232_v40 = vld [vmem:[%s1009_s15 + $0x300] sm:$0xff] }
  0xb2   : > { %v627_v10 = vmul.f32 %v232_v40, %v232_v40 }
  0xb3   : > { %v426_v21 = vadd.f32 %v425_v11, %v424_v15  ;;  %v815_v52 = vadd.f32 %v814_v43, %v813_v46  ;;  %v826_v15 = vsel %vm265_vm1, %v615_v2, 0.0  ;;  %v457_v43 = vsel %vm265_vm1, %v232_v40, 0.0  ;;  %v233_v46 = vld [vmem:[%s1009_s15 + $0x308] sm:$0xff] }
  0xb4   : > { %v628_v16 = vmul.f32 %v233_v46, %v233_v46 }
  0xb5   : > { %v428_v27 = vadd.f32 %v427_v17, %v426_v21  ;;  %v817_v58 = vadd.f32 %v816_v49, %v815_v52  ;;  %v828_v21 = vsel %vm265_vm1, %v616_v8, 0.0  ;;  %v459_v49 = vsel %vm265_vm1, %v233_v46, 0.0  ;;  %v234_v52 = vld [vmem:[%s1009_s15 + $0x310] sm:$0xff] }
  0xb6   : > { %v629_v22 = vmul.f32 %v234_v52, %v234_v52 }
  0xb7   : > { %v430_v33 = vadd.f32 %v429_v23, %v428_v27  ;;  %v819_v0 = vadd.f32 %v818_v55, %v817_v58  ;;  %v830_v27 = vsel %vm265_vm1, %v617_v14, 0.0  ;;  %v461_v55 = vsel %vm265_vm1, %v234_v52, 0.0  ;;  %v235_v58 = vld [vmem:[%s1009_s15 + $0x318] sm:$0xff] }
  0xb8   : > { %v630_v28 = vmul.f32 %v235_v58, %v235_v58 }
  0xb9   : > { %v432_v39 = vadd.f32 %v431_v29, %v430_v33  ;;  %v821_v6 = vadd.f32 %v820_v61, %v819_v0  ;;  %v832_v33 = vsel %vm265_vm1, %v618_v20, 0.0  ;;  %v463_v61 = vsel %vm265_vm1, %v235_v58, 0.0  ;;  %v236_v0 = vld [vmem:[%s1009_s15 + $0x320] sm:$0xff] }
  0xba   : > { %v631_v34 = vmul.f32 %v236_v0, %v236_v0 }
  0xbb   : > { %v434_v45 = vadd.f32 %v433_v35, %v432_v39  ;;  %v823_v12 = vadd.f32 %v822_v3, %v821_v6  ;;  %v834_v39 = vsel %vm265_vm1, %v619_v26, 0.0  ;;  %v465_v3 = vsel %vm265_vm1, %v236_v0, 0.0  ;;  %v237_v6 = vld [vmem:[%s1009_s15 + $0x328] sm:$0xff] }
  0xbc   : > { %v632_v40 = vmul.f32 %v237_v6, %v237_v6 }
  0xbd   : > { %v436_v51 = vadd.f32 %v435_v41, %v434_v45  ;;  %v825_v18 = vadd.f32 %v824_v9, %v823_v12  ;;  %v836_v45 = vsel %vm265_vm1, %v620_v32, 0.0  ;;  %v467_v9 = vsel %vm265_vm1, %v237_v6, 0.0  ;;  %v238_v12 = vld [vmem:[%s1009_s15 + $0x330] sm:$0xff] }
  0xbe   : > { %v633_v46 = vmul.f32 %v238_v12, %v238_v12 }
  0xbf   : > { %v438_v57 = vadd.f32 %v437_v47, %v436_v51  ;;  %v827_v24 = vadd.f32 %v826_v15, %v825_v18  ;;  %v838_v51 = vsel %vm265_vm1, %v621_v38, 0.0  ;;  %v469_v15 = vsel %vm265_vm1, %v238_v12, 0.0  ;;  %v239_v18 = vld [vmem:[%s1009_s15 + $0x338] sm:$0xff] }
  0xc0   : > { %v634_v52 = vmul.f32 %v239_v18, %v239_v18 }
  0xc1   : > { %v440_v63 = vadd.f32 %v439_v53, %v438_v57  ;;  %v829_v30 = vadd.f32 %v828_v21, %v827_v24  ;;  %v840_v57 = vsel %vm265_vm1, %v622_v44, 0.0  ;;  %v471_v21 = vsel %vm265_vm1, %v239_v18, 0.0  ;;  %v240_v24 = vld [vmem:[%s1009_s15 + $0x340] sm:$0xff] }
  0xc2   : > { %v635_v58 = vmul.f32 %v240_v24, %v240_v24 }
  0xc3   : > { %v442_v5 = vadd.f32 %v441_v59, %v440_v63  ;;  %v831_v36 = vadd.f32 %v830_v27, %v829_v30  ;;  %v842_v63 = vsel %vm265_vm1, %v623_v50, 0.0  ;;  %v473_v27 = vsel %vm265_vm1, %v240_v24, 0.0  ;;  %v241_v30 = vld [vmem:[%s1009_s15 + $0x348] sm:$0xff] }
  0xc4   : > { %v636_v0 = vmul.f32 %v241_v30, %v241_v30 }
  0xc5   : > { %v444_v11 = vadd.f32 %v443_v1, %v442_v5  ;;  %v833_v42 = vadd.f32 %v832_v33, %v831_v36  ;;  %v844_v5 = vsel %vm265_vm1, %v624_v56, 0.0  ;;  %v475_v33 = vsel %vm265_vm1, %v241_v30, 0.0  ;;  %v242_v36 = vld [vmem:[%s1009_s15 + $0x350] sm:$0xff] }
  0xc6   : > { %v637_v6 = vmul.f32 %v242_v36, %v242_v36 }
  0xc7   : > { %v446_v17 = vadd.f32 %v445_v7, %v444_v11  ;;  %v835_v48 = vadd.f32 %v834_v39, %v833_v42  ;;  %v846_v11 = vsel %vm265_vm1, %v625_v62, 0.0  ;;  %v477_v39 = vsel %vm265_vm1, %v242_v36, 0.0  ;;  %v243_v42 = vld [vmem:[%s1009_s15 + $0x358] sm:$0xff] }
  0xc8   : > { %v638_v12 = vmul.f32 %v243_v42, %v243_v42 }
  0xc9   : > { %v448_v23 = vadd.f32 %v447_v13, %v446_v17  ;;  %v837_v54 = vadd.f32 %v836_v45, %v835_v48  ;;  %v848_v17 = vsel %vm265_vm1, %v626_v4, 0.0  ;;  %v479_v45 = vsel %vm265_vm1, %v243_v42, 0.0  ;;  %v244_v48 = vld [vmem:[%s1009_s15 + $0x360] sm:$0xff] }
  0xca   : > { %v639_v18 = vmul.f32 %v244_v48, %v244_v48 }
  0xcb   : > { %v450_v29 = vadd.f32 %v449_v19, %v448_v23  ;;  %v839_v60 = vadd.f32 %v838_v51, %v837_v54  ;;  %v850_v23 = vsel %vm265_vm1, %v627_v10, 0.0  ;;  %v481_v51 = vsel %vm265_vm1, %v244_v48, 0.0  ;;  %v245_v54 = vld [vmem:[%s1009_s15 + $0x368] sm:$0xff] }
  0xcc   : > { %v640_v24 = vmul.f32 %v245_v54, %v245_v54 }
  0xcd   : > { %v452_v35 = vadd.f32 %v451_v25, %v450_v29  ;;  %v841_v2 = vadd.f32 %v840_v57, %v839_v60  ;;  %v852_v29 = vsel %vm265_vm1, %v628_v16, 0.0  ;;  %v483_v57 = vsel %vm265_vm1, %v245_v54, 0.0  ;;  %v246_v60 = vld [vmem:[%s1009_s15 + $0x370] sm:$0xff] }
  0xce   : > { %v641_v30 = vmul.f32 %v246_v60, %v246_v60 }
  0xcf   : > { %v454_v41 = vadd.f32 %v453_v31, %v452_v35  ;;  %v843_v8 = vadd.f32 %v842_v63, %v841_v2  ;;  %v854_v35 = vsel %vm265_vm1, %v629_v22, 0.0  ;;  %v485_v63 = vsel %vm265_vm1, %v246_v60, 0.0  ;;  %v247_v2 = vld [vmem:[%s1009_s15 + $0x378] sm:$0xff] }
  0xd0   : > { %v642_v36 = vmul.f32 %v247_v2, %v247_v2 }
  0xd1   : > { %v456_v47 = vadd.f32 %v455_v37, %v454_v41  ;;  %v845_v14 = vadd.f32 %v844_v5, %v843_v8  ;;  %v856_v41 = vsel %vm265_vm1, %v630_v28, 0.0  ;;  %v487_v5 = vsel %vm265_vm1, %v247_v2, 0.0  ;;  %v248_v8 = vld [vmem:[%s1009_s15 + $0x380] sm:$0xff] }
  0xd2   : > { %v643_v42 = vmul.f32 %v248_v8, %v248_v8 }
  0xd3   : > { %v458_v53 = vadd.f32 %v457_v43, %v456_v47  ;;  %v847_v20 = vadd.f32 %v846_v11, %v845_v14  ;;  %v858_v47 = vsel %vm265_vm1, %v631_v34, 0.0  ;;  %v489_v11 = vsel %vm265_vm1, %v248_v8, 0.0  ;;  %v249_v14 = vld [vmem:[%s1009_s15 + $0x388] sm:$0xff] }
  0xd4   : > { %v644_v48 = vmul.f32 %v249_v14, %v249_v14 }
  0xd5   : > { %v460_v59 = vadd.f32 %v459_v49, %v458_v53  ;;  %v849_v26 = vadd.f32 %v848_v17, %v847_v20  ;;  %v860_v53 = vsel %vm265_vm1, %v632_v40, 0.0  ;;  %v491_v17 = vsel %vm265_vm1, %v249_v14, 0.0  ;;  %v250_v20 = vld [vmem:[%s1009_s15 + $0x390] sm:$0xff] }
  0xd6   : > { %v645_v54 = vmul.f32 %v250_v20, %v250_v20 }
  0xd7   : > { %v462_v1 = vadd.f32 %v461_v55, %v460_v59  ;;  %v851_v32 = vadd.f32 %v850_v23, %v849_v26  ;;  %v862_v59 = vsel %vm265_vm1, %v633_v46, 0.0  ;;  %v493_v23 = vsel %vm265_vm1, %v250_v20, 0.0  ;;  %v251_v26 = vld [vmem:[%s1009_s15 + $0x398] sm:$0xff] }
  0xd8   : > { %v646_v60 = vmul.f32 %v251_v26, %v251_v26 }
  0xd9   : > { %v464_v7 = vadd.f32 %v463_v61, %v462_v1  ;;  %v853_v38 = vadd.f32 %v852_v29, %v851_v32  ;;  %v864_v1 = vsel %vm265_vm1, %v634_v52, 0.0  ;;  %v495_v29 = vsel %vm265_vm1, %v251_v26, 0.0  ;;  %v252_v32 = vld [vmem:[%s1009_s15 + $0x3a0] sm:$0xff] }
  0xda   : > { %v647_v2 = vmul.f32 %v252_v32, %v252_v32 }
  0xdb   : > { %v466_v13 = vadd.f32 %v465_v3, %v464_v7  ;;  %v855_v44 = vadd.f32 %v854_v35, %v853_v38  ;;  %v866_v7 = vsel %vm265_vm1, %v635_v58, 0.0  ;;  %v497_v35 = vsel %vm265_vm1, %v252_v32, 0.0  ;;  %v253_v38 = vld [vmem:[%s1009_s15 + $0x3a8] sm:$0xff] }
  0xdc   : > { %v648_v8 = vmul.f32 %v253_v38, %v253_v38 }
  0xdd   : > { %v468_v19 = vadd.f32 %v467_v9, %v466_v13  ;;  %v857_v50 = vadd.f32 %v856_v41, %v855_v44  ;;  %v868_v13 = vsel %vm265_vm1, %v636_v0, 0.0  ;;  %v499_v41 = vsel %vm265_vm1, %v253_v38, 0.0  ;;  %v254_v44 = vld [vmem:[%s1009_s15 + $0x3b0] sm:$0xff] }
  0xde   : > { %v649_v14 = vmul.f32 %v254_v44, %v254_v44 }
  0xdf   : > { %v470_v25 = vadd.f32 %v469_v15, %v468_v19  ;;  %v859_v56 = vadd.f32 %v858_v47, %v857_v50  ;;  %v870_v19 = vsel %vm265_vm1, %v637_v6, 0.0  ;;  %v501_v47 = vsel %vm265_vm1, %v254_v44, 0.0  ;;  %v255_v50 = vld [vmem:[%s1009_s15 + $0x3b8] sm:$0xff] }
  0xe0   : > { %v650_v20 = vmul.f32 %v255_v50, %v255_v50 }
  0xe1   : > { %v472_v31 = vadd.f32 %v471_v21, %v470_v25  ;;  %v861_v62 = vadd.f32 %v860_v53, %v859_v56  ;;  %v872_v25 = vsel %vm265_vm1, %v638_v12, 0.0  ;;  %v503_v53 = vsel %vm265_vm1, %v255_v50, 0.0  ;;  %v256_v56 = vld [vmem:[%s1009_s15 + $0x3c0] sm:$0xff] }
  0xe2   : > { %v651_v26 = vmul.f32 %v256_v56, %v256_v56 }
  0xe3   : > { %v474_v37 = vadd.f32 %v473_v27, %v472_v31  ;;  %v863_v4 = vadd.f32 %v862_v59, %v861_v62  ;;  %v874_v31 = vsel %vm265_vm1, %v639_v18, 0.0  ;;  %v505_v59 = vsel %vm265_vm1, %v256_v56, 0.0  ;;  %v257_v62 = vld [vmem:[%s1009_s15 + $0x3c8] sm:$0xff] }
  0xe4   : > { %v652_v32 = vmul.f32 %v257_v62, %v257_v62 }
  0xe5   : > { %v476_v43 = vadd.f32 %v475_v33, %v474_v37  ;;  %v865_v10 = vadd.f32 %v864_v1, %v863_v4  ;;  %v876_v37 = vsel %vm265_vm1, %v640_v24, 0.0  ;;  %v507_v1 = vsel %vm265_vm1, %v257_v62, 0.0  ;;  %v258_v4 = vld [vmem:[%s1009_s15 + $0x3d0] sm:$0xff] }
  0xe6   : > { %v653_v38 = vmul.f32 %v258_v4, %v258_v4 }
  0xe7   : > { %v478_v49 = vadd.f32 %v477_v39, %v476_v43  ;;  %v867_v16 = vadd.f32 %v866_v7, %v865_v10  ;;  %v878_v43 = vsel %vm265_vm1, %v641_v30, 0.0  ;;  %v509_v7 = vsel %vm265_vm1, %v258_v4, 0.0  ;;  %v259_v10 = vld [vmem:[%s1009_s15 + $0x3d8] sm:$0xff] }
  0xe9   : > { %v480_v55 = vadd.f32 %v479_v45, %v478_v49  ;;  %v869_v22 = vadd.f32 %v868_v13, %v867_v16  ;;  %v880_v49 = vsel %vm265_vm1, %v642_v36, 0.0  ;;  %v511_v13 = vsel %vm265_vm1, %v259_v10, 0.0  ;;  %v260_v16 = vld [vmem:[%s1009_s15 + $0x3e0] sm:$0xff] }
  0xeb   : > { %v482_v61 = vadd.f32 %v481_v51, %v480_v55  ;;  %v871_v28 = vadd.f32 %v870_v19, %v869_v22  ;;  %v882_v55 = vsel %vm265_vm1, %v643_v42, 0.0  ;;  %v513_v19 = vsel %vm265_vm1, %v260_v16, 0.0  ;;  %v261_v22 = vld [vmem:[%s1009_s15 + $0x3e8] sm:$0xff] }
  0xec   : > { %v654_v42 = vmul.f32 %v259_v10, %v259_v10  ;;  %v656_v50 = vmul.f32 %v261_v22, %v261_v22 }
  0xed   : > { %v484_v3 = vadd.f32 %v483_v57, %v482_v61  ;;  %v873_v34 = vadd.f32 %v872_v25, %v871_v28  ;;  %v884_v61 = vsel %vm265_vm1, %v644_v48, 0.0  ;;  %v515_v25 = vsel %vm265_vm1, %v261_v22, 0.0  ;;  %v262_v28 = vld [vmem:[%s1009_s15 + $0x3f0] sm:$0xff] }
  0xef   : > { %v486_v9 = vadd.f32 %v485_v63, %v484_v3  ;;  %v875_v40 = vadd.f32 %v874_v31, %v873_v34  ;;  %v886_v3 = vsel %vm265_vm1, %v645_v54, 0.0  ;;  %v517_v31 = vsel %vm265_vm1, %v262_v28, 0.0  ;;  %v263_v34 = vld [vmem:[%s1009_s15 + $0x3f8] sm:$0xff] }
  0xf0   : > { %v657_v54 = vmul.f32 %v262_v28, %v262_v28 }
  0xf1   : > { %v488_v15 = vadd.f32 %v487_v5, %v486_v9  ;;  %v877_v46 = vadd.f32 %v876_v37, %v875_v40  ;;  %v888_v9 = vsel %vm265_vm1, %v646_v60, 0.0  ;;  %v519_v37 = vsel %vm265_vm1, %v263_v34, 0.0 }
  0xf2   : > { %v910_v62 = vsel %vm265_vm1, %v657_v54, 0.0 }
  0xf3   : > { %v490_v21 = vadd.f32 %v489_v11, %v488_v15  ;;  %v879_v52 = vadd.f32 %v878_v43, %v877_v46  ;;  %v890_v15 = vsel %vm265_vm1, %v647_v2, 0.0  ;;  %v900_v43 = vsel %vm265_vm1, %v652_v32, 0.0 }
  0xf4   : > { %v655_v46 = vmul.f32 %v260_v16, %v260_v16 }
  0xf5   : > { %v492_v27 = vadd.f32 %v491_v17, %v490_v21  ;;  %v881_v58 = vadd.f32 %v880_v49, %v879_v52  ;;  %v892_v21 = vsel %vm265_vm1, %v648_v8, 0.0 }
  0xf7   : > { %v494_v33 = vadd.f32 %v493_v23, %v492_v27  ;;  %v883_v0 = vadd.f32 %v882_v55, %v881_v58  ;;  %v894_v27 = vsel %vm265_vm1, %v649_v14, 0.0  ;;  %v906_v55 = vsel %vm265_vm1, %v655_v46, 0.0 }
  0xf8   : > { %v658_v58 = vmul.f32 %v263_v34, %v263_v34 }
  0xf9   : > { %v496_v39 = vadd.f32 %v495_v29, %v494_v33  ;;  %v885_v6 = vadd.f32 %v884_v61, %v883_v0  ;;  %v896_v33 = vsel %vm265_vm1, %v650_v20, 0.0 }
  0xfa   : > { %v912_v2 = vsel %vm265_vm1, %v658_v58, 0.0 }
  0xfb   : > { %v498_v45 = vadd.f32 %v497_v35, %v496_v39  ;;  %v887_v12 = vadd.f32 %v886_v3, %v885_v6  ;;  %v898_v39 = vsel %vm265_vm1, %v651_v26, 0.0 }
  0xfd   : > { %v500_v51 = vadd.f32 %v499_v41, %v498_v45  ;;  %v889_v18 = vadd.f32 %v888_v9, %v887_v12  ;;  %v530_v12 = vld [vmem:[%s1418_s2] sm:$0x1] }
  0xff   : > { %v502_v57 = vadd.f32 %v501_v47, %v500_v51  ;;  %v891_v24 = vadd.f32 %v890_v15, %v889_v18  ;;  %v902_v47 = vsel %vm265_vm1, %v653_v38, 0.0  ;;  %v904_v51 = vsel %vm265_vm1, %v654_v42, 0.0 }
 0x101   : > { %v504_v63 = vadd.f32 %v503_v53, %v502_v57  ;;  %v893_v30 = vadd.f32 %v892_v21, %v891_v24 }
 0x103   : > { %v506_v5 = vadd.f32 %v505_v59, %v504_v63  ;;  %v895_v36 = vadd.f32 %v894_v27, %v893_v30  ;;  %v908_v59 = vsel %vm265_vm1, %v656_v50, 0.0 }
 0x105   : > { %v508_v11 = vadd.f32 %v507_v1, %v506_v5  ;;  %v897_v41 = vadd.f32 %v896_v33, %v895_v36  ;;  %v264_v1 = vld [vmem:[%s1417_s1] sm:$0x1] }
 0x107   : > { %v510_v17 = vadd.f32 %v509_v7, %v508_v11  ;;  %v899_v45 = vadd.f32 %v898_v39, %v897_v41 }
 0x109   : > { %v512_v23 = vadd.f32 %v511_v13, %v510_v17  ;;  %v901_v49 = vadd.f32 %v900_v43, %v899_v45 }
 0x10b   : > { %v514_v29 = vadd.f32 %v513_v19, %v512_v23  ;;  %v903_v53 = vadd.f32 %v902_v47, %v901_v49 }
 0x10d   : > { %v516_v35 = vadd.f32 %v515_v25, %v514_v29  ;;  %v905_v57 = vadd.f32 %v904_v51, %v903_v53 }
 0x10f   : > { %v518_v40 = vadd.f32 %v517_v31, %v516_v35  ;;  %v907_v61 = vadd.f32 %v906_v55, %v905_v57 }
 0x111   : > { %v520_v44 = vadd.f32 %v519_v37, %v518_v40  ;;  %v909_v0 = vadd.f32 %v908_v59, %v907_v61 }
 0x113   : > { %v521_v48 = vrot.slane %v520_v44, 4  ;;  %v911_v4 = vadd.f32 %v910_v62, %v909_v0 }
 0x115   : > { %v522_v52 = vadd.f32 %v521_v48, %v520_v44  ;;  %v913_v6 = vadd.f32 %v912_v2, %v911_v4 }
 0x117   : > { %v523_v56 = vrot.slane %v522_v52, 2  ;;  %v914_v7 = vrot.slane %v913_v6, 4 }
 0x119   : > { %v524_v60 = vadd.f32 %v523_v56, %v522_v52  ;;  %v915_v8 = vadd.f32 %v914_v7, %v913_v6 }
 0x11b   : > { %v525_v63 = vrot.slane %v524_v60, 1  ;;  %v916_v9 = vrot.slane %v915_v8, 2 }
 0x11d   : > { %v526_v3 = vadd.f32 %v525_v63, %v524_v60  ;;  %v917_v10 = vadd.f32 %v916_v9, %v915_v8 }
 0x11f   : > { %v527_v5 = vadd.f32 %v526_v3, %v264_v1  ;;  %v918_v11 = vrot.slane %v917_v10, 1 }
 0x121   : > { %529 = vst.msk [vmem:[%s1417_s1] sm:$0x1] %vm528_vm2, %v527_v5  ;;  %v919_v13 = vadd.f32 %v918_v11, %v917_v10 }
 0x123   : > { %v920_v14 = vadd.f32 %v919_v13, %v530_v12 }
 0x125   : > { %921 = vst.msk [vmem:[%s1418_s2] sm:$0x1] %vm528_vm2, %v920_v14 }
 0x126 PF: > { %s13_s9 = sadd.s32 1, %s980_s9  }
 0x127   : > { %p10_p5 = scmp.ge.s32.totalorder %s13_s9, 4  }
 0x129   :  { %12 = sbr.rel (!%p10_p5) target bundleno = 1 (0x1), region = 62 }

// kernel: generator_forward.45
= control target key start
LH: loop header
LB: loop body
LE: loop exit
PB: predicated region body
PF: predicated region fallthrough
CT: control target
= control target key end

     0   :  { %s800_s12 = smov 0   ;;  %s1471_s0 = inlined_call_operand.vmem [shape: f32[2048,8], index: 0, kind: input, shape index: {}]   ;;  %s1472_s1 = inlined_call_operand.vmem [shape: f32[1,8], index: 1, kind: input, shape index: {}]   ;;  %s1473_s2 = inlined_call_operand.vmem [shape: f32[1,8], index: 2, kind: input, shape index: {}]   ;;  %s1474_s3 = inlined_call_operand.vmem [shape: f32[2048,8], index: 3, kind: output, shape index: {}]  }
   0x1 LB: > { %s751_s13 = sadd.s32 4294967295, %s778_s12   ;;  %p755_p0 = scmp.ge.s32.totalorder %s778_s12, 1  ;;  %s778_s12 = sphi %s800_s12, %s13_s12  }
   0x2   : > { %p138_p1 = scmp.lt.s32.totalorder %s778_s12, 3 }
   0x4   : > { %p139_p2 = pnand %p755_p0, %p138_p1 }
   0x5   : > { %s756_s14 = sshll.u32 (!%p139_p2), %s751_s13, 7 }
   0x6   : > { %142 = sbr.rel (%p139_p2) target bundleno = 147 (0x93), region = 32  ;;  %p163_p3 = scmp.lt.s32.totalorder (!%p139_p2), %s756_s14, 255 }
   0xb   : > { %s1476_s14 = smov (!%p163_p3, %s756_s14), 255  ;;  %v811_v0 = vld [vmem:[%s1472_s1] ss:$0 sm:$0xff]  ;;  %vm566_vm0 = vcmask 64512  }
   0xc   : > { %s757_s17 = sshll.u32 %s1476_s14, 3  ;;  %v821_v1 = vld [vmem:[%s1473_s2] ss:$0 sm:$0xff] }
   0xd   : > { %s816_s20 = scalar_lea.vmem %s1471_s0, %s757_s17  ;;  %s835_s25 = scalar_lea.vmem %s1474_s3, %s757_s17 }
   0xe   : > { %v174_v2 = vld [vmem:[%s816_s20] sm:$0xff]  ;;  %v175_v3 = vld [vmem:[%s816_s20 + $0x8] sm:$0xff]  ;;  %v176_v4 = vld [vmem:[%s816_s20 + $0x10] sm:$0xff] }
   0xf   : > { %v306_v5 = vmul.f32 %v811_v0, %v174_v2  ;;  %v307_v6 = vmul.f32 %v811_v0, %v175_v3  ;;  %v308_v7 = vmul.f32 %v811_v0, %v176_v4  ;;  %v177_v8 = vld [vmem:[%s816_s20 + $0x18] sm:$0xff]  ;;  %v178_v9 = vld [vmem:[%s816_s20 + $0x20] sm:$0xff]  ;;  %v179_v10 = vld [vmem:[%s816_s20 + $0x28] sm:$0xff] }
  0x10   : > { %v309_v11 = vmul.f32 %v811_v0, %v177_v8  ;;  %v310_v12 = vmul.f32 %v811_v0, %v178_v9  ;;  %v311_v13 = vmul.f32 %v811_v0, %v179_v10  ;;  %v180_v14 = vld [vmem:[%s816_s20 + $0x30] sm:$0xff]  ;;  %v181_v15 = vld [vmem:[%s816_s20 + $0x38] sm:$0xff]  ;;  %v182_v16 = vld [vmem:[%s816_s20 + $0x40] sm:$0xff] }
  0x11   : > { %v438_v17 = vadd.f32 %v821_v1, %v306_v5  ;;  %v439_v18 = vadd.f32 %v821_v1, %v307_v6  ;;  %v440_v19 = vadd.f32 %v821_v1, %v308_v7  ;;  %v312_v20 = vmul.f32 %v811_v0, %v180_v14  ;;  %v183_v21 = vld [vmem:[%s816_s20 + $0x48] sm:$0xff]  ;;  %v184_v24 = vld [vmem:[%s816_s20 + $0x50] sm:$0xff]  ;;  %v185_v27 = vld [vmem:[%s816_s20 + $0x58] sm:$0xff] }
  0x12   : > { %v441_v22 = vadd.f32 %v821_v1, %v309_v11  ;;  %v313_v23 = vmul.f32 %v811_v0, %v181_v15  ;;  %v442_v25 = vadd.f32 %v821_v1, %v310_v12  ;;  %v314_v26 = vmul.f32 %v811_v0, %v182_v16  ;;  %v186_v30 = vld [vmem:[%s816_s20 + $0x60] sm:$0xff]  ;;  %v187_v33 = vld [vmem:[%s816_s20 + $0x68] sm:$0xff]  ;;  %v188_v36 = vld [vmem:[%s816_s20 + $0x70] sm:$0xff] }
  0x13   : > { %567 = vst.msk [vmem:[%s835_s25] sm:$0xff] %vm566_vm0, %v438_v17  ;;  %v443_v28 = vadd.f32 %v821_v1, %v311_v13  ;;  %v315_v29 = vmul.f32 %v811_v0, %v183_v21  ;;  %v444_v31 = vadd.f32 %v821_v1, %v312_v20  ;;  %v316_v32 = vmul.f32 %v811_v0, %v184_v24  ;;  %v189_v39 = vld [vmem:[%s816_s20 + $0x78] sm:$0xff]  ;;  %v190_v42 = vld [vmem:[%s816_s20 + $0x80] sm:$0xff]  ;;  %v191_v45 = vld [vmem:[%s816_s20 + $0x88] sm:$0xff] }
  0x14   : > { %568 = vst.msk [vmem:[%s835_s25 + $0x8] sm:$0xff] %vm566_vm0, %v439_v18  ;;  %v445_v34 = vadd.f32 %v821_v1, %v313_v23  ;;  %v317_v35 = vmul.f32 %v811_v0, %v185_v27  ;;  %v446_v37 = vadd.f32 %v821_v1, %v314_v26  ;;  %v318_v38 = vmul.f32 %v811_v0, %v186_v30  ;;  %v192_v48 = vld [vmem:[%s816_s20 + $0x90] sm:$0xff]  ;;  %v193_v51 = vld [vmem:[%s816_s20 + $0x98] sm:$0xff]  ;;  %v194_v54 = vld [vmem:[%s816_s20 + $0xa0] sm:$0xff] }
  0x15   : > { %569 = vst.msk [vmem:[%s835_s25 + $0x10] sm:$0xff] %vm566_vm0, %v440_v19  ;;  %v447_v40 = vadd.f32 %v821_v1, %v315_v29  ;;  %v319_v41 = vmul.f32 %v811_v0, %v187_v33  ;;  %v448_v43 = vadd.f32 %v821_v1, %v316_v32  ;;  %v320_v44 = vmul.f32 %v811_v0, %v188_v36  ;;  %v195_v57 = vld [vmem:[%s816_s20 + $0xa8] sm:$0xff]  ;;  %v196_v60 = vld [vmem:[%s816_s20 + $0xb0] sm:$0xff]  ;;  %v197_v63 = vld [vmem:[%s816_s20 + $0xb8] sm:$0xff] }
  0x16   : > { %570 = vst.msk [vmem:[%s835_s25 + $0x18] sm:$0xff] %vm566_vm0, %v441_v22  ;;  %v449_v46 = vadd.f32 %v821_v1, %v317_v35  ;;  %v321_v47 = vmul.f32 %v811_v0, %v189_v39  ;;  %v450_v49 = vadd.f32 %v821_v1, %v318_v38  ;;  %v322_v50 = vmul.f32 %v811_v0, %v190_v42  ;;  %v198_v4 = vld [vmem:[%s816_s20 + $0xc0] sm:$0xff]  ;;  %v199_v7 = vld [vmem:[%s816_s20 + $0xc8] sm:$0xff]  ;;  %v200_v10 = vld [vmem:[%s816_s20 + $0xd0] sm:$0xff] }
  0x17   : > { %571 = vst.msk [vmem:[%s835_s25 + $0x20] sm:$0xff] %vm566_vm0, %v442_v25  ;;  %v451_v52 = vadd.f32 %v821_v1, %v319_v41  ;;  %v323_v53 = vmul.f32 %v811_v0, %v191_v45  ;;  %v452_v55 = vadd.f32 %v821_v1, %v320_v44  ;;  %v324_v56 = vmul.f32 %v811_v0, %v192_v48  ;;  %v201_v13 = vld [vmem:[%s816_s20 + $0xd8] sm:$0xff]  ;;  %v202_v16 = vld [vmem:[%s816_s20 + $0xe0] sm:$0xff]  ;;  %v203_v19 = vld [vmem:[%s816_s20 + $0xe8] sm:$0xff] }
  0x18   : > { %572 = vst.msk [vmem:[%s835_s25 + $0x28] sm:$0xff] %vm566_vm0, %v443_v28  ;;  %v453_v58 = vadd.f32 %v821_v1, %v321_v47  ;;  %v325_v59 = vmul.f32 %v811_v0, %v193_v51  ;;  %v454_v61 = vadd.f32 %v821_v1, %v322_v50  ;;  %v326_v62 = vmul.f32 %v811_v0, %v194_v54  ;;  %v204_v22 = vld [vmem:[%s816_s20 + $0xf0] sm:$0xff]  ;;  %v205_v25 = vld [vmem:[%s816_s20 + $0xf8] sm:$0xff]  ;;  %v206_v28 = vld [vmem:[%s816_s20 + $0x100] sm:$0xff] }
  0x19   : > { %573 = vst.msk [vmem:[%s835_s25 + $0x30] sm:$0xff] %vm566_vm0, %v444_v31  ;;  %v455_v2 = vadd.f32 %v821_v1, %v323_v53  ;;  %v327_v3 = vmul.f32 %v811_v0, %v195_v57  ;;  %v456_v5 = vadd.f32 %v821_v1, %v324_v56  ;;  %v328_v6 = vmul.f32 %v811_v0, %v196_v60  ;;  %v207_v31 = vld [vmem:[%s816_s20 + $0x108] sm:$0xff] }
  0x1a   : > { %574 = vst.msk [vmem:[%s835_s25 + $0x38] sm:$0xff] %vm566_vm0, %v445_v34  ;;  %v457_v8 = vadd.f32 %v821_v1, %v325_v59  ;;  %v329_v9 = vmul.f32 %v811_v0, %v197_v63  ;;  %v458_v11 = vadd.f32 %v821_v1, %v326_v62  ;;  %v330_v12 = vmul.f32 %v811_v0, %v198_v4  ;;  %v208_v34 = vld [vmem:[%s816_s20 + $0x110] sm:$0xff] }
  0x1b   : > { %575 = vst.msk [vmem:[%s835_s25 + $0x40] sm:$0xff] %vm566_vm0, %v446_v37  ;;  %v459_v14 = vadd.f32 %v821_v1, %v327_v3  ;;  %v331_v15 = vmul.f32 %v811_v0, %v199_v7  ;;  %v460_v17 = vadd.f32 %v821_v1, %v328_v6  ;;  %v332_v18 = vmul.f32 %v811_v0, %v200_v10  ;;  %v209_v37 = vld [vmem:[%s816_s20 + $0x118] sm:$0xff] }
  0x1c   : > { %576 = vst.msk [vmem:[%s835_s25 + $0x48] sm:$0xff] %vm566_vm0, %v447_v40  ;;  %v461_v20 = vadd.f32 %v821_v1, %v329_v9  ;;  %v333_v21 = vmul.f32 %v811_v0, %v201_v13  ;;  %v462_v23 = vadd.f32 %v821_v1, %v330_v12  ;;  %v334_v24 = vmul.f32 %v811_v0, %v202_v16  ;;  %v210_v40 = vld [vmem:[%s816_s20 + $0x120] sm:$0xff] }
  0x1d   : > { %577 = vst.msk [vmem:[%s835_s25 + $0x50] sm:$0xff] %vm566_vm0, %v448_v43  ;;  %v463_v26 = vadd.f32 %v821_v1, %v331_v15  ;;  %v335_v27 = vmul.f32 %v811_v0, %v203_v19  ;;  %v464_v29 = vadd.f32 %v821_v1, %v332_v18  ;;  %v336_v30 = vmul.f32 %v811_v0, %v204_v22  ;;  %v211_v43 = vld [vmem:[%s816_s20 + $0x128] sm:$0xff] }
  0x1e   : > { %578 = vst.msk [vmem:[%s835_s25 + $0x58] sm:$0xff] %vm566_vm0, %v449_v46  ;;  %v465_v32 = vadd.f32 %v821_v1, %v333_v21  ;;  %v337_v33 = vmul.f32 %v811_v0, %v205_v25  ;;  %v466_v35 = vadd.f32 %v821_v1, %v334_v24  ;;  %v338_v36 = vmul.f32 %v811_v0, %v206_v28  ;;  %v212_v46 = vld [vmem:[%s816_s20 + $0x130] sm:$0xff] }
  0x1f   : > { %579 = vst.msk [vmem:[%s835_s25 + $0x60] sm:$0xff] %vm566_vm0, %v450_v49  ;;  %v467_v38 = vadd.f32 %v821_v1, %v335_v27  ;;  %v339_v39 = vmul.f32 %v811_v0, %v207_v31  ;;  %v468_v41 = vadd.f32 %v821_v1, %v336_v30  ;;  %v340_v42 = vmul.f32 %v811_v0, %v208_v34  ;;  %v213_v49 = vld [vmem:[%s816_s20 + $0x138] sm:$0xff] }
  0x20   : > { %580 = vst.msk [vmem:[%s835_s25 + $0x68] sm:$0xff] %vm566_vm0, %v451_v52  ;;  %v469_v44 = vadd.f32 %v821_v1, %v337_v33  ;;  %v341_v45 = vmul.f32 %v811_v0, %v209_v37  ;;  %v470_v47 = vadd.f32 %v821_v1, %v338_v36  ;;  %v342_v48 = vmul.f32 %v811_v0, %v210_v40  ;;  %v214_v52 = vld [vmem:[%s816_s20 + $0x140] sm:$0xff] }
  0x21   : > { %581 = vst.msk [vmem:[%s835_s25 + $0x70] sm:$0xff] %vm566_vm0, %v452_v55  ;;  %v471_v50 = vadd.f32 %v821_v1, %v339_v39  ;;  %v343_v51 = vmul.f32 %v811_v0, %v211_v43  ;;  %v472_v53 = vadd.f32 %v821_v1, %v340_v42  ;;  %v344_v54 = vmul.f32 %v811_v0, %v212_v46  ;;  %v215_v55 = vld [vmem:[%s816_s20 + $0x148] sm:$0xff] }
  0x22   : > { %582 = vst.msk [vmem:[%s835_s25 + $0x78] sm:$0xff] %vm566_vm0, %v453_v58  ;;  %v473_v56 = vadd.f32 %v821_v1, %v341_v45  ;;  %v345_v57 = vmul.f32 %v811_v0, %v213_v49  ;;  %v216_v58 = vld [vmem:[%s816_s20 + $0x150] sm:$0xff]  ;;  %v474_v59 = vadd.f32 %v821_v1, %v342_v48  ;;  %v346_v60 = vmul.f32 %v811_v0, %v214_v52 }
  0x23   : > { %583 = vst.msk [vmem:[%s835_s25 + $0x80] sm:$0xff] %vm566_vm0, %v454_v61  ;;  %v217_v61 = vld [vmem:[%s816_s20 + $0x158] sm:$0xff]  ;;  %v475_v62 = vadd.f32 %v821_v1, %v343_v51  ;;  %v347_v63 = vmul.f32 %v811_v0, %v215_v55  ;;  %v476_v3 = vadd.f32 %v821_v1, %v344_v54  ;;  %v348_v4 = vmul.f32 %v811_v0, %v216_v58 }
  0x24   : > { %584 = vst.msk [vmem:[%s835_s25 + $0x88] sm:$0xff] %vm566_vm0, %v455_v2  ;;  %v218_v2 = vld [vmem:[%s816_s20 + $0x160] sm:$0xff]  ;;  %v477_v6 = vadd.f32 %v821_v1, %v345_v57  ;;  %v349_v7 = vmul.f32 %v811_v0, %v217_v61  ;;  %v478_v9 = vadd.f32 %v821_v1, %v346_v60 }
  0x25   : > { %585 = vst.msk [vmem:[%s835_s25 + $0x90] sm:$0xff] %vm566_vm0, %v456_v5  ;;  %v219_v5 = vld [vmem:[%s816_s20 + $0x168] sm:$0xff]  ;;  %v350_v10 = vmul.f32 %v811_v0, %v218_v2  ;;  %v479_v12 = vadd.f32 %v821_v1, %v347_v63  ;;  %v480_v15 = vadd.f32 %v821_v1, %v348_v4 }
  0x26   : > { %586 = vst.msk [vmem:[%s835_s25 + $0x98] sm:$0xff] %vm566_vm0, %v457_v8  ;;  %v220_v8 = vld [vmem:[%s816_s20 + $0x170] sm:$0xff]  ;;  %v351_v13 = vmul.f32 %v811_v0, %v219_v5  ;;  %v481_v18 = vadd.f32 %v821_v1, %v349_v7 }
  0x27   : > { %587 = vst.msk [vmem:[%s835_s25 + $0xa0] sm:$0xff] %vm566_vm0, %v458_v11  ;;  %v221_v11 = vld [vmem:[%s816_s20 + $0x178] sm:$0xff]  ;;  %v352_v16 = vmul.f32 %v811_v0, %v220_v8  ;;  %v482_v21 = vadd.f32 %v821_v1, %v350_v10 }
  0x28   : > { %588 = vst.msk [vmem:[%s835_s25 + $0xa8] sm:$0xff] %vm566_vm0, %v459_v14  ;;  %v222_v14 = vld [vmem:[%s816_s20 + $0x180] sm:$0xff]  ;;  %v353_v19 = vmul.f32 %v811_v0, %v221_v11  ;;  %v483_v24 = vadd.f32 %v821_v1, %v351_v13 }
  0x29   : > { %589 = vst.msk [vmem:[%s835_s25 + $0xb0] sm:$0xff] %vm566_vm0, %v460_v17  ;;  %v223_v17 = vld [vmem:[%s816_s20 + $0x188] sm:$0xff]  ;;  %v354_v22 = vmul.f32 %v811_v0, %v222_v14  ;;  %v484_v27 = vadd.f32 %v821_v1, %v352_v16 }
  0x2a   : > { %590 = vst.msk [vmem:[%s835_s25 + $0xb8] sm:$0xff] %vm566_vm0, %v461_v20  ;;  %v224_v20 = vld [vmem:[%s816_s20 + $0x190] sm:$0xff]  ;;  %v355_v25 = vmul.f32 %v811_v0, %v223_v17  ;;  %v485_v30 = vadd.f32 %v821_v1, %v353_v19 }
  0x2b   : > { %591 = vst.msk [vmem:[%s835_s25 + $0xc0] sm:$0xff] %vm566_vm0, %v462_v23  ;;  %v225_v23 = vld [vmem:[%s816_s20 + $0x198] sm:$0xff]  ;;  %v356_v28 = vmul.f32 %v811_v0, %v224_v20  ;;  %v486_v33 = vadd.f32 %v821_v1, %v354_v22 }
  0x2c   : > { %592 = vst.msk [vmem:[%s835_s25 + $0xc8] sm:$0xff] %vm566_vm0, %v463_v26  ;;  %v226_v26 = vld [vmem:[%s816_s20 + $0x1a0] sm:$0xff]  ;;  %v357_v31 = vmul.f32 %v811_v0, %v225_v23  ;;  %v487_v36 = vadd.f32 %v821_v1, %v355_v25 }
  0x2d   : > { %593 = vst.msk [vmem:[%s835_s25 + $0xd0] sm:$0xff] %vm566_vm0, %v464_v29  ;;  %v227_v29 = vld [vmem:[%s816_s20 + $0x1a8] sm:$0xff]  ;;  %v358_v34 = vmul.f32 %v811_v0, %v226_v26  ;;  %v488_v39 = vadd.f32 %v821_v1, %v356_v28 }
  0x2e   : > { %594 = vst.msk [vmem:[%s835_s25 + $0xd8] sm:$0xff] %vm566_vm0, %v465_v32  ;;  %v228_v32 = vld [vmem:[%s816_s20 + $0x1b0] sm:$0xff]  ;;  %v359_v37 = vmul.f32 %v811_v0, %v227_v29  ;;  %v489_v42 = vadd.f32 %v821_v1, %v357_v31 }
  0x2f   : > { %595 = vst.msk [vmem:[%s835_s25 + $0xe0] sm:$0xff] %vm566_vm0, %v466_v35  ;;  %v229_v35 = vld [vmem:[%s816_s20 + $0x1b8] sm:$0xff]  ;;  %v360_v40 = vmul.f32 %v811_v0, %v228_v32  ;;  %v490_v45 = vadd.f32 %v821_v1, %v358_v34 }
  0x30   : > { %596 = vst.msk [vmem:[%s835_s25 + $0xe8] sm:$0xff] %vm566_vm0, %v467_v38  ;;  %v230_v38 = vld [vmem:[%s816_s20 + $0x1c0] sm:$0xff]  ;;  %v361_v43 = vmul.f32 %v811_v0, %v229_v35  ;;  %v491_v48 = vadd.f32 %v821_v1, %v359_v37 }
  0x31   : > { %597 = vst.msk [vmem:[%s835_s25 + $0xf0] sm:$0xff] %vm566_vm0, %v468_v41  ;;  %v231_v41 = vld [vmem:[%s816_s20 + $0x1c8] sm:$0xff]  ;;  %v362_v46 = vmul.f32 %v811_v0, %v230_v38  ;;  %v492_v51 = vadd.f32 %v821_v1, %v360_v40 }
  0x32   : > { %598 = vst.msk [vmem:[%s835_s25 + $0xf8] sm:$0xff] %vm566_vm0, %v469_v44  ;;  %v232_v44 = vld [vmem:[%s816_s20 + $0x1d0] sm:$0xff]  ;;  %v363_v49 = vmul.f32 %v811_v0, %v231_v41  ;;  %v493_v54 = vadd.f32 %v821_v1, %v361_v43 }
  0x33   : > { %599 = vst.msk [vmem:[%s835_s25 + $0x100] sm:$0xff] %vm566_vm0, %v470_v47  ;;  %v233_v47 = vld [vmem:[%s816_s20 + $0x1d8] sm:$0xff]  ;;  %v364_v52 = vmul.f32 %v811_v0, %v232_v44  ;;  %v494_v57 = vadd.f32 %v821_v1, %v362_v46 }
  0x34   : > { %600 = vst.msk [vmem:[%s835_s25 + $0x108] sm:$0xff] %vm566_vm0, %v471_v50  ;;  %v234_v50 = vld [vmem:[%s816_s20 + $0x1e0] sm:$0xff]  ;;  %v365_v55 = vmul.f32 %v811_v0, %v233_v47  ;;  %v495_v60 = vadd.f32 %v821_v1, %v363_v49 }
  0x35   : > { %601 = vst.msk [vmem:[%s835_s25 + $0x110] sm:$0xff] %vm566_vm0, %v472_v53  ;;  %v235_v53 = vld [vmem:[%s816_s20 + $0x1e8] sm:$0xff]  ;;  %v366_v58 = vmul.f32 %v811_v0, %v234_v50  ;;  %v496_v63 = vadd.f32 %v821_v1, %v364_v52 }
  0x36   : > { %602 = vst.msk [vmem:[%s835_s25 + $0x118] sm:$0xff] %vm566_vm0, %v473_v56  ;;  %v236_v56 = vld [vmem:[%s816_s20 + $0x1f0] sm:$0xff]  ;;  %v367_v61 = vmul.f32 %v811_v0, %v235_v53  ;;  %v497_v4 = vadd.f32 %v821_v1, %v365_v55 }
  0x37   : > { %603 = vst.msk [vmem:[%s835_s25 + $0x120] sm:$0xff] %vm566_vm0, %v474_v59  ;;  %v237_v59 = vld [vmem:[%s816_s20 + $0x1f8] sm:$0xff]  ;;  %v368_v2 = vmul.f32 %v811_v0, %v236_v56  ;;  %v498_v7 = vadd.f32 %v821_v1, %v366_v58 }
  0x38   : > { %604 = vst.msk [vmem:[%s835_s25 + $0x128] sm:$0xff] %vm566_vm0, %v475_v62  ;;  %v238_v62 = vld [vmem:[%s816_s20 + $0x200] sm:$0xff]  ;;  %v369_v5 = vmul.f32 %v811_v0, %v237_v59  ;;  %v499_v10 = vadd.f32 %v821_v1, %v367_v61 }
  0x39   : > { %605 = vst.msk [vmem:[%s835_s25 + $0x130] sm:$0xff] %vm566_vm0, %v476_v3  ;;  %v239_v3 = vld [vmem:[%s816_s20 + $0x208] sm:$0xff]  ;;  %v370_v8 = vmul.f32 %v811_v0, %v238_v62  ;;  %v500_v13 = vadd.f32 %v821_v1, %v368_v2 }
  0x3a   : > { %606 = vst.msk [vmem:[%s835_s25 + $0x138] sm:$0xff] %vm566_vm0, %v477_v6  ;;  %v240_v6 = vld [vmem:[%s816_s20 + $0x210] sm:$0xff]  ;;  %v371_v11 = vmul.f32 %v811_v0, %v239_v3  ;;  %v501_v16 = vadd.f32 %v821_v1, %v369_v5 }
  0x3b   : > { %607 = vst.msk [vmem:[%s835_s25 + $0x140] sm:$0xff] %vm566_vm0, %v478_v9  ;;  %v241_v9 = vld [vmem:[%s816_s20 + $0x218] sm:$0xff]  ;;  %v372_v14 = vmul.f32 %v811_v0, %v240_v6  ;;  %v502_v19 = vadd.f32 %v821_v1, %v370_v8 }
  0x3c   : > { %608 = vst.msk [vmem:[%s835_s25 + $0x148] sm:$0xff] %vm566_vm0, %v479_v12  ;;  %v242_v12 = vld [vmem:[%s816_s20 + $0x220] sm:$0xff]  ;;  %v373_v17 = vmul.f32 %v811_v0, %v241_v9  ;;  %v503_v22 = vadd.f32 %v821_v1, %v371_v11 }
  0x3d   : > { %609 = vst.msk [vmem:[%s835_s25 + $0x150] sm:$0xff] %vm566_vm0, %v480_v15  ;;  %v243_v15 = vld [vmem:[%s816_s20 + $0x228] sm:$0xff]  ;;  %v374_v20 = vmul.f32 %v811_v0, %v242_v12  ;;  %v504_v25 = vadd.f32 %v821_v1, %v372_v14 }
  0x3e   : > { %610 = vst.msk [vmem:[%s835_s25 + $0x158] sm:$0xff] %vm566_vm0, %v481_v18  ;;  %v244_v18 = vld [vmem:[%s816_s20 + $0x230] sm:$0xff]  ;;  %v375_v23 = vmul.f32 %v811_v0, %v243_v15  ;;  %v505_v28 = vadd.f32 %v821_v1, %v373_v17 }
  0x3f   : > { %611 = vst.msk [vmem:[%s835_s25 + $0x160] sm:$0xff] %vm566_vm0, %v482_v21  ;;  %v245_v21 = vld [vmem:[%s816_s20 + $0x238] sm:$0xff]  ;;  %v376_v26 = vmul.f32 %v811_v0, %v244_v18  ;;  %v506_v31 = vadd.f32 %v821_v1, %v374_v20 }
  0x40   : > { %612 = vst.msk [vmem:[%s835_s25 + $0x168] sm:$0xff] %vm566_vm0, %v483_v24  ;;  %v246_v24 = vld [vmem:[%s816_s20 + $0x240] sm:$0xff]  ;;  %v377_v29 = vmul.f32 %v811_v0, %v245_v21  ;;  %v507_v34 = vadd.f32 %v821_v1, %v375_v23 }
  0x41   : > { %613 = vst.msk [vmem:[%s835_s25 + $0x170] sm:$0xff] %vm566_vm0, %v484_v27  ;;  %v247_v27 = vld [vmem:[%s816_s20 + $0x248] sm:$0xff]  ;;  %v378_v32 = vmul.f32 %v811_v0, %v246_v24  ;;  %v508_v37 = vadd.f32 %v821_v1, %v376_v26 }
  0x42   : > { %614 = vst.msk [vmem:[%s835_s25 + $0x178] sm:$0xff] %vm566_vm0, %v485_v30  ;;  %v248_v30 = vld [vmem:[%s816_s20 + $0x250] sm:$0xff]  ;;  %v379_v35 = vmul.f32 %v811_v0, %v247_v27  ;;  %v509_v40 = vadd.f32 %v821_v1, %v377_v29 }
  0x43   : > { %615 = vst.msk [vmem:[%s835_s25 + $0x180] sm:$0xff] %vm566_vm0, %v486_v33  ;;  %v249_v33 = vld [vmem:[%s816_s20 + $0x258] sm:$0xff]  ;;  %v380_v38 = vmul.f32 %v811_v0, %v248_v30  ;;  %v510_v43 = vadd.f32 %v821_v1, %v378_v32 }
  0x44   : > { %616 = vst.msk [vmem:[%s835_s25 + $0x188] sm:$0xff] %vm566_vm0, %v487_v36  ;;  %v250_v36 = vld [vmem:[%s816_s20 + $0x260] sm:$0xff]  ;;  %v381_v41 = vmul.f32 %v811_v0, %v249_v33  ;;  %v511_v46 = vadd.f32 %v821_v1, %v379_v35 }
  0x45   : > { %617 = vst.msk [vmem:[%s835_s25 + $0x190] sm:$0xff] %vm566_vm0, %v488_v39  ;;  %v251_v39 = vld [vmem:[%s816_s20 + $0x268] sm:$0xff]  ;;  %v382_v44 = vmul.f32 %v811_v0, %v250_v36  ;;  %v512_v49 = vadd.f32 %v821_v1, %v380_v38 }
  0x46   : > { %618 = vst.msk [vmem:[%s835_s25 + $0x198] sm:$0xff] %vm566_vm0, %v489_v42  ;;  %v252_v42 = vld [vmem:[%s816_s20 + $0x270] sm:$0xff]  ;;  %v383_v47 = vmul.f32 %v811_v0, %v251_v39  ;;  %v513_v52 = vadd.f32 %v821_v1, %v381_v41 }
  0x47   : > { %619 = vst.msk [vmem:[%s835_s25 + $0x1a0] sm:$0xff] %vm566_vm0, %v490_v45  ;;  %v253_v45 = vld [vmem:[%s816_s20 + $0x278] sm:$0xff]  ;;  %v384_v50 = vmul.f32 %v811_v0, %v252_v42  ;;  %v514_v55 = vadd.f32 %v821_v1, %v382_v44 }
  0x48   : > { %620 = vst.msk [vmem:[%s835_s25 + $0x1a8] sm:$0xff] %vm566_vm0, %v491_v48  ;;  %v254_v48 = vld [vmem:[%s816_s20 + $0x280] sm:$0xff]  ;;  %v385_v53 = vmul.f32 %v811_v0, %v253_v45  ;;  %v515_v58 = vadd.f32 %v821_v1, %v383_v47 }
  0x49   : > { %621 = vst.msk [vmem:[%s835_s25 + $0x1b0] sm:$0xff] %vm566_vm0, %v492_v51  ;;  %v255_v51 = vld [vmem:[%s816_s20 + $0x288] sm:$0xff]  ;;  %v386_v56 = vmul.f32 %v811_v0, %v254_v48  ;;  %v516_v61 = vadd.f32 %v821_v1, %v384_v50 }
  0x4a   : > { %622 = vst.msk [vmem:[%s835_s25 + $0x1b8] sm:$0xff] %vm566_vm0, %v493_v54  ;;  %v256_v54 = vld [vmem:[%s816_s20 + $0x290] sm:$0xff]  ;;  %v387_v59 = vmul.f32 %v811_v0, %v255_v51  ;;  %v517_v2 = vadd.f32 %v821_v1, %v385_v53 }
  0x4b   : > { %623 = vst.msk [vmem:[%s835_s25 + $0x1c0] sm:$0xff] %vm566_vm0, %v494_v57  ;;  %v257_v57 = vld [vmem:[%s816_s20 + $0x298] sm:$0xff]  ;;  %v388_v62 = vmul.f32 %v811_v0, %v256_v54  ;;  %v518_v5 = vadd.f32 %v821_v1, %v386_v56 }
  0x4c   : > { %624 = vst.msk [vmem:[%s835_s25 + $0x1c8] sm:$0xff] %vm566_vm0, %v495_v60  ;;  %v258_v60 = vld [vmem:[%s816_s20 + $0x2a0] sm:$0xff]  ;;  %v389_v3 = vmul.f32 %v811_v0, %v257_v57  ;;  %v519_v8 = vadd.f32 %v821_v1, %v387_v59 }
  0x4d   : > { %625 = vst.msk [vmem:[%s835_s25 + $0x1d0] sm:$0xff] %vm566_vm0, %v496_v63  ;;  %v259_v63 = vld [vmem:[%s816_s20 + $0x2a8] sm:$0xff]  ;;  %v390_v6 = vmul.f32 %v811_v0, %v258_v60  ;;  %v520_v11 = vadd.f32 %v821_v1, %v388_v62 }
  0x4e   : > { %626 = vst.msk [vmem:[%s835_s25 + $0x1d8] sm:$0xff] %vm566_vm0, %v497_v4  ;;  %v260_v4 = vld [vmem:[%s816_s20 + $0x2b0] sm:$0xff]  ;;  %v391_v9 = vmul.f32 %v811_v0, %v259_v63  ;;  %v521_v14 = vadd.f32 %v821_v1, %v389_v3 }
  0x4f   : > { %627 = vst.msk [vmem:[%s835_s25 + $0x1e0] sm:$0xff] %vm566_vm0, %v498_v7  ;;  %v261_v7 = vld [vmem:[%s816_s20 + $0x2b8] sm:$0xff]  ;;  %v392_v12 = vmul.f32 %v811_v0, %v260_v4  ;;  %v522_v17 = vadd.f32 %v821_v1, %v390_v6 }
  0x50   : > { %628 = vst.msk [vmem:[%s835_s25 + $0x1e8] sm:$0xff] %vm566_vm0, %v499_v10  ;;  %v262_v10 = vld [vmem:[%s816_s20 + $0x2c0] sm:$0xff]  ;;  %v393_v15 = vmul.f32 %v811_v0, %v261_v7  ;;  %v523_v20 = vadd.f32 %v821_v1, %v391_v9 }
  0x51   : > { %629 = vst.msk [vmem:[%s835_s25 + $0x1f0] sm:$0xff] %vm566_vm0, %v500_v13  ;;  %v263_v13 = vld [vmem:[%s816_s20 + $0x2c8] sm:$0xff]  ;;  %v394_v18 = vmul.f32 %v811_v0, %v262_v10  ;;  %v524_v23 = vadd.f32 %v821_v1, %v392_v12 }
  0x52   : > { %630 = vst.msk [vmem:[%s835_s25 + $0x1f8] sm:$0xff] %vm566_vm0, %v501_v16  ;;  %v264_v16 = vld [vmem:[%s816_s20 + $0x2d0] sm:$0xff]  ;;  %v395_v21 = vmul.f32 %v811_v0, %v263_v13  ;;  %v525_v26 = vadd.f32 %v821_v1, %v393_v15 }
  0x53   : > { %631 = vst.msk [vmem:[%s835_s25 + $0x200] sm:$0xff] %vm566_vm0, %v502_v19  ;;  %v265_v19 = vld [vmem:[%s816_s20 + $0x2d8] sm:$0xff]  ;;  %v396_v24 = vmul.f32 %v811_v0, %v264_v16  ;;  %v526_v29 = vadd.f32 %v821_v1, %v394_v18 }
  0x54   : > { %632 = vst.msk [vmem:[%s835_s25 + $0x208] sm:$0xff] %vm566_vm0, %v503_v22  ;;  %v266_v22 = vld [vmem:[%s816_s20 + $0x2e0] sm:$0xff]  ;;  %v397_v27 = vmul.f32 %v811_v0, %v265_v19  ;;  %v527_v32 = vadd.f32 %v821_v1, %v395_v21 }
  0x55   : > { %633 = vst.msk [vmem:[%s835_s25 + $0x210] sm:$0xff] %vm566_vm0, %v504_v25  ;;  %v267_v25 = vld [vmem:[%s816_s20 + $0x2e8] sm:$0xff]  ;;  %v398_v30 = vmul.f32 %v811_v0, %v266_v22  ;;  %v528_v35 = vadd.f32 %v821_v1, %v396_v24 }
  0x56   : > { %634 = vst.msk [vmem:[%s835_s25 + $0x218] sm:$0xff] %vm566_vm0, %v505_v28  ;;  %v268_v28 = vld [vmem:[%s816_s20 + $0x2f0] sm:$0xff]  ;;  %v399_v33 = vmul.f32 %v811_v0, %v267_v25  ;;  %v529_v38 = vadd.f32 %v821_v1, %v397_v27 }
  0x57   : > { %635 = vst.msk [vmem:[%s835_s25 + $0x220] sm:$0xff] %vm566_vm0, %v506_v31  ;;  %v269_v31 = vld [vmem:[%s816_s20 + $0x2f8] sm:$0xff]  ;;  %v400_v36 = vmul.f32 %v811_v0, %v268_v28  ;;  %v530_v41 = vadd.f32 %v821_v1, %v398_v30 }
  0x58   : > { %636 = vst.msk [vmem:[%s835_s25 + $0x228] sm:$0xff] %vm566_vm0, %v507_v34  ;;  %v270_v34 = vld [vmem:[%s816_s20 + $0x300] sm:$0xff]  ;;  %v401_v39 = vmul.f32 %v811_v0, %v269_v31  ;;  %v531_v44 = vadd.f32 %v821_v1, %v399_v33 }
  0x59   : > { %637 = vst.msk [vmem:[%s835_s25 + $0x230] sm:$0xff] %vm566_vm0, %v508_v37  ;;  %v271_v37 = vld [vmem:[%s816_s20 + $0x308] sm:$0xff]  ;;  %v402_v42 = vmul.f32 %v811_v0, %v270_v34  ;;  %v532_v47 = vadd.f32 %v821_v1, %v400_v36 }
  0x5a   : > { %638 = vst.msk [vmem:[%s835_s25 + $0x238] sm:$0xff] %vm566_vm0, %v509_v40  ;;  %v272_v40 = vld [vmem:[%s816_s20 + $0x310] sm:$0xff]  ;;  %v403_v45 = vmul.f32 %v811_v0, %v271_v37  ;;  %v533_v50 = vadd.f32 %v821_v1, %v401_v39 }
  0x5b   : > { %639 = vst.msk [vmem:[%s835_s25 + $0x240] sm:$0xff] %vm566_vm0, %v510_v43  ;;  %v273_v43 = vld [vmem:[%s816_s20 + $0x318] sm:$0xff]  ;;  %v404_v48 = vmul.f32 %v811_v0, %v272_v40  ;;  %v534_v53 = vadd.f32 %v821_v1, %v402_v42 }
  0x5c   : > { %640 = vst.msk [vmem:[%s835_s25 + $0x248] sm:$0xff] %vm566_vm0, %v511_v46  ;;  %v274_v46 = vld [vmem:[%s816_s20 + $0x320] sm:$0xff]  ;;  %v405_v51 = vmul.f32 %v811_v0, %v273_v43  ;;  %v535_v56 = vadd.f32 %v821_v1, %v403_v45 }
  0x5d   : > { %641 = vst.msk [vmem:[%s835_s25 + $0x250] sm:$0xff] %vm566_vm0, %v512_v49  ;;  %v275_v49 = vld [vmem:[%s816_s20 + $0x328] sm:$0xff]  ;;  %v406_v54 = vmul.f32 %v811_v0, %v274_v46  ;;  %v536_v59 = vadd.f32 %v821_v1, %v404_v48 }
  0x5e   : > { %642 = vst.msk [vmem:[%s835_s25 + $0x258] sm:$0xff] %vm566_vm0, %v513_v52  ;;  %v276_v52 = vld [vmem:[%s816_s20 + $0x330] sm:$0xff]  ;;  %v407_v57 = vmul.f32 %v811_v0, %v275_v49  ;;  %v537_v62 = vadd.f32 %v821_v1, %v405_v51 }
  0x5f   : > { %643 = vst.msk [vmem:[%s835_s25 + $0x260] sm:$0xff] %vm566_vm0, %v514_v55  ;;  %v277_v55 = vld [vmem:[%s816_s20 + $0x338] sm:$0xff]  ;;  %v408_v60 = vmul.f32 %v811_v0, %v276_v52  ;;  %v538_v3 = vadd.f32 %v821_v1, %v406_v54 }
  0x60   : > { %644 = vst.msk [vmem:[%s835_s25 + $0x268] sm:$0xff] %vm566_vm0, %v515_v58  ;;  %v278_v58 = vld [vmem:[%s816_s20 + $0x340] sm:$0xff]  ;;  %v409_v63 = vmul.f32 %v811_v0, %v277_v55  ;;  %v539_v6 = vadd.f32 %v821_v1, %v407_v57 }
  0x61   : > { %645 = vst.msk [vmem:[%s835_s25 + $0x270] sm:$0xff] %vm566_vm0, %v516_v61  ;;  %v279_v61 = vld [vmem:[%s816_s20 + $0x348] sm:$0xff]  ;;  %v410_v4 = vmul.f32 %v811_v0, %v278_v58  ;;  %v540_v9 = vadd.f32 %v821_v1, %v408_v60 }
  0x62   : > { %646 = vst.msk [vmem:[%s835_s25 + $0x278] sm:$0xff] %vm566_vm0, %v517_v2  ;;  %v280_v2 = vld [vmem:[%s816_s20 + $0x350] sm:$0xff]  ;;  %v411_v7 = vmul.f32 %v811_v0, %v279_v61  ;;  %v541_v12 = vadd.f32 %v821_v1, %v409_v63 }
  0x63   : > { %647 = vst.msk [vmem:[%s835_s25 + $0x280] sm:$0xff] %vm566_vm0, %v518_v5  ;;  %v281_v5 = vld [vmem:[%s816_s20 + $0x358] sm:$0xff]  ;;  %v412_v10 = vmul.f32 %v811_v0, %v280_v2  ;;  %v542_v15 = vadd.f32 %v821_v1, %v410_v4 }
  0x64   : > { %648 = vst.msk [vmem:[%s835_s25 + $0x288] sm:$0xff] %vm566_vm0, %v519_v8  ;;  %v282_v8 = vld [vmem:[%s816_s20 + $0x360] sm:$0xff]  ;;  %v413_v13 = vmul.f32 %v811_v0, %v281_v5  ;;  %v543_v18 = vadd.f32 %v821_v1, %v411_v7 }
  0x65   : > { %649 = vst.msk [vmem:[%s835_s25 + $0x290] sm:$0xff] %vm566_vm0, %v520_v11  ;;  %v283_v11 = vld [vmem:[%s816_s20 + $0x368] sm:$0xff]  ;;  %v414_v16 = vmul.f32 %v811_v0, %v282_v8  ;;  %v544_v21 = vadd.f32 %v821_v1, %v412_v10 }
  0x66   : > { %650 = vst.msk [vmem:[%s835_s25 + $0x298] sm:$0xff] %vm566_vm0, %v521_v14  ;;  %v284_v14 = vld [vmem:[%s816_s20 + $0x370] sm:$0xff]  ;;  %v415_v19 = vmul.f32 %v811_v0, %v283_v11  ;;  %v545_v24 = vadd.f32 %v821_v1, %v413_v13 }
  0x67   : > { %651 = vst.msk [vmem:[%s835_s25 + $0x2a0] sm:$0xff] %vm566_vm0, %v522_v17  ;;  %v285_v17 = vld [vmem:[%s816_s20 + $0x378] sm:$0xff]  ;;  %v416_v22 = vmul.f32 %v811_v0, %v284_v14  ;;  %v546_v27 = vadd.f32 %v821_v1, %v414_v16 }
  0x68   : > { %652 = vst.msk [vmem:[%s835_s25 + $0x2a8] sm:$0xff] %vm566_vm0, %v523_v20  ;;  %v286_v20 = vld [vmem:[%s816_s20 + $0x380] sm:$0xff]  ;;  %v417_v25 = vmul.f32 %v811_v0, %v285_v17  ;;  %v547_v30 = vadd.f32 %v821_v1, %v415_v19 }
  0x69   : > { %653 = vst.msk [vmem:[%s835_s25 + $0x2b0] sm:$0xff] %vm566_vm0, %v524_v23  ;;  %v287_v23 = vld [vmem:[%s816_s20 + $0x388] sm:$0xff]  ;;  %v418_v28 = vmul.f32 %v811_v0, %v286_v20  ;;  %v548_v33 = vadd.f32 %v821_v1, %v416_v22 }
  0x6a   : > { %654 = vst.msk [vmem:[%s835_s25 + $0x2b8] sm:$0xff] %vm566_vm0, %v525_v26  ;;  %v288_v26 = vld [vmem:[%s816_s20 + $0x390] sm:$0xff]  ;;  %v419_v31 = vmul.f32 %v811_v0, %v287_v23  ;;  %v549_v36 = vadd.f32 %v821_v1, %v417_v25 }
  0x6b   : > { %655 = vst.msk [vmem:[%s835_s25 + $0x2c0] sm:$0xff] %vm566_vm0, %v526_v29  ;;  %v289_v29 = vld [vmem:[%s816_s20 + $0x398] sm:$0xff]  ;;  %v420_v34 = vmul.f32 %v811_v0, %v288_v26  ;;  %v550_v39 = vadd.f32 %v821_v1, %v418_v28 }
  0x6c   : > { %656 = vst.msk [vmem:[%s835_s25 + $0x2c8] sm:$0xff] %vm566_vm0, %v527_v32  ;;  %v290_v32 = vld [vmem:[%s816_s20 + $0x3a0] sm:$0xff]  ;;  %v421_v37 = vmul.f32 %v811_v0, %v289_v29  ;;  %v551_v42 = vadd.f32 %v821_v1, %v419_v31 }
  0x6d   : > { %657 = vst.msk [vmem:[%s835_s25 + $0x2d0] sm:$0xff] %vm566_vm0, %v528_v35  ;;  %v291_v35 = vld [vmem:[%s816_s20 + $0x3a8] sm:$0xff]  ;;  %v422_v40 = vmul.f32 %v811_v0, %v290_v32  ;;  %v552_v45 = vadd.f32 %v821_v1, %v420_v34 }
  0x6e   : > { %658 = vst.msk [vmem:[%s835_s25 + $0x2d8] sm:$0xff] %vm566_vm0, %v529_v38  ;;  %v292_v38 = vld [vmem:[%s816_s20 + $0x3b0] sm:$0xff]  ;;  %v423_v43 = vmul.f32 %v811_v0, %v291_v35  ;;  %v553_v48 = vadd.f32 %v821_v1, %v421_v37 }
  0x6f   : > { %659 = vst.msk [vmem:[%s835_s25 + $0x2e0] sm:$0xff] %vm566_vm0, %v530_v41  ;;  %v293_v41 = vld [vmem:[%s816_s20 + $0x3b8] sm:$0xff]  ;;  %v424_v46 = vmul.f32 %v811_v0, %v292_v38  ;;  %v554_v51 = vadd.f32 %v821_v1, %v422_v40 }
  0x70   : > { %660 = vst.msk [vmem:[%s835_s25 + $0x2e8] sm:$0xff] %vm566_vm0, %v531_v44  ;;  %v294_v44 = vld [vmem:[%s816_s20 + $0x3c0] sm:$0xff]  ;;  %v425_v49 = vmul.f32 %v811_v0, %v293_v41  ;;  %v555_v54 = vadd.f32 %v821_v1, %v423_v43 }
  0x71   : > { %661 = vst.msk [vmem:[%s835_s25 + $0x2f0] sm:$0xff] %vm566_vm0, %v532_v47  ;;  %v295_v47 = vld [vmem:[%s816_s20 + $0x3c8] sm:$0xff]  ;;  %v426_v52 = vmul.f32 %v811_v0, %v294_v44  ;;  %v556_v57 = vadd.f32 %v821_v1, %v424_v46 }
  0x72   : > { %662 = vst.msk [vmem:[%s835_s25 + $0x2f8] sm:$0xff] %vm566_vm0, %v533_v50  ;;  %v296_v50 = vld [vmem:[%s816_s20 + $0x3d0] sm:$0xff]  ;;  %v427_v55 = vmul.f32 %v811_v0, %v295_v47  ;;  %v557_v60 = vadd.f32 %v821_v1, %v425_v49 }
  0x73   : > { %663 = vst.msk [vmem:[%s835_s25 + $0x300] sm:$0xff] %vm566_vm0, %v534_v53  ;;  %v297_v53 = vld [vmem:[%s816_s20 + $0x3d8] sm:$0xff]  ;;  %v428_v58 = vmul.f32 %v811_v0, %v296_v50  ;;  %v558_v63 = vadd.f32 %v821_v1, %v426_v52 }
  0x74   : > { %664 = vst.msk [vmem:[%s835_s25 + $0x308] sm:$0xff] %vm566_vm0, %v535_v56  ;;  %v298_v56 = vld [vmem:[%s816_s20 + $0x3e0] sm:$0xff]  ;;  %v429_v61 = vmul.f32 %v811_v0, %v297_v53  ;;  %v559_v4 = vadd.f32 %v821_v1, %v427_v55 }
  0x75   : > { %665 = vst.msk [vmem:[%s835_s25 + $0x310] sm:$0xff] %vm566_vm0, %v536_v59  ;;  %v299_v59 = vld [vmem:[%s816_s20 + $0x3e8] sm:$0xff]  ;;  %v430_v2 = vmul.f32 %v811_v0, %v298_v56 }
  0x76   : > { %666 = vst.msk [vmem:[%s835_s25 + $0x318] sm:$0xff] %vm566_vm0, %v537_v62  ;;  %v300_v62 = vld [vmem:[%s816_s20 + $0x3f0] sm:$0xff]  ;;  %v431_v5 = vmul.f32 %v811_v0, %v299_v59  ;;  %v561_v8 = vadd.f32 %v821_v1, %v429_v61 }
  0x77   : > { %667 = vst.msk [vmem:[%s835_s25 + $0x320] sm:$0xff] %vm566_vm0, %v538_v3  ;;  %v301_v3 = vld [vmem:[%s816_s20 + $0x3f8] sm:$0xff]  ;;  %v432_v7 = vmul.f32 %v811_v0, %v300_v62  ;;  %v562_v10 = vadd.f32 %v821_v1, %v430_v2 }
  0x78   : > { %668 = vst.msk [vmem:[%s835_s25 + $0x328] sm:$0xff] %vm566_vm0, %v539_v6  ;;  %v560_v6 = vadd.f32 %v821_v1, %v428_v58  ;;  %v563_v11 = vadd.f32 %v821_v1, %v431_v5 }
  0x79   : > { %669 = vst.msk [vmem:[%s835_s25 + $0x330] sm:$0xff] %vm566_vm0, %v540_v9  ;;  %v433_v9 = vmul.f32 %v811_v0, %v301_v3 }
  0x7a   : > { %670 = vst.msk [vmem:[%s835_s25 + $0x338] sm:$0xff] %vm566_vm0, %v541_v12  ;;  %v564_v12 = vadd.f32 %v821_v1, %v432_v7 }
  0x7b   : > { %671 = vst.msk [vmem:[%s835_s25 + $0x340] sm:$0xff] %vm566_vm0, %v542_v15  ;;  %v565_v13 = vadd.f32 %v821_v1, %v433_v9 }
  0x7c   : > { %672 = vst.msk [vmem:[%s835_s25 + $0x348] sm:$0xff] %vm566_vm0, %v543_v18 }
  0x7d   : > { %673 = vst.msk [vmem:[%s835_s25 + $0x350] sm:$0xff] %vm566_vm0, %v544_v21 }
  0x7e   : > { %674 = vst.msk [vmem:[%s835_s25 + $0x358] sm:$0xff] %vm566_vm0, %v545_v24 }
  0x7f   : > { %675 = vst.msk [vmem:[%s835_s25 + $0x360] sm:$0xff] %vm566_vm0, %v546_v27 }
  0x80   : > { %676 = vst.msk [vmem:[%s835_s25 + $0x368] sm:$0xff] %vm566_vm0, %v547_v30 }
  0x81   : > { %677 = vst.msk [vmem:[%s835_s25 + $0x370] sm:$0xff] %vm566_vm0, %v548_v33 }
  0x82   : > { %678 = vst.msk [vmem:[%s835_s25 + $0x378] sm:$0xff] %vm566_vm0, %v549_v36 }
  0x83   : > { %679 = vst.msk [vmem:[%s835_s25 + $0x380] sm:$0xff] %vm566_vm0, %v550_v39 }
  0x84   : > { %680 = vst.msk [vmem:[%s835_s25 + $0x388] sm:$0xff] %vm566_vm0, %v551_v42 }
  0x85   : > { %681 = vst.msk [vmem:[%s835_s25 + $0x390] sm:$0xff] %vm566_vm0, %v552_v45 }
  0x86   : > { %682 = vst.msk [vmem:[%s835_s25 + $0x398] sm:$0xff] %vm566_vm0, %v553_v48 }
  0x87   : > { %683 = vst.msk [vmem:[%s835_s25 + $0x3a0] sm:$0xff] %vm566_vm0, %v554_v51 }
  0x88   : > { %684 = vst.msk [vmem:[%s835_s25 + $0x3a8] sm:$0xff] %vm566_vm0, %v555_v54 }
  0x89   : > { %685 = vst.msk [vmem:[%s835_s25 + $0x3b0] sm:$0xff] %vm566_vm0, %v556_v57 }
  0x8a   : > { %686 = vst.msk [vmem:[%s835_s25 + $0x3b8] sm:$0xff] %vm566_vm0, %v557_v60 }
  0x8b   : > { %687 = vst.msk [vmem:[%s835_s25 + $0x3c0] sm:$0xff] %vm566_vm0, %v558_v63 }
  0x8c   : > { %688 = vst.msk [vmem:[%s835_s25 + $0x3c8] sm:$0xff] %vm566_vm0, %v559_v4 }
  0x8d   : > { %689 = vst.msk [vmem:[%s835_s25 + $0x3d0] sm:$0xff] %vm566_vm0, %v560_v6 }
  0x8e   : > { %690 = vst.msk [vmem:[%s835_s25 + $0x3d8] sm:$0xff] %vm566_vm0, %v561_v8 }
  0x8f   : > { %691 = vst.msk [vmem:[%s835_s25 + $0x3e0] sm:$0xff] %vm566_vm0, %v562_v10 }
  0x90   : > { %692 = vst.msk [vmem:[%s835_s25 + $0x3e8] sm:$0xff] %vm566_vm0, %v563_v11 }
  0x91   : > { %693 = vst.msk [vmem:[%s835_s25 + $0x3f0] sm:$0xff] %vm566_vm0, %v564_v12 }
  0x92   : > { %694 = vst.msk [vmem:[%s835_s25 + $0x3f8] sm:$0xff] %vm566_vm0, %v565_v13 }
  0x93 PF: > { %s13_s12 = sadd.s32 1, %s778_s12  }
  0x94   : > { %p10_p4 = scmp.ge.s32.totalorder %s13_s12, 4  }
  0x96   :  { %12 = sbr.rel (!%p10_p4) target bundleno = 1 (0x1), region = 62 }

// kernel: generator_forward.46
= control target key start
LH: loop header
LB: loop body
LE: loop exit
PB: predicated region body
PF: predicated region fallthrough
CT: control target
= control target key end

     0   :  { %s1816_s12 = smov 0   ;;  %s1818_s13 = smov 0   ;;  %s2049_s0 = inlined_call_operand.vmem [shape: bf16[2048,128], index: 0, kind: input, shape index: {}]   ;;  %s2050_s1 = inlined_call_operand.vmem [shape: bf16[128,128], index: 1, kind: input, shape index: {}]   ;;  %s2051_s2 = inlined_call_operand.vmem [shape: f32[1,128], index: 2, kind: input, shape index: {}]   ;;  %s2052_s3 = inlined_call_operand.vmem [shape: f32[2048,128], index: 3, kind: output, shape index: {}]  }
   0x1   :  { %s1820_s14 = smov 0  }
   0x2 LB: > { %s32_s15 = sadd.s32 1, %s1790_s13  ;;  %p1388_p0 = scmp.ge.s32.totalorder %s1794_s14, 1  ;;  %s1794_s14 = sphi %s1820_s14, %s13_s14   ;;  %s1790_s13 = sphi %s1818_s13, %s2054_s13   ;;  %s1786_s12 = sphi %s1816_s12, %s2053_s12  }
   0x3   : > { %p34_p1 = scmp.ge.s32.totalorder %s32_s15, 4  ;;  %p188_p2 = scmp.lt.s32.totalorder %s1794_s14, 5 }
   0x5   : > { %s2056_s15 = smov (%p34_p1, %s32_s15), 0  ;;  %p189_p3 = pnand %p1388_p0, %p188_p2 }
   0x6   : > { %s1389_s24 = sshll.u32 (!%p189_p3), %s1786_s12, 6 }
   0x7   : > { %192 = sbr.rel (%p189_p3) target bundleno = 308 (0x134), region = 32  ;;  %p230_p4 = scmp.lt.s32.totalorder (!%p189_p3), %s1389_s24, 255 }
   0xc   : > { %v1594_v0 = vld [vmem:[%s2050_s1 + $0x38] sm:$0xff]  ;;  %v1593_v1 = vld [vmem:[%s2050_s1 + $0x30] sm:$0xff]  ;;  %v1592_v2 = vld [vmem:[%s2050_s1 + $0x28] sm:$0xff]  ;;  %s2058_s24 = smov (!%p230_p4, %s1389_s24), 255 }
   0xd   : > { %711 = vmatpush.bf16.msra.mxu0 %v1594_v0  ;;  %1595 = vmatpush.bf16.msra.mxu1 %v1594_v0  ;;  %v1591_v3 = vld [vmem:[%s2050_s1 + $0x20] sm:$0xff]  ;;  %v1590_v4 = vld [vmem:[%s2050_s1 + $0x18] sm:$0xff]  ;;  %v1589_v5 = vld [vmem:[%s2050_s1 + $0x10] sm:$0xff]  ;;  %s1390_s4 = sshll.u32 %s2058_s24, 2  ;;  %s1392_s12 = sshll.u32 %s2058_s24, 3 }
   0xe   : > { %1596 = vmatpush.bf16.msra.mxu2 %v1594_v0  ;;  %1597 = vmatpush.bf16.msra.mxu3 %v1594_v0  ;;  %v1588_v6 = vld [vmem:[%s2050_s1 + $0x8] sm:$0xff]  ;;  %v1587_v7 = vld [vmem:[%s2050_s1] sm:$0xff]  ;;  %s1867_s9 = scalar_lea.vmem %s2049_s0, %s1390_s4  ;;  %s1912_s18 = scalar_lea.vmem %s2052_s3, %s1392_s12 }
   0xf   : > { %v1555_v8 = vld [vmem:[%s1867_s9] sm:$0xff]  ;;  %v1556_v12 = vld [vmem:[%s1867_s9 + $0x8] sm:$0xff]  ;;  %v1557_v16 = vld [vmem:[%s1867_s9 + $0x10] sm:$0xff] }
  0x10   : > { %v1563_v9 = vld [vmem:[%s1867_s9 + $0x40] sm:$0xff]  ;;  %v1564_v13 = vld [vmem:[%s1867_s9 + $0x48] sm:$0xff]  ;;  %v1565_v17 = vld [vmem:[%s1867_s9 + $0x50] sm:$0xff] }
  0x11   : > { %712 = vmatpush.bf16.msra.mxu0 %v1593_v1  ;;  %1598 = vmatpush.bf16.msra.mxu1 %v1593_v1  ;;  %v1571_v10 = vld [vmem:[%s1867_s9 + $0x80] sm:$0xff]  ;;  %v1572_v14 = vld [vmem:[%s1867_s9 + $0x88] sm:$0xff]  ;;  %v1573_v18 = vld [vmem:[%s1867_s9 + $0x90] sm:$0xff] }
  0x12   : > { %1599 = vmatpush.bf16.msra.mxu2 %v1593_v1  ;;  %1600 = vmatpush.bf16.msra.mxu3 %v1593_v1  ;;  %v1579_v11 = vld [vmem:[%s1867_s9 + $0xc0] sm:$0xff]  ;;  %v1580_v15 = vld [vmem:[%s1867_s9 + $0xc8] sm:$0xff]  ;;  %v1581_v19 = vld [vmem:[%s1867_s9 + $0xd0] sm:$0xff] }
  0x13   : > { %v1558_v20 = vld [vmem:[%s1867_s9 + $0x18] sm:$0xff]  ;;  %v1559_v24 = vld [vmem:[%s1867_s9 + $0x20] sm:$0xff]  ;;  %v1560_v28 = vld [vmem:[%s1867_s9 + $0x28] sm:$0xff] }
  0x14   : > { %v1566_v21 = vld [vmem:[%s1867_s9 + $0x58] sm:$0xff]  ;;  %v1567_v25 = vld [vmem:[%s1867_s9 + $0x60] sm:$0xff]  ;;  %v1568_v29 = vld [vmem:[%s1867_s9 + $0x68] sm:$0xff] }
  0x15   : > { %713 = vmatpush.bf16.msra.mxu0 %v1592_v2  ;;  %1601 = vmatpush.bf16.msra.mxu1 %v1592_v2  ;;  %v1574_v22 = vld [vmem:[%s1867_s9 + $0x98] sm:$0xff]  ;;  %v1575_v26 = vld [vmem:[%s1867_s9 + $0xa0] sm:$0xff]  ;;  %v1576_v30 = vld [vmem:[%s1867_s9 + $0xa8] sm:$0xff] }
  0x16   : > { %1602 = vmatpush.bf16.msra.mxu2 %v1592_v2  ;;  %1603 = vmatpush.bf16.msra.mxu3 %v1592_v2  ;;  %v1582_v23 = vld [vmem:[%s1867_s9 + $0xd8] sm:$0xff]  ;;  %v1583_v27 = vld [vmem:[%s1867_s9 + $0xe0] sm:$0xff]  ;;  %v1584_v31 = vld [vmem:[%s1867_s9 + $0xe8] sm:$0xff] }
  0x17   : > { %v1561_v32 = vld [vmem:[%s1867_s9 + $0x30] sm:$0xff]  ;;  %v1562_v36 = vld [vmem:[%s1867_s9 + $0x38] sm:$0xff]  ;;  %v1904_v40 = vld [vmem:[%s2051_s2] ss:$0 sm:$0xff] }
  0x18   : > { %v1569_v33 = vld [vmem:[%s1867_s9 + $0x70] sm:$0xff]  ;;  %v1570_v37 = vld [vmem:[%s1867_s9 + $0x78] sm:$0xff] }
  0x19   : > { %714 = vmatpush.bf16.msra.mxu0 %v1591_v3  ;;  %1604 = vmatpush.bf16.msra.mxu1 %v1591_v3  ;;  %v1577_v34 = vld [vmem:[%s1867_s9 + $0xb0] sm:$0xff]  ;;  %v1578_v38 = vld [vmem:[%s1867_s9 + $0xb8] sm:$0xff] }
  0x1a   : > { %1605 = vmatpush.bf16.msra.mxu2 %v1591_v3  ;;  %1606 = vmatpush.bf16.msra.mxu3 %v1591_v3  ;;  %v1585_v35 = vld [vmem:[%s1867_s9 + $0xf0] sm:$0xff]  ;;  %v1586_v39 = vld [vmem:[%s1867_s9 + $0xf8] sm:$0xff] }
  0x1d   : > { %715 = vmatpush.bf16.msra.mxu0 %v1590_v4  ;;  %1607 = vmatpush.bf16.msra.mxu1 %v1590_v4 }
  0x1e   : > { %1608 = vmatpush.bf16.msra.mxu2 %v1590_v4  ;;  %1609 = vmatpush.bf16.msra.mxu3 %v1590_v4 }
  0x21   : > { %716 = vmatpush.bf16.msra.mxu0 %v1589_v5  ;;  %1610 = vmatpush.bf16.msra.mxu1 %v1589_v5 }
  0x22   : > { %1611 = vmatpush.bf16.msra.mxu2 %v1589_v5  ;;  %1612 = vmatpush.bf16.msra.mxu3 %v1589_v5 }
  0x25   : > { %717 = vmatpush.bf16.msra.mxu0 %v1588_v6  ;;  %1613 = vmatpush.bf16.msra.mxu1 %v1588_v6 }
  0x26   : > { %1614 = vmatpush.bf16.msra.mxu2 %v1588_v6  ;;  %1615 = vmatpush.bf16.msra.mxu3 %v1588_v6 }
  0x29   : > { %718 = vmatpush.bf16.msra.mxu0 %v1587_v7  ;;  %1616 = vmatpush.bf16.msra.mxu1 %v1587_v7 }
  0x2a   : > { %1617 = vmatpush.bf16.msra.mxu2 %v1587_v7  ;;  %1618 = vmatpush.bf16.msra.mxu3 %v1587_v7 }
  0x2c   : > { %719 = vmatmul.bf16.vlgmr.msra.gmra.mxu0 %v1555_v8  ;;  %759 = vmatmul.bf16.vlgmr.msra.gmra.mxu1 %v1563_v9 }
  0x2d   : > { %799 = vmatmul.bf16.vlgmr.msra.gmra.mxu2 %v1571_v10  ;;  %839 = vmatmul.bf16.vlgmr.msra.gmra.mxu3 %v1579_v11 }
  0x3c   : > { %724 = vmatmul.bf16.gmra.mxu0 %v1556_v12  ;;  %764 = vmatmul.bf16.gmra.mxu1 %v1564_v13 }
  0x3d   : > { %804 = vmatmul.bf16.gmra.mxu2 %v1572_v14  ;;  %844 = vmatmul.bf16.gmra.mxu3 %v1580_v15 }
  0x4c   : > { %729 = vmatmul.bf16.gmra.mxu0 %v1557_v16  ;;  %769 = vmatmul.bf16.gmra.mxu1 %v1565_v17 }
  0x4d   : > { %809 = vmatmul.bf16.gmra.mxu2 %v1573_v18  ;;  %849 = vmatmul.bf16.gmra.mxu3 %v1581_v19 }
  0x5c   : > { %734 = vmatmul.bf16.gmra.mxu0 %v1558_v20  ;;  %774 = vmatmul.bf16.gmra.mxu1 %v1566_v21 }
  0x5d   : > { %814 = vmatmul.bf16.gmra.mxu2 %v1574_v22  ;;  %854 = vmatmul.bf16.gmra.mxu3 %v1582_v23 }
  0x6c   : > { %739 = vmatmul.bf16.gmra.mxu0 %v1559_v24  ;;  %779 = vmatmul.bf16.gmra.mxu1 %v1567_v25 }
  0x6d   : > { %819 = vmatmul.bf16.gmra.mxu2 %v1575_v26  ;;  %859 = vmatmul.bf16.gmra.mxu3 %v1583_v27 }
  0x7c   : > { %744 = vmatmul.bf16.gmra.mxu0 %v1560_v28  ;;  %784 = vmatmul.bf16.gmra.mxu1 %v1568_v29 }
  0x7d   : > { %824 = vmatmul.bf16.gmra.mxu2 %v1576_v30  ;;  %864 = vmatmul.bf16.gmra.mxu3 %v1584_v31 }
  0x8c   : > { %749 = vmatmul.bf16.gmra.mxu0 %v1561_v32  ;;  %789 = vmatmul.bf16.gmra.mxu1 %v1569_v33 }
  0x8d   : > { %829 = vmatmul.bf16.gmra.mxu2 %v1577_v34  ;;  %869 = vmatmul.bf16.gmra.mxu3 %v1585_v35 }
  0x9c   : > { %754 = vmatmul.bf16.gmra.mxu0 %v1562_v36  ;;  %794 = vmatmul.bf16.gmra.mxu1 %v1570_v37 }
  0x9d   : > { %834 = vmatmul.bf16.gmra.mxu2 %v1578_v38  ;;  %874 = vmatmul.bf16.gmra.mxu3 %v1586_v39 }
  0xa9   : > { %v720_v41 = vpop.f32.mrf.mxu0  ;;  %v760_v42 = vpop.f32.mrf.mxu1 }
  0xaa   : > { %v1079_v43 = vadd.f32 %v1904_v40, %v720_v41  ;;  %v1095_v44 = vadd.f32 %v1904_v40, %v760_v42 }
  0xac   : > { %1644 = vtanh.f32 %v1079_v43 }
  0xad   : > { %1646 = vtanh.f32 %v1095_v44 }
  0xb0   : > { %v800_v45 = vpop.f32.mrf.mxu2  ;;  %v840_v46 = vpop.f32.mrf.mxu3 }
  0xb1   : > { %v1111_v47 = vadd.f32 %v1904_v40, %v800_v45  ;;  %v1127_v48 = vadd.f32 %v1904_v40, %v840_v46  ;;  %v722_v49 = vpop.f32.mrf.mxu0  ;;  %v762_v50 = vpop.f32.mrf.mxu1 }
  0xb2   : > { %v1645_v51 = vpop.eup %1644  ;;  %v1080_v52 = vadd.f32 %v1904_v40, %v722_v49  ;;  %v1096_v53 = vadd.f32 %v1904_v40, %v762_v50 }
  0xb3   : > { %v1647_v54 = vpop.eup %1646  ;;  %1207 = vst [vmem:[%s1912_s18] sm:$0xff] %v1645_v51  ;;  %1648 = vtanh.f32 %v1111_v47 }
  0xb4   : > { %1223 = vst [vmem:[%s1912_s18 + $0x80] sm:$0xff] %v1647_v54  ;;  %1650 = vtanh.f32 %v1127_v48 }
  0xb5   : > { %1652 = vtanh.f32 %v1080_v52 }
  0xb6   : > { %1654 = vtanh.f32 %v1096_v53 }
  0xb8   : > { %v802_v55 = vpop.f32.mrf.mxu2  ;;  %v842_v56 = vpop.f32.mrf.mxu3 }
  0xb9   : > { %v1649_v57 = vpop.eup %1648  ;;  %v1112_v58 = vadd.f32 %v1904_v40, %v802_v55  ;;  %v1128_v59 = vadd.f32 %v1904_v40, %v842_v56  ;;  %v725_v60 = vpop.f32.mrf.mxu0 }
  0xba   : > { %v765_v61 = vpop.f32.mrf.mxu1  ;;  %v1651_v62 = vpop.eup %1650  ;;  %1239 = vst [vmem:[%s1912_s18 + $0x100] sm:$0xff] %v1649_v57  ;;  %v1081_v63 = vadd.f32 %v1904_v40, %v725_v60 }
  0xbb   : > { %v1097_v0 = vadd.f32 %v1904_v40, %v765_v61  ;;  %v1653_v1 = vpop.eup %1652  ;;  %1255 = vst [vmem:[%s1912_s18 + $0x180] sm:$0xff] %v1651_v62  ;;  %1656 = vtanh.f32 %v1112_v58 }
  0xbc   : > { %v1655_v2 = vpop.eup %1654  ;;  %1208 = vst [vmem:[%s1912_s18 + $0x8] sm:$0xff] %v1653_v1  ;;  %1658 = vtanh.f32 %v1128_v59 }
  0xbd   : > { %1224 = vst [vmem:[%s1912_s18 + $0x88] sm:$0xff] %v1655_v2  ;;  %1660 = vtanh.f32 %v1081_v63 }
  0xbe   : > { %1662 = vtanh.f32 %v1097_v0 }
  0xc0   : > { %v805_v3 = vpop.f32.mrf.mxu2  ;;  %v845_v4 = vpop.f32.mrf.mxu3 }
  0xc1   : > { %v1657_v5 = vpop.eup %1656  ;;  %v1113_v6 = vadd.f32 %v1904_v40, %v805_v3  ;;  %v1129_v7 = vadd.f32 %v1904_v40, %v845_v4  ;;  %v727_v8 = vpop.f32.mrf.mxu0 }
  0xc2   : > { %v767_v9 = vpop.f32.mrf.mxu1  ;;  %v1659_v10 = vpop.eup %1658  ;;  %1240 = vst [vmem:[%s1912_s18 + $0x108] sm:$0xff] %v1657_v5  ;;  %v1082_v11 = vadd.f32 %v1904_v40, %v727_v8 }
  0xc3   : > { %v1098_v12 = vadd.f32 %v1904_v40, %v767_v9  ;;  %v1661_v13 = vpop.eup %1660  ;;  %1256 = vst [vmem:[%s1912_s18 + $0x188] sm:$0xff] %v1659_v10  ;;  %1664 = vtanh.f32 %v1113_v6 }
  0xc4   : > { %v1663_v14 = vpop.eup %1662  ;;  %1209 = vst [vmem:[%s1912_s18 + $0x10] sm:$0xff] %v1661_v13  ;;  %1666 = vtanh.f32 %v1129_v7 }
  0xc5   : > { %1225 = vst [vmem:[%s1912_s18 + $0x90] sm:$0xff] %v1663_v14  ;;  %1668 = vtanh.f32 %v1082_v11 }
  0xc6   : > { %1670 = vtanh.f32 %v1098_v12 }
  0xc8   : > { %v807_v15 = vpop.f32.mrf.mxu2  ;;  %v847_v16 = vpop.f32.mrf.mxu3 }
  0xc9   : > { %v1665_v17 = vpop.eup %1664  ;;  %v1114_v18 = vadd.f32 %v1904_v40, %v807_v15  ;;  %v1130_v19 = vadd.f32 %v1904_v40, %v847_v16  ;;  %v730_v20 = vpop.f32.mrf.mxu0 }
  0xca   : > { %v770_v21 = vpop.f32.mrf.mxu1  ;;  %v1667_v22 = vpop.eup %1666  ;;  %1241 = vst [vmem:[%s1912_s18 + $0x110] sm:$0xff] %v1665_v17  ;;  %v1083_v23 = vadd.f32 %v1904_v40, %v730_v20 }
  0xcb   : > { %v1099_v24 = vadd.f32 %v1904_v40, %v770_v21  ;;  %v1669_v25 = vpop.eup %1668  ;;  %1257 = vst [vmem:[%s1912_s18 + $0x190] sm:$0xff] %v1667_v22  ;;  %1672 = vtanh.f32 %v1114_v18 }
  0xcc   : > { %v1671_v26 = vpop.eup %1670  ;;  %1210 = vst [vmem:[%s1912_s18 + $0x18] sm:$0xff] %v1669_v25  ;;  %1674 = vtanh.f32 %v1130_v19 }
  0xcd   : > { %1226 = vst [vmem:[%s1912_s18 + $0x98] sm:$0xff] %v1671_v26  ;;  %1676 = vtanh.f32 %v1083_v23 }
  0xce   : > { %1678 = vtanh.f32 %v1099_v24 }
  0xd0   : > { %v810_v27 = vpop.f32.mrf.mxu2  ;;  %v850_v28 = vpop.f32.mrf.mxu3 }
  0xd1   : > { %v1673_v29 = vpop.eup %1672  ;;  %v1115_v30 = vadd.f32 %v1904_v40, %v810_v27  ;;  %v1131_v31 = vadd.f32 %v1904_v40, %v850_v28  ;;  %v732_v32 = vpop.f32.mrf.mxu0 }
  0xd2   : > { %v772_v33 = vpop.f32.mrf.mxu1  ;;  %v1675_v34 = vpop.eup %1674  ;;  %1242 = vst [vmem:[%s1912_s18 + $0x118] sm:$0xff] %v1673_v29  ;;  %v1084_v35 = vadd.f32 %v1904_v40, %v732_v32 }
  0xd3   : > { %v1100_v36 = vadd.f32 %v1904_v40, %v772_v33  ;;  %v1677_v37 = vpop.eup %1676  ;;  %1258 = vst [vmem:[%s1912_s18 + $0x198] sm:$0xff] %v1675_v34  ;;  %1680 = vtanh.f32 %v1115_v30 }
  0xd4   : > { %v1679_v38 = vpop.eup %1678  ;;  %1211 = vst [vmem:[%s1912_s18 + $0x20] sm:$0xff] %v1677_v37  ;;  %1682 = vtanh.f32 %v1131_v31 }
  0xd5   : > { %1227 = vst [vmem:[%s1912_s18 + $0xa0] sm:$0xff] %v1679_v38  ;;  %1684 = vtanh.f32 %v1084_v35 }
  0xd6   : > { %1686 = vtanh.f32 %v1100_v36 }
  0xd8   : > { %v812_v39 = vpop.f32.mrf.mxu2  ;;  %v852_v41 = vpop.f32.mrf.mxu3 }
  0xd9   : > { %v1681_v42 = vpop.eup %1680  ;;  %v1116_v43 = vadd.f32 %v1904_v40, %v812_v39  ;;  %v1132_v44 = vadd.f32 %v1904_v40, %v852_v41  ;;  %v735_v45 = vpop.f32.mrf.mxu0 }
  0xda   : > { %v775_v46 = vpop.f32.mrf.mxu1  ;;  %v1683_v47 = vpop.eup %1682  ;;  %1243 = vst [vmem:[%s1912_s18 + $0x120] sm:$0xff] %v1681_v42  ;;  %v1085_v48 = vadd.f32 %v1904_v40, %v735_v45 }
  0xdb   : > { %v1101_v49 = vadd.f32 %v1904_v40, %v775_v46  ;;  %v1685_v50 = vpop.eup %1684  ;;  %1259 = vst [vmem:[%s1912_s18 + $0x1a0] sm:$0xff] %v1683_v47  ;;  %1688 = vtanh.f32 %v1116_v43 }
  0xdc   : > { %v1687_v51 = vpop.eup %1686  ;;  %1212 = vst [vmem:[%s1912_s18 + $0x28] sm:$0xff] %v1685_v50  ;;  %1690 = vtanh.f32 %v1132_v44 }
  0xdd   : > { %1228 = vst [vmem:[%s1912_s18 + $0xa8] sm:$0xff] %v1687_v51  ;;  %1692 = vtanh.f32 %v1085_v48 }
  0xde   : > { %1694 = vtanh.f32 %v1101_v49 }
  0xe0   : > { %v815_v52 = vpop.f32.mrf.mxu2  ;;  %v855_v53 = vpop.f32.mrf.mxu3 }
  0xe1   : > { %v1689_v54 = vpop.eup %1688  ;;  %v1117_v55 = vadd.f32 %v1904_v40, %v815_v52  ;;  %v1133_v56 = vadd.f32 %v1904_v40, %v855_v53  ;;  %v737_v57 = vpop.f32.mrf.mxu0 }
  0xe2   : > { %v777_v58 = vpop.f32.mrf.mxu1  ;;  %v1691_v59 = vpop.eup %1690  ;;  %1244 = vst [vmem:[%s1912_s18 + $0x128] sm:$0xff] %v1689_v54  ;;  %v1086_v60 = vadd.f32 %v1904_v40, %v737_v57 }
  0xe3   : > { %v1102_v61 = vadd.f32 %v1904_v40, %v777_v58  ;;  %v1693_v62 = vpop.eup %1692  ;;  %1260 = vst [vmem:[%s1912_s18 + $0x1a8] sm:$0xff] %v1691_v59  ;;  %1696 = vtanh.f32 %v1117_v55 }
  0xe4   : > { %v1695_v63 = vpop.eup %1694  ;;  %1213 = vst [vmem:[%s1912_s18 + $0x30] sm:$0xff] %v1693_v62  ;;  %1698 = vtanh.f32 %v1133_v56 }
  0xe5   : > { %1229 = vst [vmem:[%s1912_s18 + $0xb0] sm:$0xff] %v1695_v63  ;;  %1700 = vtanh.f32 %v1086_v60 }
  0xe6   : > { %1702 = vtanh.f32 %v1102_v61 }
  0xe8   : > { %v817_v0 = vpop.f32.mrf.mxu2  ;;  %v857_v1 = vpop.f32.mrf.mxu3 }
  0xe9   : > { %v1697_v2 = vpop.eup %1696  ;;  %v1118_v3 = vadd.f32 %v1904_v40, %v817_v0  ;;  %v1134_v4 = vadd.f32 %v1904_v40, %v857_v1  ;;  %v740_v5 = vpop.f32.mrf.mxu0 }
  0xea   : > { %v780_v6 = vpop.f32.mrf.mxu1  ;;  %v1699_v7 = vpop.eup %1698  ;;  %1245 = vst [vmem:[%s1912_s18 + $0x130] sm:$0xff] %v1697_v2  ;;  %v1087_v8 = vadd.f32 %v1904_v40, %v740_v5 }
  0xeb   : > { %v1103_v9 = vadd.f32 %v1904_v40, %v780_v6  ;;  %v1701_v10 = vpop.eup %1700  ;;  %1261 = vst [vmem:[%s1912_s18 + $0x1b0] sm:$0xff] %v1699_v7  ;;  %1704 = vtanh.f32 %v1118_v3 }
  0xec   : > { %v1703_v11 = vpop.eup %1702  ;;  %1214 = vst [vmem:[%s1912_s18 + $0x38] sm:$0xff] %v1701_v10  ;;  %1706 = vtanh.f32 %v1134_v4 }
  0xed   : > { %1230 = vst [vmem:[%s1912_s18 + $0xb8] sm:$0xff] %v1703_v11  ;;  %1708 = vtanh.f32 %v1087_v8 }
  0xee   : > { %1710 = vtanh.f32 %v1103_v9 }
  0xf0   : > { %v820_v12 = vpop.f32.mrf.mxu2  ;;  %v860_v13 = vpop.f32.mrf.mxu3 }
  0xf1   : > { %v1705_v14 = vpop.eup %1704  ;;  %v1119_v15 = vadd.f32 %v1904_v40, %v820_v12  ;;  %v1135_v16 = vadd.f32 %v1904_v40, %v860_v13  ;;  %v742_v17 = vpop.f32.mrf.mxu0 }
  0xf2   : > { %v782_v18 = vpop.f32.mrf.mxu1  ;;  %v1707_v19 = vpop.eup %1706  ;;  %1246 = vst [vmem:[%s1912_s18 + $0x138] sm:$0xff] %v1705_v14  ;;  %v1088_v20 = vadd.f32 %v1904_v40, %v742_v17 }
  0xf3   : > { %v1104_v21 = vadd.f32 %v1904_v40, %v782_v18  ;;  %v1709_v22 = vpop.eup %1708  ;;  %1262 = vst [vmem:[%s1912_s18 + $0x1b8] sm:$0xff] %v1707_v19  ;;  %1712 = vtanh.f32 %v1119_v15 }
  0xf4   : > { %v1711_v23 = vpop.eup %1710  ;;  %1215 = vst [vmem:[%s1912_s18 + $0x40] sm:$0xff] %v1709_v22  ;;  %1714 = vtanh.f32 %v1135_v16 }
  0xf5   : > { %1231 = vst [vmem:[%s1912_s18 + $0xc0] sm:$0xff] %v1711_v23  ;;  %1716 = vtanh.f32 %v1088_v20 }
  0xf6   : > { %1718 = vtanh.f32 %v1104_v21 }
  0xf8   : > { %v822_v24 = vpop.f32.mrf.mxu2  ;;  %v862_v25 = vpop.f32.mrf.mxu3 }
  0xf9   : > { %v1713_v26 = vpop.eup %1712  ;;  %v1120_v27 = vadd.f32 %v1904_v40, %v822_v24  ;;  %v1136_v28 = vadd.f32 %v1904_v40, %v862_v25  ;;  %v745_v29 = vpop.f32.mrf.mxu0 }
  0xfa   : > { %v785_v30 = vpop.f32.mrf.mxu1  ;;  %v1715_v31 = vpop.eup %1714  ;;  %1247 = vst [vmem:[%s1912_s18 + $0x140] sm:$0xff] %v1713_v26  ;;  %v1089_v32 = vadd.f32 %v1904_v40, %v745_v29 }
  0xfb   : > { %v1105_v33 = vadd.f32 %v1904_v40, %v785_v30  ;;  %v1717_v34 = vpop.eup %1716  ;;  %1263 = vst [vmem:[%s1912_s18 + $0x1c0] sm:$0xff] %v1715_v31  ;;  %1720 = vtanh.f32 %v1120_v27 }
  0xfc   : > { %v1719_v35 = vpop.eup %1718  ;;  %1216 = vst [vmem:[%s1912_s18 + $0x48] sm:$0xff] %v1717_v34  ;;  %1722 = vtanh.f32 %v1136_v28 }
  0xfd   : > { %1232 = vst [vmem:[%s1912_s18 + $0xc8] sm:$0xff] %v1719_v35  ;;  %1724 = vtanh.f32 %v1089_v32 }
  0xfe   : > { %1726 = vtanh.f32 %v1105_v33 }
 0x100   : > { %v825_v36 = vpop.f32.mrf.mxu2  ;;  %v865_v37 = vpop.f32.mrf.mxu3 }
 0x101   : > { %v1721_v38 = vpop.eup %1720  ;;  %v1121_v39 = vadd.f32 %v1904_v40, %v825_v36  ;;  %v1137_v41 = vadd.f32 %v1904_v40, %v865_v37  ;;  %v747_v42 = vpop.f32.mrf.mxu0 }
 0x102   : > { %v787_v43 = vpop.f32.mrf.mxu1  ;;  %v1723_v44 = vpop.eup %1722  ;;  %1248 = vst [vmem:[%s1912_s18 + $0x148] sm:$0xff] %v1721_v38  ;;  %v1090_v45 = vadd.f32 %v1904_v40, %v747_v42 }
 0x103   : > { %v1106_v46 = vadd.f32 %v1904_v40, %v787_v43  ;;  %v1725_v47 = vpop.eup %1724  ;;  %1264 = vst [vmem:[%s1912_s18 + $0x1c8] sm:$0xff] %v1723_v44  ;;  %1728 = vtanh.f32 %v1121_v39 }
 0x104   : > { %v1727_v48 = vpop.eup %1726  ;;  %1217 = vst [vmem:[%s1912_s18 + $0x50] sm:$0xff] %v1725_v47  ;;  %1730 = vtanh.f32 %v1137_v41 }
 0x105   : > { %1233 = vst [vmem:[%s1912_s18 + $0xd0] sm:$0xff] %v1727_v48  ;;  %1732 = vtanh.f32 %v1090_v45 }
 0x106   : > { %1734 = vtanh.f32 %v1106_v46 }
 0x108   : > { %v827_v49 = vpop.f32.mrf.mxu2  ;;  %v867_v50 = vpop.f32.mrf.mxu3 }
 0x109   : > { %v1729_v51 = vpop.eup %1728  ;;  %v1122_v52 = vadd.f32 %v1904_v40, %v827_v49  ;;  %v1138_v53 = vadd.f32 %v1904_v40, %v867_v50  ;;  %v750_v54 = vpop.f32.mrf.mxu0 }
 0x10a   : > { %v790_v55 = vpop.f32.mrf.mxu1  ;;  %v1731_v56 = vpop.eup %1730  ;;  %1249 = vst [vmem:[%s1912_s18 + $0x150] sm:$0xff] %v1729_v51  ;;  %v1091_v57 = vadd.f32 %v1904_v40, %v750_v54 }
 0x10b   : > { %v1107_v58 = vadd.f32 %v1904_v40, %v790_v55  ;;  %v1733_v59 = vpop.eup %1732  ;;  %1265 = vst [vmem:[%s1912_s18 + $0x1d0] sm:$0xff] %v1731_v56  ;;  %1736 = vtanh.f32 %v1122_v52 }
 0x10c   : > { %v1735_v60 = vpop.eup %1734  ;;  %1218 = vst [vmem:[%s1912_s18 + $0x58] sm:$0xff] %v1733_v59  ;;  %1738 = vtanh.f32 %v1138_v53 }
 0x10d   : > { %1234 = vst [vmem:[%s1912_s18 + $0xd8] sm:$0xff] %v1735_v60  ;;  %1740 = vtanh.f32 %v1091_v57 }
 0x10e   : > { %1742 = vtanh.f32 %v1107_v58 }
 0x110   : > { %v830_v61 = vpop.f32.mrf.mxu2  ;;  %v870_v62 = vpop.f32.mrf.mxu3 }
 0x111   : > { %v1737_v63 = vpop.eup %1736  ;;  %v1123_v0 = vadd.f32 %v1904_v40, %v830_v61  ;;  %v1139_v1 = vadd.f32 %v1904_v40, %v870_v62  ;;  %v752_v2 = vpop.f32.mrf.mxu0 }
 0x112   : > { %v792_v3 = vpop.f32.mrf.mxu1  ;;  %v1739_v4 = vpop.eup %1738  ;;  %1250 = vst [vmem:[%s1912_s18 + $0x158] sm:$0xff] %v1737_v63  ;;  %v1092_v5 = vadd.f32 %v1904_v40, %v752_v2 }
 0x113   : > { %v1108_v6 = vadd.f32 %v1904_v40, %v792_v3  ;;  %v1741_v7 = vpop.eup %1740  ;;  %1266 = vst [vmem:[%s1912_s18 + $0x1d8] sm:$0xff] %v1739_v4  ;;  %1744 = vtanh.f32 %v1123_v0 }
 0x114   : > { %v1743_v8 = vpop.eup %1742  ;;  %1219 = vst [vmem:[%s1912_s18 + $0x60] sm:$0xff] %v1741_v7  ;;  %1746 = vtanh.f32 %v1139_v1 }
 0x115   : > { %1235 = vst [vmem:[%s1912_s18 + $0xe0] sm:$0xff] %v1743_v8  ;;  %1748 = vtanh.f32 %v1092_v5 }
 0x116   : > { %1750 = vtanh.f32 %v1108_v6 }
 0x118   : > { %v832_v9 = vpop.f32.mrf.mxu2  ;;  %v872_v10 = vpop.f32.mrf.mxu3 }
 0x119   : > { %v1745_v11 = vpop.eup %1744  ;;  %v1124_v12 = vadd.f32 %v1904_v40, %v832_v9  ;;  %v1140_v13 = vadd.f32 %v1904_v40, %v872_v10  ;;  %v755_v14 = vpop.f32.mrf.mxu0 }
 0x11a   : > { %v795_v15 = vpop.f32.mrf.mxu1  ;;  %v1747_v16 = vpop.eup %1746  ;;  %1251 = vst [vmem:[%s1912_s18 + $0x160] sm:$0xff] %v1745_v11  ;;  %v1093_v17 = vadd.f32 %v1904_v40, %v755_v14 }
 0x11b   : > { %v1109_v18 = vadd.f32 %v1904_v40, %v795_v15  ;;  %v1749_v19 = vpop.eup %1748  ;;  %1267 = vst [vmem:[%s1912_s18 + $0x1e0] sm:$0xff] %v1747_v16  ;;  %1752 = vtanh.f32 %v1124_v12 }
 0x11c   : > { %v1751_v20 = vpop.eup %1750  ;;  %1220 = vst [vmem:[%s1912_s18 + $0x68] sm:$0xff] %v1749_v19  ;;  %1754 = vtanh.f32 %v1140_v13 }
 0x11d   : > { %1236 = vst [vmem:[%s1912_s18 + $0xe8] sm:$0xff] %v1751_v20  ;;  %1756 = vtanh.f32 %v1093_v17 }
 0x11e   : > { %1758 = vtanh.f32 %v1109_v18 }
 0x120   : > { %v835_v21 = vpop.f32.mrf.mxu2  ;;  %v875_v22 = vpop.f32.mrf.mxu3 }
 0x121   : > { %v1753_v23 = vpop.eup %1752  ;;  %v1125_v24 = vadd.f32 %v1904_v40, %v835_v21  ;;  %v1141_v25 = vadd.f32 %v1904_v40, %v875_v22  ;;  %v757_v26 = vpop.f32.mrf.mxu0 }
 0x122   : > { %v797_v27 = vpop.f32.mrf.mxu1  ;;  %v1755_v28 = vpop.eup %1754  ;;  %1252 = vst [vmem:[%s1912_s18 + $0x168] sm:$0xff] %v1753_v23  ;;  %v1094_v29 = vadd.f32 %v1904_v40, %v757_v26 }
 0x123   : > { %v1110_v30 = vadd.f32 %v1904_v40, %v797_v27  ;;  %v1757_v31 = vpop.eup %1756  ;;  %1268 = vst [vmem:[%s1912_s18 + $0x1e8] sm:$0xff] %v1755_v28  ;;  %1760 = vtanh.f32 %v1125_v24 }
 0x124   : > { %v1759_v32 = vpop.eup %1758  ;;  %1221 = vst [vmem:[%s1912_s18 + $0x70] sm:$0xff] %v1757_v31  ;;  %1762 = vtanh.f32 %v1141_v25 }
 0x125   : > { %1237 = vst [vmem:[%s1912_s18 + $0xf0] sm:$0xff] %v1759_v32  ;;  %1764 = vtanh.f32 %v1094_v29 }
 0x126   : > { %1766 = vtanh.f32 %v1110_v30 }
 0x128   : > { %v837_v33 = vpop.f32.mrf.mxu2  ;;  %v877_v34 = vpop.f32.mrf.mxu3 }
 0x129   : > { %v1761_v35 = vpop.eup %1760  ;;  %v1126_v36 = vadd.f32 %v1904_v40, %v837_v33  ;;  %v1142_v37 = vadd.f32 %v1904_v40, %v877_v34 }
 0x12a   : > { %v1763_v38 = vpop.eup %1762  ;;  %1253 = vst [vmem:[%s1912_s18 + $0x170] sm:$0xff] %v1761_v35 }
 0x12b   : > { %v1765_v39 = vpop.eup %1764  ;;  %1269 = vst [vmem:[%s1912_s18 + $0x1f0] sm:$0xff] %v1763_v38  ;;  %1768 = vtanh.f32 %v1126_v36 }
 0x12c   : > { %v1767_v41 = vpop.eup %1766  ;;  %1222 = vst [vmem:[%s1912_s18 + $0x78] sm:$0xff] %v1765_v39  ;;  %1770 = vtanh.f32 %v1142_v37 }
 0x12d   : > { %1238 = vst [vmem:[%s1912_s18 + $0xf8] sm:$0xff] %v1767_v41 }
 0x131   : > { %v1769_v42 = vpop.eup %1768 }
 0x132   : > { %v1771_v43 = vpop.eup %1770  ;;  %1254 = vst [vmem:[%s1912_s18 + $0x178] sm:$0xff] %v1769_v42 }
 0x133   : > { %1270 = vst [vmem:[%s1912_s18 + $0x1f8] sm:$0xff] %v1771_v43 }
 0x134 PF: > { %s13_s14 = sadd.s32 1, %s1794_s14   ;;  %s2053_s12 = smov %s1790_s13 }
 0x135   : > { %p10_p5 = scmp.ge.s32.totalorder %s13_s14, 6   ;;  %s2054_s13 = smov %s2056_s15 }
 0x137   :  { %12 = sbr.rel (!%p10_p5) target bundleno = 2 (0x2), region = 76 }

</bundles_post_ra>
